<compile_context>
chip_gen: v7x
topology: tpu7x:2x2x1
jax: 0.10.0
libtpu: 0.0.40
codegen_flags: <defaults>
</compile_context>

<pallas_src>
import jax
import jax.numpy as jnp
import numpy as np
from jax.experimental import pallas as pl
from jax.experimental.pallas import tpu as pltpu

KMER = 3
VOCAB = 4 ** KMER          # 64
EMB = 128                  # embedding dim == LSTM input size
HID = 128                  # LSTM hidden size per direction
ATT = 100                  # Bahdanau attention hidden units (RNN_hidden)
ATT_PAD = 128              # zero-padded, lane-aligned attention width
MLP = 32                   # predictor hidden width
BN_EPS = 1e-5


def _sigmoid(z):
    # single EUP tanh instead of exp + reciprocal; mathematically identical
    return 0.5 * (jnp.tanh(0.5 * z) + 1.0)


def hlattn_kernel(x_ref,                       # (B, S, EMB) bf16
                  wihcat_ref, bcat_ref,        # (EMB, 8H) bf16, (1, 8H) f32  [fwd|bwd, biases folded]
                  whhf_ref, whhb_ref,          # (H, 4H) bf16 each
                  w1_ref, b1_ref,              # (2H, ATT_PAD) bf16, (1, ATT_PAD) f32
                  w2_ref, b2_ref,              # (2H, ATT_PAD) bf16, (1, ATT_PAD) f32
                  v_ref,                       # (1, ATT_PAD) f32   (V weight as a row; bias cancels in softmax)
                  p1_ref, bp1_ref,             # (2H, MLP) bf16, (1, MLP) f32
                  bnscale_ref, bnshift_ref,    # (1, MLP) f32 each  (folded eval-mode BatchNorm1d)
                  p2_ref, bp2_ref,             # (1, MLP) f32, (1, 1) f32
                  out_ref,                     # (B, 1) f32
                  seq_ref):                    # scratch (B, S, 2H) f32
    B, S, E = x_ref.shape
    H = HID
    G4 = 4 * H

    # ---------------- hoisted input projection (one big MXU op, biases folded) ----------------
    x2d = x_ref[...].reshape(B * S, E)                                        # bf16
    xproj = (jnp.dot(x2d, wihcat_ref[...], preferred_element_type=jnp.float32)
             + bcat_ref[...])                                                  # (B*S, 8H) f32
    xproj = xproj.reshape(B, S, 2 * G4)

    whh_f = whhf_ref[...]
    whh_b = whhb_ref[...]

    def cell(xg, h, c, whh):
        # PyTorch gate order: i, f, g, o
        g = xg + jnp.dot(h.astype(jnp.bfloat16), whh, preferred_element_type=jnp.float32)
        i = _sigmoid(g[:, 0 * H:1 * H])
        f = _sigmoid(g[:, 1 * H:2 * H])
        gg = jnp.tanh(g[:, 2 * H:3 * H])
        o = _sigmoid(g[:, 3 * H:4 * H])
        c_new = f * c + i * gg
        return o * jnp.tanh(c_new), c_new

    # ------------- fused BiLSTM recurrence: fwd chain at t, bwd chain at S-1-t -------------
    h_f = jnp.zeros((B, H), jnp.float32); c_f = h_f
    h_b = jnp.zeros((B, H), jnp.float32); c_b = h_b
    for t in range(S):                                   # S is small & static -> unrolled
        h_f, c_f = cell(xproj[:, t, :G4], h_f, c_f, whh_f)
        h_b, c_b = cell(xproj[:, S - 1 - t, G4:], h_b, c_b, whh_b)
        seq_ref[:, t, :H] = h_f
        seq_ref[:, S - 1 - t, H:] = h_b

    # ---------------------------- batched Bahdanau attention ----------------------------
    vals = seq_ref[...]                                                        # (B, S, 2H) f32
    vals2d = vals.reshape(B * S, 2 * H)
    w1v = (jnp.dot(vals2d.astype(jnp.bfloat16), w1_ref[...],
                   preferred_element_type=jnp.float32)
           + b1_ref[...]).reshape(B, S, ATT_PAD)                               # (B, S, ATT_PAD)

    # h_n.view(batch, 2*HID): PyTorch views the contiguous (num_dirs, B, HID) buffer as
    # (B, 2*HID) — this mixes direction AND batch rows.  Reproduce exactly with static
    # row selection (B is static & small).
    def flat_row(k):                                     # row k of the flat (2B, HID) h_n
        return h_f[k:k + 1, :] if k < B else h_b[k - B:k - B + 1, :]
    hn = jnp.concatenate(
        [jnp.concatenate([flat_row(2 * r), flat_row(2 * r + 1)], axis=1) for r in range(B)],
        axis=0)                                                                # (B, 2H)

    w2h = (jnp.dot(hn.astype(jnp.bfloat16), w2_ref[...],
                   preferred_element_type=jnp.float32) + b2_ref[...])          # (B, ATT_PAD)

    e = jnp.tanh(w1v + w2h[:, None, :])                                        # (B, S, ATT_PAD)
    # score = e @ V : lane reduce on the VPU/XLU instead of a 1-lane-wide MXU matmul.
    # (The V-layer bias shifts every score equally and cancels in the softmax.)
    score = jnp.sum(e * v_ref[...].reshape(1, 1, ATT_PAD), axis=-1)            # (B, S)

    m = jnp.max(score, axis=1, keepdims=True)
    p = jnp.exp(score - m)
    attn = p * pl.reciprocal(jnp.sum(p, axis=1, keepdims=True), approx=True)   # (B, S)

    context = jnp.sum(vals * attn[:, :, None], axis=1)                         # (B, 2H)

    # -------- predictor: Linear -> BatchNorm1d(eval, folded) -> ReLU -> Dropout(eval) -> Linear --------
    z = (jnp.dot(context.astype(jnp.bfloat16), p1_ref[...],
                 preferred_element_type=jnp.float32) + bp1_ref[...])           # (B, MLP)
    z = z * bnscale_ref[...] + bnshift_ref[...]
    z = jnp.maximum(z, 0.0)
    # final Linear(32 -> 1) as a lane reduction (avoids a 1-wide MXU matmul / masked stores)
    out_ref[...] = jnp.sum(z * p2_ref[...], axis=-1, keepdims=True) + bp2_ref[...]


def hlattn_forward(x_emb, params):
    """x_emb: (B, S, EMB) float32 (already embedded). Returns (B,) float32."""
    B, S, _ = x_emb.shape
    f32, bf16 = jnp.float32, jnp.bfloat16
    pad_a = ATT_PAD - ATT

    # --- wrapper-side layout plumbing (concat / zero-pad / dtype cast / BN fold) ---
    wih_cat = jnp.concatenate([params['wih_f'], params['wih_b']], axis=1).astype(bf16)   # (EMB, 8H)
    b_cat = jnp.concatenate([params['bf'], params['bb']], axis=1).astype(f32)            # (1, 8H)

    w1p = jnp.pad(params['w1'], ((0, 0), (0, pad_a))).astype(bf16)
    w2p = jnp.pad(params['w2'], ((0, 0), (0, pad_a))).astype(bf16)
    b1p = jnp.pad(params['b1'], ((0, 0), (0, pad_a))).astype(f32)
    b2p = jnp.pad(params['b2'], ((0, 0), (0, pad_a))).astype(f32)
    v_row = jnp.pad(params['v'][:, 0].reshape(1, ATT), ((0, 0), (0, pad_a))).astype(f32)

    bn_scale = (params['gamma'] * jax.lax.rsqrt(params['var'] + BN_EPS)).astype(f32)
    bn_shift = (params['beta'] - params['mean'] * bn_scale).astype(f32)
    p2_row = params['p2'][:, 0].reshape(1, MLP).astype(f32)

    args = (x_emb.astype(bf16),
            wih_cat, b_cat,
            params['whh_f'].astype(bf16), params['whh_b'].astype(bf16),
            w1p, b1p, w2p, b2p, v_row,
            params['p1'].astype(bf16), params['bp1'].astype(f32),
            bn_scale, bn_shift, p2_row, params['bp2'].astype(f32))

    out = pl.pallas_call(
        hlattn_kernel,
        out_shape=jax.ShapeDtypeStruct((B, 1), jnp.float32),
        in_specs=[pl.BlockSpec(memory_space=pltpu.MemorySpace.VMEM) for _ in args],
        out_specs=pl.BlockSpec(memory_space=pltpu.MemorySpace.VMEM),
        scratch_shapes=[pltpu.VMEM((B, S, 2 * HID), jnp.float32)],   # fused fwd|bwd LSTM outputs
    )(*args)
    return out[:, 0]                                                 # xout.squeeze()


# ----------------------------- parameter init (deterministic) -----------------------------
def init_params(key):
    ks = jax.random.split(key, 20)
    u = lambda k, shape, s=0.08: jax.random.uniform(k, shape, jnp.float32, -s, s)

    emb_raw = jax.random.normal(ks[0], (VOCAB, EMB), jnp.float32)
    # nn.Embedding(max_norm=True): rows with L2 norm > 1 are rescaled to norm 1
    norm = jnp.linalg.norm(emb_raw, axis=1, keepdims=True)
    emb = emb_raw * jnp.where(norm > 1.0, 1.0 / (norm + 1e-7), 1.0)

    return dict(
        emb=emb,
        wih_f=u(ks[1], (EMB, 4 * HID)), whh_f=u(ks[2], (HID, 4 * HID)),
        bf=u(ks[3], (1, 4 * HID)) + u(ks[4], (1, 4 * HID)),        # b_ih + b_hh
        wih_b=u(ks[5], (EMB, 4 * HID)), whh_b=u(ks[6], (HID, 4 * HID)),
        bb=u(ks[7], (1, 4 * HID)) + u(ks[8], (1, 4 * HID)),
        w1=u(ks[9], (2 * HID, ATT)),  b1=u(ks[10], (1, ATT)),
        w2=u(ks[11], (2 * HID, ATT)), b2=u(ks[12], (1, ATT)),
        v=u(ks[13], (ATT, 1)),        bv=u(ks[14], (1, 1)),
        p1=u(ks[15], (2 * HID, MLP)), bp1=u(ks[16], (1, MLP)),
        gamma=jnp.ones((1, MLP), jnp.float32),
        beta=jnp.zeros((1, MLP), jnp.float32),
        mean=jnp.zeros((1, MLP), jnp.float32),
        var=jnp.ones((1, MLP), jnp.float32),
        p2=u(ks[17], (MLP, 1)),       bp2=u(ks[18], (1, 1)),
    )


# ----------------------------- pure-JAX reference for cross-check -----------------------------
def reference_forward(inputs, p):
    x = p['emb'][inputs]                                         # (B, S, EMB); dropout=eval identity
    B, S, _ = x.shape

    def run_direction(xs, w_ih, w_hh, b):
        def step(carry, x_t):
            h, c = carry
            g = x_t @ w_ih + h @ w_hh + b[0]
            i, f, gg, o = jnp.split(g, 4, axis=-1)
            i = jax.nn.sigmoid(i); f = jax.nn.sigmoid(f)
            gg = jnp.tanh(gg); o = jax.nn.sigmoid(o)
            c = f * c + i * gg
            h = o * jnp.tanh(c)
            return (h, c), h
        h0 = jnp.zeros((B, HID), jnp.float32)
        (h_last, _), hs = jax.lax.scan(step, (h0, h0), jnp.swapaxes(xs, 0, 1))
        return h_last, jnp.swapaxes(hs, 0, 1)

    hf, out_f = run_direction(x, p['wih_f'], p['whh_f'], p['bf'])
    hb, out_b_rev = run_direction(x[:, ::-1, :], p['wih_b'], p['whh_b'], p['bb'])
    output = jnp.concatenate([out_f, out_b_rev[:, ::-1, :]], axis=-1)   # (B, S, 2*HID)

    h_n = jnp.stack([hf, hb], axis=0).reshape(B, 2 * HID)               # torch .view semantics

    w1v = output @ p['w1'] + p['b1'][0]
    w2h = h_n @ p['w2'] + p['b2'][0]
    score = jnp.tanh(w1v + w2h[:, None, :]) @ p['v'] + p['bv'][0]       # (B, S, 1)
    attn = jax.nn.softmax(score, axis=1)
    context = jnp.sum(output * attn, axis=1)                            # (B, 2*HID)

    z = context @ p['p1'] + p['bp1'][0]
    z = (z - p['mean'][0]) / jnp.sqrt(p['var'][0] + BN_EPS) * p['gamma'][0] + p['beta'][0]
    z = jnp.maximum(z, 0.0)
    out = z @ p['p2'] + p['bp2'][0]
    return out[:, 0]


if __name__ == "__main__":
    key = jax.random.PRNGKey(0)
    k_in, k_par = jax.random.split(key)

    B, S = 2, 8
    inputs = jax.random.randint(k_in, (B, S), 0, VOCAB)                 # kmer token ids
    params = init_params(k_par)

    # Embedding gather in glue (pure indexing); dropout is eval-mode identity.
    x_emb = params['emb'][inputs].astype(jnp.float32)                   # (B, S, EMB)

    out = jax.block_until_ready(jax.jit(hlattn_forward)(x_emb, params))

    ref = jax.block_until_ready(reference_forward(inputs, params))
    np.testing.assert_allclose(np.asarray(out), np.asarray(ref), rtol=5e-2, atol=5e-2)

    print("KERNEL_OK")
</pallas_src>

<mosaic_0001>
module attributes {stable_mosaic.version = 11 : i64} {
  func.func @hlattn_kernel(%arg0: memref<2x8x128xbf16, #tpu.memory_space<vmem>>, %arg1: memref<128x1024xbf16, #tpu.memory_space<vmem>>, %arg2: memref<1x1024xf32, #tpu.memory_space<vmem>>, %arg3: memref<128x512xbf16, #tpu.memory_space<vmem>>, %arg4: memref<128x512xbf16, #tpu.memory_space<vmem>>, %arg5: memref<256x128xbf16, #tpu.memory_space<vmem>>, %arg6: memref<1x128xf32, #tpu.memory_space<vmem>>, %arg7: memref<256x128xbf16, #tpu.memory_space<vmem>>, %arg8: memref<1x128xf32, #tpu.memory_space<vmem>>, %arg9: memref<1x128xf32, #tpu.memory_space<vmem>>, %arg10: memref<256x32xbf16, #tpu.memory_space<vmem>>, %arg11: memref<1x32xf32, #tpu.memory_space<vmem>>, %arg12: memref<1x32xf32, #tpu.memory_space<vmem>>, %arg13: memref<1x32xf32, #tpu.memory_space<vmem>>, %arg14: memref<1x32xf32, #tpu.memory_space<vmem>>, %arg15: memref<1x1xf32, #tpu.memory_space<vmem>>, %arg16: memref<2x1xf32, #tpu.memory_space<vmem>>, %arg17: memref<2x8x256xf32, #tpu.memory_space<vmem>>) attributes {dimension_semantics = [], scalar_prefetch = 0 : i64, scratch_operands = 1 : i64, tpu.core_type = #tpu.core_type<tc>} {
    %c0 = arith.constant 0 : index
    %c0_0 = arith.constant 0 : index
    %c0_1 = arith.constant 0 : index
    %0 = vector.load %arg0[%c0, %c0_0, %c0_1] : memref<2x8x128xbf16, #tpu.memory_space<vmem>>, vector<2x8x128xbf16>
    %1 = vector.shape_cast %0 : vector<2x8x128xbf16> to vector<16x128xbf16>
    %c0_2 = arith.constant 0 : index
    %c0_3 = arith.constant 0 : index
    %2 = vector.load %arg1[%c0_2, %c0_3] : memref<128x1024xbf16, #tpu.memory_space<vmem>>, vector<128x1024xbf16>
    %cst = arith.constant dense<0.000000e+00> : vector<16x1024xf32>
    %3 = tpu.matmul %1, %2, %cst {dimension_numbers = #tpu.dot_dimension_numbers<[1], [0], [0], [1], [0, 0, 1, 1], [], []>} : vector<16x128xbf16>, vector<128x1024xbf16>, vector<16x1024xf32> -> vector<16x1024xf32>
    %c0_4 = arith.constant 0 : index
    %c0_5 = arith.constant 0 : index
    %4 = vector.load %arg2[%c0_4, %c0_5] : memref<1x1024xf32, #tpu.memory_space<vmem>>, vector<1x1024xf32>
    %5 = vector.broadcast %4 : vector<1x1024xf32> to vector<16x1024xf32>
    %6 = arith.addf %3, %5 : vector<16x1024xf32>
    %7 = vector.shape_cast %6 : vector<16x1024xf32> to vector<2x8x1024xf32>
    %c0_6 = arith.constant 0 : index
    %c0_7 = arith.constant 0 : index
    %8 = vector.load %arg3[%c0_6, %c0_7] : memref<128x512xbf16, #tpu.memory_space<vmem>>, vector<128x512xbf16>
    %c0_8 = arith.constant 0 : index
    %c0_9 = arith.constant 0 : index
    %9 = vector.load %arg4[%c0_8, %c0_9] : memref<128x512xbf16, #tpu.memory_space<vmem>>, vector<128x512xbf16>
    %cst_10 = arith.constant 0.000000e+00 : f32
    %10 = vector.broadcast %cst_10 : f32 to vector<2x128xf32>
    %cst_11 = arith.constant 0.000000e+00 : f32
    %11 = vector.broadcast %cst_11 : f32 to vector<2x128xf32>
    %12 = vector.extract_strided_slice %7 {offsets = [0, 0, 0], sizes = [2, 1, 512], strides = [1, 1, 1]} : vector<2x8x1024xf32> to vector<2x1x512xf32>
    %13 = vector.shape_cast %12 : vector<2x1x512xf32> to vector<2x512xf32>
    %14 = arith.truncf %10 : vector<2x128xf32> to vector<2x128xbf16>
    %cst_12 = arith.constant dense<0.000000e+00> : vector<2x512xf32>
    %15 = tpu.matmul %14, %8, %cst_12 {dimension_numbers = #tpu.dot_dimension_numbers<[1], [0], [0], [1], [0, 0, 1, 1], [], []>} : vector<2x128xbf16>, vector<128x512xbf16>, vector<2x512xf32> -> vector<2x512xf32>
    %16 = arith.addf %13, %15 : vector<2x512xf32>
    %17 = vector.extract_strided_slice %16 {offsets = [0, 0], sizes = [2, 128], strides = [1, 1]} : vector<2x512xf32> to vector<2x128xf32>
    %cst_13 = arith.constant 5.000000e-01 : f32
    %18 = vector.broadcast %cst_13 : f32 to vector<2x128xf32>
    %19 = arith.mulf %18, %17 : vector<2x128xf32>
    %20 = math.tanh %19 : vector<2x128xf32>
    %cst_14 = arith.constant 1.000000e+00 : f32
    %21 = vector.broadcast %cst_14 : f32 to vector<2x128xf32>
    %22 = arith.addf %20, %21 : vector<2x128xf32>
    %cst_15 = arith.constant 5.000000e-01 : f32
    %23 = vector.broadcast %cst_15 : f32 to vector<2x128xf32>
    %24 = arith.mulf %23, %22 : vector<2x128xf32>
    %25 = vector.extract_strided_slice %16 {offsets = [0, 128], sizes = [2, 128], strides = [1, 1]} : vector<2x512xf32> to vector<2x128xf32>
    %cst_16 = arith.constant 5.000000e-01 : f32
    %26 = vector.broadcast %cst_16 : f32 to vector<2x128xf32>
    %27 = arith.mulf %26, %25 : vector<2x128xf32>
    %28 = math.tanh %27 : vector<2x128xf32>
    %cst_17 = arith.constant 1.000000e+00 : f32
    %29 = vector.broadcast %cst_17 : f32 to vector<2x128xf32>
    %30 = arith.addf %28, %29 : vector<2x128xf32>
    %cst_18 = arith.constant 5.000000e-01 : f32
    %31 = vector.broadcast %cst_18 : f32 to vector<2x128xf32>
    %32 = arith.mulf %31, %30 : vector<2x128xf32>
    %33 = vector.extract_strided_slice %16 {offsets = [0, 256], sizes = [2, 128], strides = [1, 1]} : vector<2x512xf32> to vector<2x128xf32>
    %34 = math.tanh %33 : vector<2x128xf32>
    %35 = vector.extract_strided_slice %16 {offsets = [0, 384], sizes = [2, 128], strides = [1, 1]} : vector<2x512xf32> to vector<2x128xf32>
    %cst_19 = arith.constant 5.000000e-01 : f32
    %36 = vector.broadcast %cst_19 : f32 to vector<2x128xf32>
    %37 = arith.mulf %36, %35 : vector<2x128xf32>
    %38 = math.tanh %37 : vector<2x128xf32>
    %cst_20 = arith.constant 1.000000e+00 : f32
    %39 = vector.broadcast %cst_20 : f32 to vector<2x128xf32>
    %40 = arith.addf %38, %39 : vector<2x128xf32>
    %cst_21 = arith.constant 5.000000e-01 : f32
    %41 = vector.broadcast %cst_21 : f32 to vector<2x128xf32>
    %42 = arith.mulf %41, %40 : vector<2x128xf32>
    %43 = arith.mulf %32, %10 : vector<2x128xf32>
    %44 = arith.mulf %24, %34 : vector<2x128xf32>
    %45 = arith.addf %43, %44 : vector<2x128xf32>
    %46 = math.tanh %45 : vector<2x128xf32>
    %47 = arith.mulf %42, %46 : vector<2x128xf32>
    %48 = vector.extract_strided_slice %7 {offsets = [0, 7, 512], sizes = [2, 1, 512], strides = [1, 1, 1]} : vector<2x8x1024xf32> to vector<2x1x512xf32>
    %49 = vector.shape_cast %48 : vector<2x1x512xf32> to vector<2x512xf32>
    %50 = arith.truncf %11 : vector<2x128xf32> to vector<2x128xbf16>
    %cst_22 = arith.constant dense<0.000000e+00> : vector<2x512xf32>
    %51 = tpu.matmul %50, %9, %cst_22 {dimension_numbers = #tpu.dot_dimension_numbers<[1], [0], [0], [1], [0, 0, 1, 1], [], []>} : vector<2x128xbf16>, vector<128x512xbf16>, vector<2x512xf32> -> vector<2x512xf32>
    %52 = arith.addf %49, %51 : vector<2x512xf32>
    %53 = vector.extract_strided_slice %52 {offsets = [0, 0], sizes = [2, 128], strides = [1, 1]} : vector<2x512xf32> to vector<2x128xf32>
    %cst_23 = arith.constant 5.000000e-01 : f32
    %54 = vector.broadcast %cst_23 : f32 to vector<2x128xf32>
    %55 = arith.mulf %54, %53 : vector<2x128xf32>
    %56 = math.tanh %55 : vector<2x128xf32>
    %cst_24 = arith.constant 1.000000e+00 : f32
    %57 = vector.broadcast %cst_24 : f32 to vector<2x128xf32>
    %58 = arith.addf %56, %57 : vector<2x128xf32>
    %cst_25 = arith.constant 5.000000e-01 : f32
    %59 = vector.broadcast %cst_25 : f32 to vector<2x128xf32>
    %60 = arith.mulf %59, %58 : vector<2x128xf32>
    %61 = vector.extract_strided_slice %52 {offsets = [0, 128], sizes = [2, 128], strides = [1, 1]} : vector<2x512xf32> to vector<2x128xf32>
    %cst_26 = arith.constant 5.000000e-01 : f32
    %62 = vector.broadcast %cst_26 : f32 to vector<2x128xf32>
    %63 = arith.mulf %62, %61 : vector<2x128xf32>
    %64 = math.tanh %63 : vector<2x128xf32>
    %cst_27 = arith.constant 1.000000e+00 : f32
    %65 = vector.broadcast %cst_27 : f32 to vector<2x128xf32>
    %66 = arith.addf %64, %65 : vector<2x128xf32>
    %cst_28 = arith.constant 5.000000e-01 : f32
    %67 = vector.broadcast %cst_28 : f32 to vector<2x128xf32>
    %68 = arith.mulf %67, %66 : vector<2x128xf32>
    %69 = vector.extract_strided_slice %52 {offsets = [0, 256], sizes = [2, 128], strides = [1, 1]} : vector<2x512xf32> to vector<2x128xf32>
    %70 = math.tanh %69 : vector<2x128xf32>
    %71 = vector.extract_strided_slice %52 {offsets = [0, 384], sizes = [2, 128], strides = [1, 1]} : vector<2x512xf32> to vector<2x128xf32>
    %cst_29 = arith.constant 5.000000e-01 : f32
    %72 = vector.broadcast %cst_29 : f32 to vector<2x128xf32>
    %73 = arith.mulf %72, %71 : vector<2x128xf32>
    %74 = math.tanh %73 : vector<2x128xf32>
    %cst_30 = arith.constant 1.000000e+00 : f32
    %75 = vector.broadcast %cst_30 : f32 to vector<2x128xf32>
    %76 = arith.addf %74, %75 : vector<2x128xf32>
    %cst_31 = arith.constant 5.000000e-01 : f32
    %77 = vector.broadcast %cst_31 : f32 to vector<2x128xf32>
    %78 = arith.mulf %77, %76 : vector<2x128xf32>
    %79 = arith.mulf %68, %11 : vector<2x128xf32>
    %80 = arith.mulf %60, %70 : vector<2x128xf32>
    %81 = arith.addf %79, %80 : vector<2x128xf32>
    %82 = math.tanh %81 : vector<2x128xf32>
    %83 = arith.mulf %78, %82 : vector<2x128xf32>
    %c0_32 = arith.constant 0 : index
    %c0_33 = arith.constant 0 : index
    %c0_34 = arith.constant 0 : index
    %84 = vector.load %arg17[%c0_32, %c0_33, %c0_34] : memref<2x8x256xf32, #tpu.memory_space<vmem>>, vector<2x1x128xf32>
    %85 = vector.shape_cast %84 : vector<2x1x128xf32> to vector<2x128xf32>
    %86 = vector.shape_cast %47 : vector<2x128xf32> to vector<2x1x128xf32>
    tpu.vector_store %arg17[%c0_32, %c0_33, %c0_34], %86 {strides = array<i32>} : memref<2x8x256xf32, #tpu.memory_space<vmem>>, vector<2x1x128xf32>,
    %c0_35 = arith.constant 0 : index
    %c7 = arith.constant 7 : index
    %c128 = arith.constant 128 : index
    %87 = vector.load %arg17[%c0_35, %c7, %c128] : memref<2x8x256xf32, #tpu.memory_space<vmem>>, vector<2x1x128xf32>
    %88 = vector.shape_cast %87 : vector<2x1x128xf32> to vector<2x128xf32>
    %89 = vector.shape_cast %83 : vector<2x128xf32> to vector<2x1x128xf32>
    tpu.vector_store %arg17[%c0_35, %c7, %c128], %89 {strides = array<i32>} : memref<2x8x256xf32, #tpu.memory_space<vmem>>, vector<2x1x128xf32>,
    %90 = vector.extract_strided_slice %7 {offsets = [0, 1, 0], sizes = [2, 1, 512], strides = [1, 1, 1]} : vector<2x8x1024xf32> to vector<2x1x512xf32>
    %91 = vector.shape_cast %90 : vector<2x1x512xf32> to vector<2x512xf32>
    %92 = arith.truncf %47 : vector<2x128xf32> to vector<2x128xbf16>
    %cst_36 = arith.constant dense<0.000000e+00> : vector<2x512xf32>
    %93 = tpu.matmul %92, %8, %cst_36 {dimension_numbers = #tpu.dot_dimension_numbers<[1], [0], [0], [1], [0, 0, 1, 1], [], []>} : vector<2x128xbf16>, vector<128x512xbf16>, vector<2x512xf32> -> vector<2x512xf32>
    %94 = arith.addf %91, %93 : vector<2x512xf32>
    %95 = vector.extract_strided_slice %94 {offsets = [0, 0], sizes = [2, 128], strides = [1, 1]} : vector<2x512xf32> to vector<2x128xf32>
    %cst_37 = arith.constant 5.000000e-01 : f32
    %96 = vector.broadcast %cst_37 : f32 to vector<2x128xf32>
    %97 = arith.mulf %96, %95 : vector<2x128xf32>
    %98 = math.tanh %97 : vector<2x128xf32>
    %cst_38 = arith.constant 1.000000e+00 : f32
    %99 = vector.broadcast %cst_38 : f32 to vector<2x128xf32>
    %100 = arith.addf %98, %99 : vector<2x128xf32>
    %cst_39 = arith.constant 5.000000e-01 : f32
    %101 = vector.broadcast %cst_39 : f32 to vector<2x128xf32>
    %102 = arith.mulf %101, %100 : vector<2x128xf32>
    %103 = vector.extract_strided_slice %94 {offsets = [0, 128], sizes = [2, 128], strides = [1, 1]} : vector<2x512xf32> to vector<2x128xf32>
    %cst_40 = arith.constant 5.000000e-01 : f32
    %104 = vector.broadcast %cst_40 : f32 to vector<2x128xf32>
    %105 = arith.mulf %104, %103 : vector<2x128xf32>
    %106 = math.tanh %105 : vector<2x128xf32>
    %cst_41 = arith.constant 1.000000e+00 : f32
    %107 = vector.broadcast %cst_41 : f32 to vector<2x128xf32>
    %108 = arith.addf %106, %107 : vector<2x128xf32>
    %cst_42 = arith.constant 5.000000e-01 : f32
    %109 = vector.broadcast %cst_42 : f32 to vector<2x128xf32>
    %110 = arith.mulf %109, %108 : vector<2x128xf32>
    %111 = vector.extract_strided_slice %94 {offsets = [0, 256], sizes = [2, 128], strides = [1, 1]} : vector<2x512xf32> to vector<2x128xf32>
    %112 = math.tanh %111 : vector<2x128xf32>
    %113 = vector.extract_strided_slice %94 {offsets = [0, 384], sizes = [2, 128], strides = [1, 1]} : vector<2x512xf32> to vector<2x128xf32>
    %cst_43 = arith.constant 5.000000e-01 : f32
    %114 = vector.broadcast %cst_43 : f32 to vector<2x128xf32>
    %115 = arith.mulf %114, %113 : vector<2x128xf32>
    %116 = math.tanh %115 : vector<2x128xf32>
    %cst_44 = arith.constant 1.000000e+00 : f32
    %117 = vector.broadcast %cst_44 : f32 to vector<2x128xf32>
    %118 = arith.addf %116, %117 : vector<2x128xf32>
    %cst_45 = arith.constant 5.000000e-01 : f32
    %119 = vector.broadcast %cst_45 : f32 to vector<2x128xf32>
    %120 = arith.mulf %119, %118 : vector<2x128xf32>
    %121 = arith.mulf %110, %45 : vector<2x128xf32>
    %122 = arith.mulf %102, %112 : vector<2x128xf32>
    %123 = arith.addf %121, %122 : vector<2x128xf32>
    %124 = math.tanh %123 : vector<2x128xf32>
    %125 = arith.mulf %120, %124 : vector<2x128xf32>
    %126 = vector.extract_strided_slice %7 {offsets = [0, 6, 512], sizes = [2, 1, 512], strides = [1, 1, 1]} : vector<2x8x1024xf32> to vector<2x1x512xf32>
    %127 = vector.shape_cast %126 : vector<2x1x512xf32> to vector<2x512xf32>
    %128 = arith.truncf %83 : vector<2x128xf32> to vector<2x128xbf16>
    %cst_46 = arith.constant dense<0.000000e+00> : vector<2x512xf32>
    %129 = tpu.matmul %128, %9, %cst_46 {dimension_numbers = #tpu.dot_dimension_numbers<[1], [0], [0], [1], [0, 0, 1, 1], [], []>} : vector<2x128xbf16>, vector<128x512xbf16>, vector<2x512xf32> -> vector<2x512xf32>
    %130 = arith.addf %127, %129 : vector<2x512xf32>
    %131 = vector.extract_strided_slice %130 {offsets = [0, 0], sizes = [2, 128], strides = [1, 1]} : vector<2x512xf32> to vector<2x128xf32>
    %cst_47 = arith.constant 5.000000e-01 : f32
    %132 = vector.broadcast %cst_47 : f32 to vector<2x128xf32>
    %133 = arith.mulf %132, %131 : vector<2x128xf32>
    %134 = math.tanh %133 : vector<2x128xf32>
    %cst_48 = arith.constant 1.000000e+00 : f32
    %135 = vector.broadcast %cst_48 : f32 to vector<2x128xf32>
    %136 = arith.addf %134, %135 : vector<2x128xf32>
    %cst_49 = arith.constant 5.000000e-01 : f32
    %137 = vector.broadcast %cst_49 : f32 to vector<2x128xf32>
    %138 = arith.mulf %137, %136 : vector<2x128xf32>
    %139 = vector.extract_strided_slice %130 {offsets = [0, 128], sizes = [2, 128], strides = [1, 1]} : vector<2x512xf32> to vector<2x128xf32>
    %cst_50 = arith.constant 5.000000e-01 : f32
    %140 = vector.broadcast %cst_50 : f32 to vector<2x128xf32>
    %141 = arith.mulf %140, %139 : vector<2x128xf32>
    %142 = math.tanh %141 : vector<2x128xf32>
    %cst_51 = arith.constant 1.000000e+00 : f32
    %143 = vector.broadcast %cst_51 : f32 to vector<2x128xf32>
    %144 = arith.addf %142, %143 : vector<2x128xf32>
    %cst_52 = arith.constant 5.000000e-01 : f32
    %145 = vector.broadcast %cst_52 : f32 to vector<2x128xf32>
    %146 = arith.mulf %145, %144 : vector<2x128xf32>
    %147 = vector.extract_strided_slice %130 {offsets = [0, 256], sizes = [2, 128], strides = [1, 1]} : vector<2x512xf32> to vector<2x128xf32>
    %148 = math.tanh %147 : vector<2x128xf32>
    %149 = vector.extract_strided_slice %130 {offsets = [0, 384], sizes = [2, 128], strides = [1, 1]} : vector<2x512xf32> to vector<2x128xf32>
    %cst_53 = arith.constant 5.000000e-01 : f32
    %150 = vector.broadcast %cst_53 : f32 to vector<2x128xf32>
    %151 = arith.mulf %150, %149 : vector<2x128xf32>
    %152 = math.tanh %151 : vector<2x128xf32>
    %cst_54 = arith.constant 1.000000e+00 : f32
    %153 = vector.broadcast %cst_54 : f32 to vector<2x128xf32>
    %154 = arith.addf %152, %153 : vector<2x128xf32>
    %cst_55 = arith.constant 5.000000e-01 : f32
    %155 = vector.broadcast %cst_55 : f32 to vector<2x128xf32>
    %156 = arith.mulf %155, %154 : vector<2x128xf32>
    %157 = arith.mulf %146, %81 : vector<2x128xf32>
    %158 = arith.mulf %138, %148 : vector<2x128xf32>
    %159 = arith.addf %157, %158 : vector<2x128xf32>
    %160 = math.tanh %159 : vector<2x128xf32>
    %161 = arith.mulf %156, %160 : vector<2x128xf32>
    %c0_56 = arith.constant 0 : index
    %c1 = arith.constant 1 : index
    %c0_57 = arith.constant 0 : index
    %162 = vector.load %arg17[%c0_56, %c1, %c0_57] : memref<2x8x256xf32, #tpu.memory_space<vmem>>, vector<2x1x128xf32>
    %163 = vector.shape_cast %162 : vector<2x1x128xf32> to vector<2x128xf32>
    %164 = vector.shape_cast %125 : vector<2x128xf32> to vector<2x1x128xf32>
    tpu.vector_store %arg17[%c0_56, %c1, %c0_57], %164 {strides = array<i32>} : memref<2x8x256xf32, #tpu.memory_space<vmem>>, vector<2x1x128xf32>,
    %c0_58 = arith.constant 0 : index
    %c6 = arith.constant 6 : index
    %c128_59 = arith.constant 128 : index
    %165 = vector.load %arg17[%c0_58, %c6, %c128_59] : memref<2x8x256xf32, #tpu.memory_space<vmem>>, vector<2x1x128xf32>
    %166 = vector.shape_cast %165 : vector<2x1x128xf32> to vector<2x128xf32>
    %167 = vector.shape_cast %161 : vector<2x128xf32> to vector<2x1x128xf32>
    tpu.vector_store %arg17[%c0_58, %c6, %c128_59], %167 {strides = array<i32>} : memref<2x8x256xf32, #tpu.memory_space<vmem>>, vector<2x1x128xf32>,
    %168 = vector.extract_strided_slice %7 {offsets = [0, 2, 0], sizes = [2, 1, 512], strides = [1, 1, 1]} : vector<2x8x1024xf32> to vector<2x1x512xf32>
    %169 = vector.shape_cast %168 : vector<2x1x512xf32> to vector<2x512xf32>
    %170 = arith.truncf %125 : vector<2x128xf32> to vector<2x128xbf16>
    %cst_60 = arith.constant dense<0.000000e+00> : vector<2x512xf32>
    %171 = tpu.matmul %170, %8, %cst_60 {dimension_numbers = #tpu.dot_dimension_numbers<[1], [0], [0], [1], [0, 0, 1, 1], [], []>} : vector<2x128xbf16>, vector<128x512xbf16>, vector<2x512xf32> -> vector<2x512xf32>
    %172 = arith.addf %169, %171 : vector<2x512xf32>
    %173 = vector.extract_strided_slice %172 {offsets = [0, 0], sizes = [2, 128], strides = [1, 1]} : vector<2x512xf32> to vector<2x128xf32>
    %cst_61 = arith.constant 5.000000e-01 : f32
    %174 = vector.broadcast %cst_61 : f32 to vector<2x128xf32>
    %175 = arith.mulf %174, %173 : vector<2x128xf32>
    %176 = math.tanh %175 : vector<2x128xf32>
    %cst_62 = arith.constant 1.000000e+00 : f32
    %177 = vector.broadcast %cst_62 : f32 to vector<2x128xf32>
    %178 = arith.addf %176, %177 : vector<2x128xf32>
    %cst_63 = arith.constant 5.000000e-01 : f32
    %179 = vector.broadcast %cst_63 : f32 to vector<2x128xf32>
    %180 = arith.mulf %179, %178 : vector<2x128xf32>
    %181 = vector.extract_strided_slice %172 {offsets = [0, 128], sizes = [2, 128], strides = [1, 1]} : vector<2x512xf32> to vector<2x128xf32>
    %cst_64 = arith.constant 5.000000e-01 : f32
    %182 = vector.broadcast %cst_64 : f32 to vector<2x128xf32>
    %183 = arith.mulf %182, %181 : vector<2x128xf32>
    %184 = math.tanh %183 : vector<2x128xf32>
    %cst_65 = arith.constant 1.000000e+00 : f32
    %185 = vector.broadcast %cst_65 : f32 to vector<2x128xf32>
    %186 = arith.addf %184, %185 : vector<2x128xf32>
    %cst_66 = arith.constant 5.000000e-01 : f32
    %187 = vector.broadcast %cst_66 : f32 to vector<2x128xf32>
    %188 = arith.mulf %187, %186 : vector<2x128xf32>
    %189 = vector.extract_strided_slice %172 {offsets = [0, 256], sizes = [2, 128], strides = [1, 1]} : vector<2x512xf32> to vector<2x128xf32>
    %190 = math.tanh %189 : vector<2x128xf32>
    %191 = vector.extract_strided_slice %172 {offsets = [0, 384], sizes = [2, 128], strides = [1, 1]} : vector<2x512xf32> to vector<2x128xf32>
    %cst_67 = arith.constant 5.000000e-01 : f32
    %192 = vector.broadcast %cst_67 : f32 to vector<2x128xf32>
    %193 = arith.mulf %192, %191 : vector<2x128xf32>
    %194 = math.tanh %193 : vector<2x128xf32>
    %cst_68 = arith.constant 1.000000e+00 : f32
    %195 = vector.broadcast %cst_68 : f32 to vector<2x128xf32>
    %196 = arith.addf %194, %195 : vector<2x128xf32>
    %cst_69 = arith.constant 5.000000e-01 : f32
    %197 = vector.broadcast %cst_69 : f32 to vector<2x128xf32>
    %198 = arith.mulf %197, %196 : vector<2x128xf32>
    %199 = arith.mulf %188, %123 : vector<2x128xf32>
    %200 = arith.mulf %180, %190 : vector<2x128xf32>
    %201 = arith.addf %199, %200 : vector<2x128xf32>
    %202 = math.tanh %201 : vector<2x128xf32>
    %203 = arith.mulf %198, %202 : vector<2x128xf32>
    %204 = vector.extract_strided_slice %7 {offsets = [0, 5, 512], sizes = [2, 1, 512], strides = [1, 1, 1]} : vector<2x8x1024xf32> to vector<2x1x512xf32>
    %205 = vector.shape_cast %204 : vector<2x1x512xf32> to vector<2x512xf32>
    %206 = arith.truncf %161 : vector<2x128xf32> to vector<2x128xbf16>
    %cst_70 = arith.constant dense<0.000000e+00> : vector<2x512xf32>
    %207 = tpu.matmul %206, %9, %cst_70 {dimension_numbers = #tpu.dot_dimension_numbers<[1], [0], [0], [1], [0, 0, 1, 1], [], []>} : vector<2x128xbf16>, vector<128x512xbf16>, vector<2x512xf32> -> vector<2x512xf32>
    %208 = arith.addf %205, %207 : vector<2x512xf32>
    %209 = vector.extract_strided_slice %208 {offsets = [0, 0], sizes = [2, 128], strides = [1, 1]} : vector<2x512xf32> to vector<2x128xf32>
    %cst_71 = arith.constant 5.000000e-01 : f32
    %210 = vector.broadcast %cst_71 : f32 to vector<2x128xf32>
    %211 = arith.mulf %210, %209 : vector<2x128xf32>
    %212 = math.tanh %211 : vector<2x128xf32>
    %cst_72 = arith.constant 1.000000e+00 : f32
    %213 = vector.broadcast %cst_72 : f32 to vector<2x128xf32>
    %214 = arith.addf %212, %213 : vector<2x128xf32>
    %cst_73 = arith.constant 5.000000e-01 : f32
    %215 = vector.broadcast %cst_73 : f32 to vector<2x128xf32>
    %216 = arith.mulf %215, %214 : vector<2x128xf32>
    %217 = vector.extract_strided_slice %208 {offsets = [0, 128], sizes = [2, 128], strides = [1, 1]} : vector<2x512xf32> to vector<2x128xf32>
    %cst_74 = arith.constant 5.000000e-01 : f32
    %218 = vector.broadcast %cst_74 : f32 to vector<2x128xf32>
    %219 = arith.mulf %218, %217 : vector<2x128xf32>
    %220 = math.tanh %219 : vector<2x128xf32>
    %cst_75 = arith.constant 1.000000e+00 : f32
    %221 = vector.broadcast %cst_75 : f32 to vector<2x128xf32>
    %222 = arith.addf %220, %221 : vector<2x128xf32>
    %cst_76 = arith.constant 5.000000e-01 : f32
    %223 = vector.broadcast %cst_76 : f32 to vector<2x128xf32>
    %224 = arith.mulf %223, %222 : vector<2x128xf32>
    %225 = vector.extract_strided_slice %208 {offsets = [0, 256], sizes = [2, 128], strides = [1, 1]} : vector<2x512xf32> to vector<2x128xf32>
    %226 = math.tanh %225 : vector<2x128xf32>
    %227 = vector.extract_strided_slice %208 {offsets = [0, 384], sizes = [2, 128], strides = [1, 1]} : vector<2x512xf32> to vector<2x128xf32>
    %cst_77 = arith.constant 5.000000e-01 : f32
    %228 = vector.broadcast %cst_77 : f32 to vector<2x128xf32>
    %229 = arith.mulf %228, %227 : vector<2x128xf32>
    %230 = math.tanh %229 : vector<2x128xf32>
    %cst_78 = arith.constant 1.000000e+00 : f32
    %231 = vector.broadcast %cst_78 : f32 to vector<2x128xf32>
    %232 = arith.addf %230, %231 : vector<2x128xf32>
    %cst_79 = arith.constant 5.000000e-01 : f32
    %233 = vector.broadcast %cst_79 : f32 to vector<2x128xf32>
    %234 = arith.mulf %233, %232 : vector<2x128xf32>
    %235 = arith.mulf %224, %159 : vector<2x128xf32>
    %236 = arith.mulf %216, %226 : vector<2x128xf32>
    %237 = arith.addf %235, %236 : vector<2x128xf32>
    %238 = math.tanh %237 : vector<2x128xf32>
    %239 = arith.mulf %234, %238 : vector<2x128xf32>
    %c0_80 = arith.constant 0 : index
    %c2 = arith.constant 2 : index
    %c0_81 = arith.constant 0 : index
    %240 = vector.load %arg17[%c0_80, %c2, %c0_81] : memref<2x8x256xf32, #tpu.memory_space<vmem>>, vector<2x1x128xf32>
    %241 = vector.shape_cast %240 : vector<2x1x128xf32> to vector<2x128xf32>
    %242 = vector.shape_cast %203 : vector<2x128xf32> to vector<2x1x128xf32>
    tpu.vector_store %arg17[%c0_80, %c2, %c0_81], %242 {strides = array<i32>} : memref<2x8x256xf32, #tpu.memory_space<vmem>>, vector<2x1x128xf32>,
    %c0_82 = arith.constant 0 : index
    %c5 = arith.constant 5 : index
    %c128_83 = arith.constant 128 : index
    %243 = vector.load %arg17[%c0_82, %c5, %c128_83] : memref<2x8x256xf32, #tpu.memory_space<vmem>>, vector<2x1x128xf32>
    %244 = vector.shape_cast %243 : vector<2x1x128xf32> to vector<2x128xf32>
    %245 = vector.shape_cast %239 : vector<2x128xf32> to vector<2x1x128xf32>
    tpu.vector_store %arg17[%c0_82, %c5, %c128_83], %245 {strides = array<i32>} : memref<2x8x256xf32, #tpu.memory_space<vmem>>, vector<2x1x128xf32>,
    %246 = vector.extract_strided_slice %7 {offsets = [0, 3, 0], sizes = [2, 1, 512], strides = [1, 1, 1]} : vector<2x8x1024xf32> to vector<2x1x512xf32>
    %247 = vector.shape_cast %246 : vector<2x1x512xf32> to vector<2x512xf32>
    %248 = arith.truncf %203 : vector<2x128xf32> to vector<2x128xbf16>
    %cst_84 = arith.constant dense<0.000000e+00> : vector<2x512xf32>
    %249 = tpu.matmul %248, %8, %cst_84 {dimension_numbers = #tpu.dot_dimension_numbers<[1], [0], [0], [1], [0, 0, 1, 1], [], []>} : vector<2x128xbf16>, vector<128x512xbf16>, vector<2x512xf32> -> vector<2x512xf32>
    %250 = arith.addf %247, %249 : vector<2x512xf32>
    %251 = vector.extract_strided_slice %250 {offsets = [0, 0], sizes = [2, 128], strides = [1, 1]} : vector<2x512xf32> to vector<2x128xf32>
    %cst_85 = arith.constant 5.000000e-01 : f32
    %252 = vector.broadcast %cst_85 : f32 to vector<2x128xf32>
    %253 = arith.mulf %252, %251 : vector<2x128xf32>
    %254 = math.tanh %253 : vector<2x128xf32>
    %cst_86 = arith.constant 1.000000e+00 : f32
    %255 = vector.broadcast %cst_86 : f32 to vector<2x128xf32>
    %256 = arith.addf %254, %255 : vector<2x128xf32>
    %cst_87 = arith.constant 5.000000e-01 : f32
    %257 = vector.broadcast %cst_87 : f32 to vector<2x128xf32>
    %258 = arith.mulf %257, %256 : vector<2x128xf32>
    %259 = vector.extract_strided_slice %250 {offsets = [0, 128], sizes = [2, 128], strides = [1, 1]} : vector<2x512xf32> to vector<2x128xf32>
    %cst_88 = arith.constant 5.000000e-01 : f32
    %260 = vector.broadcast %cst_88 : f32 to vector<2x128xf32>
    %261 = arith.mulf %260, %259 : vector<2x128xf32>
    %262 = math.tanh %261 : vector<2x128xf32>
    %cst_89 = arith.constant 1.000000e+00 : f32
    %263 = vector.broadcast %cst_89 : f32 to vector<2x128xf32>
    %264 = arith.addf %262, %263 : vector<2x128xf32>
    %cst_90 = arith.constant 5.000000e-01 : f32
    %265 = vector.broadcast %cst_90 : f32 to vector<2x128xf32>
    %266 = arith.mulf %265, %264 : vector<2x128xf32>
    %267 = vector.extract_strided_slice %250 {offsets = [0, 256], sizes = [2, 128], strides = [1, 1]} : vector<2x512xf32> to vector<2x128xf32>
    %268 = math.tanh %267 : vector<2x128xf32>
    %269 = vector.extract_strided_slice %250 {offsets = [0, 384], sizes = [2, 128], strides = [1, 1]} : vector<2x512xf32> to vector<2x128xf32>
    %cst_91 = arith.constant 5.000000e-01 : f32
    %270 = vector.broadcast %cst_91 : f32 to vector<2x128xf32>
    %271 = arith.mulf %270, %269 : vector<2x128xf32>
    %272 = math.tanh %271 : vector<2x128xf32>
    %cst_92 = arith.constant 1.000000e+00 : f32
    %273 = vector.broadcast %cst_92 : f32 to vector<2x128xf32>
    %274 = arith.addf %272, %273 : vector<2x128xf32>
    %cst_93 = arith.constant 5.000000e-01 : f32
    %275 = vector.broadcast %cst_93 : f32 to vector<2x128xf32>
    %276 = arith.mulf %275, %274 : vector<2x128xf32>
    %277 = arith.mulf %266, %201 : vector<2x128xf32>
    %278 = arith.mulf %258, %268 : vector<2x128xf32>
    %279 = arith.addf %277, %278 : vector<2x128xf32>
    %280 = math.tanh %279 : vector<2x128xf32>
    %281 = arith.mulf %276, %280 : vector<2x128xf32>
    %282 = vector.extract_strided_slice %7 {offsets = [0, 4, 512], sizes = [2, 1, 512], strides = [1, 1, 1]} : vector<2x8x1024xf32> to vector<2x1x512xf32>
    %283 = vector.shape_cast %282 : vector<2x1x512xf32> to vector<2x512xf32>
    %284 = arith.truncf %239 : vector<2x128xf32> to vector<2x128xbf16>
    %cst_94 = arith.constant dense<0.000000e+00> : vector<2x512xf32>
    %285 = tpu.matmul %284, %9, %cst_94 {dimension_numbers = #tpu.dot_dimension_numbers<[1], [0], [0], [1], [0, 0, 1, 1], [], []>} : vector<2x128xbf16>, vector<128x512xbf16>, vector<2x512xf32> -> vector<2x512xf32>
    %286 = arith.addf %283, %285 : vector<2x512xf32>
    %287 = vector.extract_strided_slice %286 {offsets = [0, 0], sizes = [2, 128], strides = [1, 1]} : vector<2x512xf32> to vector<2x128xf32>
    %cst_95 = arith.constant 5.000000e-01 : f32
    %288 = vector.broadcast %cst_95 : f32 to vector<2x128xf32>
    %289 = arith.mulf %288, %287 : vector<2x128xf32>
    %290 = math.tanh %289 : vector<2x128xf32>
    %cst_96 = arith.constant 1.000000e+00 : f32
    %291 = vector.broadcast %cst_96 : f32 to vector<2x128xf32>
    %292 = arith.addf %290, %291 : vector<2x128xf32>
    %cst_97 = arith.constant 5.000000e-01 : f32
    %293 = vector.broadcast %cst_97 : f32 to vector<2x128xf32>
    %294 = arith.mulf %293, %292 : vector<2x128xf32>
    %295 = vector.extract_strided_slice %286 {offsets = [0, 128], sizes = [2, 128], strides = [1, 1]} : vector<2x512xf32> to vector<2x128xf32>
    %cst_98 = arith.constant 5.000000e-01 : f32
    %296 = vector.broadcast %cst_98 : f32 to vector<2x128xf32>
    %297 = arith.mulf %296, %295 : vector<2x128xf32>
    %298 = math.tanh %297 : vector<2x128xf32>
    %cst_99 = arith.constant 1.000000e+00 : f32
    %299 = vector.broadcast %cst_99 : f32 to vector<2x128xf32>
    %300 = arith.addf %298, %299 : vector<2x128xf32>
    %cst_100 = arith.constant 5.000000e-01 : f32
    %301 = vector.broadcast %cst_100 : f32 to vector<2x128xf32>
    %302 = arith.mulf %301, %300 : vector<2x128xf32>
    %303 = vector.extract_strided_slice %286 {offsets = [0, 256], sizes = [2, 128], strides = [1, 1]} : vector<2x512xf32> to vector<2x128xf32>
    %304 = math.tanh %303 : vector<2x128xf32>
    %305 = vector.extract_strided_slice %286 {offsets = [0, 384], sizes = [2, 128], strides = [1, 1]} : vector<2x512xf32> to vector<2x128xf32>
    %cst_101 = arith.constant 5.000000e-01 : f32
    %306 = vector.broadcast %cst_101 : f32 to vector<2x128xf32>
    %307 = arith.mulf %306, %305 : vector<2x128xf32>
    %308 = math.tanh %307 : vector<2x128xf32>
    %cst_102 = arith.constant 1.000000e+00 : f32
    %309 = vector.broadcast %cst_102 : f32 to vector<2x128xf32>
    %310 = arith.addf %308, %309 : vector<2x128xf32>
    %cst_103 = arith.constant 5.000000e-01 : f32
    %311 = vector.broadcast %cst_103 : f32 to vector<2x128xf32>
    %312 = arith.mulf %311, %310 : vector<2x128xf32>
    %313 = arith.mulf %302, %237 : vector<2x128xf32>
    %314 = arith.mulf %294, %304 : vector<2x128xf32>
    %315 = arith.addf %313, %314 : vector<2x128xf32>
    %316 = math.tanh %315 : vector<2x128xf32>
    %317 = arith.mulf %312, %316 : vector<2x128xf32>
    %c0_104 = arith.constant 0 : index
    %c3 = arith.constant 3 : index
    %c0_105 = arith.constant 0 : index
    %318 = vector.load %arg17[%c0_104, %c3, %c0_105] : memref<2x8x256xf32, #tpu.memory_space<vmem>>, vector<2x1x128xf32>
    %319 = vector.shape_cast %318 : vector<2x1x128xf32> to vector<2x128xf32>
    %320 = vector.shape_cast %281 : vector<2x128xf32> to vector<2x1x128xf32>
    tpu.vector_store %arg17[%c0_104, %c3, %c0_105], %320 {strides = array<i32>} : memref<2x8x256xf32, #tpu.memory_space<vmem>>, vector<2x1x128xf32>,
    %c0_106 = arith.constant 0 : index
    %c4 = arith.constant 4 : index
    %c128_107 = arith.constant 128 : index
    %321 = vector.load %arg17[%c0_106, %c4, %c128_107] : memref<2x8x256xf32, #tpu.memory_space<vmem>>, vector<2x1x128xf32>
    %322 = vector.shape_cast %321 : vector<2x1x128xf32> to vector<2x128xf32>
    %323 = vector.shape_cast %317 : vector<2x128xf32> to vector<2x1x128xf32>
    tpu.vector_store %arg17[%c0_106, %c4, %c128_107], %323 {strides = array<i32>} : memref<2x8x256xf32, #tpu.memory_space<vmem>>, vector<2x1x128xf32>,
    %324 = vector.extract_strided_slice %7 {offsets = [0, 4, 0], sizes = [2, 1, 512], strides = [1, 1, 1]} : vector<2x8x1024xf32> to vector<2x1x512xf32>
    %325 = vector.shape_cast %324 : vector<2x1x512xf32> to vector<2x512xf32>
    %326 = arith.truncf %281 : vector<2x128xf32> to vector<2x128xbf16>
    %cst_108 = arith.constant dense<0.000000e+00> : vector<2x512xf32>
    %327 = tpu.matmul %326, %8, %cst_108 {dimension_numbers = #tpu.dot_dimension_numbers<[1], [0], [0], [1], [0, 0, 1, 1], [], []>} : vector<2x128xbf16>, vector<128x512xbf16>, vector<2x512xf32> -> vector<2x512xf32>
    %328 = arith.addf %325, %327 : vector<2x512xf32>
    %329 = vector.extract_strided_slice %328 {offsets = [0, 0], sizes = [2, 128], strides = [1, 1]} : vector<2x512xf32> to vector<2x128xf32>
    %cst_109 = arith.constant 5.000000e-01 : f32
    %330 = vector.broadcast %cst_109 : f32 to vector<2x128xf32>
    %331 = arith.mulf %330, %329 : vector<2x128xf32>
    %332 = math.tanh %331 : vector<2x128xf32>
    %cst_110 = arith.constant 1.000000e+00 : f32
    %333 = vector.broadcast %cst_110 : f32 to vector<2x128xf32>
    %334 = arith.addf %332, %333 : vector<2x128xf32>
    %cst_111 = arith.constant 5.000000e-01 : f32
    %335 = vector.broadcast %cst_111 : f32 to vector<2x128xf32>
    %336 = arith.mulf %335, %334 : vector<2x128xf32>
    %337 = vector.extract_strided_slice %328 {offsets = [0, 128], sizes = [2, 128], strides = [1, 1]} : vector<2x512xf32> to vector<2x128xf32>
    %cst_112 = arith.constant 5.000000e-01 : f32
    %338 = vector.broadcast %cst_112 : f32 to vector<2x128xf32>
    %339 = arith.mulf %338, %337 : vector<2x128xf32>
    %340 = math.tanh %339 : vector<2x128xf32>
    %cst_113 = arith.constant 1.000000e+00 : f32
    %341 = vector.broadcast %cst_113 : f32 to vector<2x128xf32>
    %342 = arith.addf %340, %341 : vector<2x128xf32>
    %cst_114 = arith.constant 5.000000e-01 : f32
    %343 = vector.broadcast %cst_114 : f32 to vector<2x128xf32>
    %344 = arith.mulf %343, %342 : vector<2x128xf32>
    %345 = vector.extract_strided_slice %328 {offsets = [0, 256], sizes = [2, 128], strides = [1, 1]} : vector<2x512xf32> to vector<2x128xf32>
    %346 = math.tanh %345 : vector<2x128xf32>
    %347 = vector.extract_strided_slice %328 {offsets = [0, 384], sizes = [2, 128], strides = [1, 1]} : vector<2x512xf32> to vector<2x128xf32>
    %cst_115 = arith.constant 5.000000e-01 : f32
    %348 = vector.broadcast %cst_115 : f32 to vector<2x128xf32>
    %349 = arith.mulf %348, %347 : vector<2x128xf32>
    %350 = math.tanh %349 : vector<2x128xf32>
    %cst_116 = arith.constant 1.000000e+00 : f32
    %351 = vector.broadcast %cst_116 : f32 to vector<2x128xf32>
    %352 = arith.addf %350, %351 : vector<2x128xf32>
    %cst_117 = arith.constant 5.000000e-01 : f32
    %353 = vector.broadcast %cst_117 : f32 to vector<2x128xf32>
    %354 = arith.mulf %353, %352 : vector<2x128xf32>
    %355 = arith.mulf %344, %279 : vector<2x128xf32>
    %356 = arith.mulf %336, %346 : vector<2x128xf32>
    %357 = arith.addf %355, %356 : vector<2x128xf32>
    %358 = math.tanh %357 : vector<2x128xf32>
    %359 = arith.mulf %354, %358 : vector<2x128xf32>
    %360 = vector.extract_strided_slice %7 {offsets = [0, 3, 512], sizes = [2, 1, 512], strides = [1, 1, 1]} : vector<2x8x1024xf32> to vector<2x1x512xf32>
    %361 = vector.shape_cast %360 : vector<2x1x512xf32> to vector<2x512xf32>
    %362 = arith.truncf %317 : vector<2x128xf32> to vector<2x128xbf16>
    %cst_118 = arith.constant dense<0.000000e+00> : vector<2x512xf32>
    %363 = tpu.matmul %362, %9, %cst_118 {dimension_numbers = #tpu.dot_dimension_numbers<[1], [0], [0], [1], [0, 0, 1, 1], [], []>} : vector<2x128xbf16>, vector<128x512xbf16>, vector<2x512xf32> -> vector<2x512xf32>
    %364 = arith.addf %361, %363 : vector<2x512xf32>
    %365 = vector.extract_strided_slice %364 {offsets = [0, 0], sizes = [2, 128], strides = [1, 1]} : vector<2x512xf32> to vector<2x128xf32>
    %cst_119 = arith.constant 5.000000e-01 : f32
    %366 = vector.broadcast %cst_119 : f32 to vector<2x128xf32>
    %367 = arith.mulf %366, %365 : vector<2x128xf32>
    %368 = math.tanh %367 : vector<2x128xf32>
    %cst_120 = arith.constant 1.000000e+00 : f32
    %369 = vector.broadcast %cst_120 : f32 to vector<2x128xf32>
    %370 = arith.addf %368, %369 : vector<2x128xf32>
    %cst_121 = arith.constant 5.000000e-01 : f32
    %371 = vector.broadcast %cst_121 : f32 to vector<2x128xf32>
    %372 = arith.mulf %371, %370 : vector<2x128xf32>
    %373 = vector.extract_strided_slice %364 {offsets = [0, 128], sizes = [2, 128], strides = [1, 1]} : vector<2x512xf32> to vector<2x128xf32>
    %cst_122 = arith.constant 5.000000e-01 : f32
    %374 = vector.broadcast %cst_122 : f32 to vector<2x128xf32>
    %375 = arith.mulf %374, %373 : vector<2x128xf32>
    %376 = math.tanh %375 : vector<2x128xf32>
    %cst_123 = arith.constant 1.000000e+00 : f32
    %377 = vector.broadcast %cst_123 : f32 to vector<2x128xf32>
    %378 = arith.addf %376, %377 : vector<2x128xf32>
    %cst_124 = arith.constant 5.000000e-01 : f32
    %379 = vector.broadcast %cst_124 : f32 to vector<2x128xf32>
    %380 = arith.mulf %379, %378 : vector<2x128xf32>
    %381 = vector.extract_strided_slice %364 {offsets = [0, 256], sizes = [2, 128], strides = [1, 1]} : vector<2x512xf32> to vector<2x128xf32>
    %382 = math.tanh %381 : vector<2x128xf32>
    %383 = vector.extract_strided_slice %364 {offsets = [0, 384], sizes = [2, 128], strides = [1, 1]} : vector<2x512xf32> to vector<2x128xf32>
    %cst_125 = arith.constant 5.000000e-01 : f32
    %384 = vector.broadcast %cst_125 : f32 to vector<2x128xf32>
    %385 = arith.mulf %384, %383 : vector<2x128xf32>
    %386 = math.tanh %385 : vector<2x128xf32>
    %cst_126 = arith.constant 1.000000e+00 : f32
    %387 = vector.broadcast %cst_126 : f32 to vector<2x128xf32>
    %388 = arith.addf %386, %387 : vector<2x128xf32>
    %cst_127 = arith.constant 5.000000e-01 : f32
    %389 = vector.broadcast %cst_127 : f32 to vector<2x128xf32>
    %390 = arith.mulf %389, %388 : vector<2x128xf32>
    %391 = arith.mulf %380, %315 : vector<2x128xf32>
    %392 = arith.mulf %372, %382 : vector<2x128xf32>
    %393 = arith.addf %391, %392 : vector<2x128xf32>
    %394 = math.tanh %393 : vector<2x128xf32>
    %395 = arith.mulf %390, %394 : vector<2x128xf32>
    %c0_128 = arith.constant 0 : index
    %c4_129 = arith.constant 4 : index
    %c0_130 = arith.constant 0 : index
    %396 = vector.load %arg17[%c0_128, %c4_129, %c0_130] : memref<2x8x256xf32, #tpu.memory_space<vmem>>, vector<2x1x128xf32>
    %397 = vector.shape_cast %396 : vector<2x1x128xf32> to vector<2x128xf32>
    %398 = vector.shape_cast %359 : vector<2x128xf32> to vector<2x1x128xf32>
    tpu.vector_store %arg17[%c0_128, %c4_129, %c0_130], %398 {strides = array<i32>} : memref<2x8x256xf32, #tpu.memory_space<vmem>>, vector<2x1x128xf32>,
    %c0_131 = arith.constant 0 : index
    %c3_132 = arith.constant 3 : index
    %c128_133 = arith.constant 128 : index
    %399 = vector.load %arg17[%c0_131, %c3_132, %c128_133] : memref<2x8x256xf32, #tpu.memory_space<vmem>>, vector<2x1x128xf32>
    %400 = vector.shape_cast %399 : vector<2x1x128xf32> to vector<2x128xf32>
    %401 = vector.shape_cast %395 : vector<2x128xf32> to vector<2x1x128xf32>
    tpu.vector_store %arg17[%c0_131, %c3_132, %c128_133], %401 {strides = array<i32>} : memref<2x8x256xf32, #tpu.memory_space<vmem>>, vector<2x1x128xf32>,
    %402 = vector.extract_strided_slice %7 {offsets = [0, 5, 0], sizes = [2, 1, 512], strides = [1, 1, 1]} : vector<2x8x1024xf32> to vector<2x1x512xf32>
    %403 = vector.shape_cast %402 : vector<2x1x512xf32> to vector<2x512xf32>
    %404 = arith.truncf %359 : vector<2x128xf32> to vector<2x128xbf16>
    %cst_134 = arith.constant dense<0.000000e+00> : vector<2x512xf32>
    %405 = tpu.matmul %404, %8, %cst_134 {dimension_numbers = #tpu.dot_dimension_numbers<[1], [0], [0], [1], [0, 0, 1, 1], [], []>} : vector<2x128xbf16>, vector<128x512xbf16>, vector<2x512xf32> -> vector<2x512xf32>
    %406 = arith.addf %403, %405 : vector<2x512xf32>
    %407 = vector.extract_strided_slice %406 {offsets = [0, 0], sizes = [2, 128], strides = [1, 1]} : vector<2x512xf32> to vector<2x128xf32>
    %cst_135 = arith.constant 5.000000e-01 : f32
    %408 = vector.broadcast %cst_135 : f32 to vector<2x128xf32>
    %409 = arith.mulf %408, %407 : vector<2x128xf32>
    %410 = math.tanh %409 : vector<2x128xf32>
    %cst_136 = arith.constant 1.000000e+00 : f32
    %411 = vector.broadcast %cst_136 : f32 to vector<2x128xf32>
    %412 = arith.addf %410, %411 : vector<2x128xf32>
    %cst_137 = arith.constant 5.000000e-01 : f32
    %413 = vector.broadcast %cst_137 : f32 to vector<2x128xf32>
    %414 = arith.mulf %413, %412 : vector<2x128xf32>
    %415 = vector.extract_strided_slice %406 {offsets = [0, 128], sizes = [2, 128], strides = [1, 1]} : vector<2x512xf32> to vector<2x128xf32>
    %cst_138 = arith.constant 5.000000e-01 : f32
    %416 = vector.broadcast %cst_138 : f32 to vector<2x128xf32>
    %417 = arith.mulf %416, %415 : vector<2x128xf32>
    %418 = math.tanh %417 : vector<2x128xf32>
    %cst_139 = arith.constant 1.000000e+00 : f32
    %419 = vector.broadcast %cst_139 : f32 to vector<2x128xf32>
    %420 = arith.addf %418, %419 : vector<2x128xf32>
    %cst_140 = arith.constant 5.000000e-01 : f32
    %421 = vector.broadcast %cst_140 : f32 to vector<2x128xf32>
    %422 = arith.mulf %421, %420 : vector<2x128xf32>
    %423 = vector.extract_strided_slice %406 {offsets = [0, 256], sizes = [2, 128], strides = [1, 1]} : vector<2x512xf32> to vector<2x128xf32>
    %424 = math.tanh %423 : vector<2x128xf32>
    %425 = vector.extract_strided_slice %406 {offsets = [0, 384], sizes = [2, 128], strides = [1, 1]} : vector<2x512xf32> to vector<2x128xf32>
    %cst_141 = arith.constant 5.000000e-01 : f32
    %426 = vector.broadcast %cst_141 : f32 to vector<2x128xf32>
    %427 = arith.mulf %426, %425 : vector<2x128xf32>
    %428 = math.tanh %427 : vector<2x128xf32>
    %cst_142 = arith.constant 1.000000e+00 : f32
    %429 = vector.broadcast %cst_142 : f32 to vector<2x128xf32>
    %430 = arith.addf %428, %429 : vector<2x128xf32>
    %cst_143 = arith.constant 5.000000e-01 : f32
    %431 = vector.broadcast %cst_143 : f32 to vector<2x128xf32>
    %432 = arith.mulf %431, %430 : vector<2x128xf32>
    %433 = arith.mulf %422, %357 : vector<2x128xf32>
    %434 = arith.mulf %414, %424 : vector<2x128xf32>
    %435 = arith.addf %433, %434 : vector<2x128xf32>
    %436 = math.tanh %435 : vector<2x128xf32>
    %437 = arith.mulf %432, %436 : vector<2x128xf32>
    %438 = vector.extract_strided_slice %7 {offsets = [0, 2, 512], sizes = [2, 1, 512], strides = [1, 1, 1]} : vector<2x8x1024xf32> to vector<2x1x512xf32>
    %439 = vector.shape_cast %438 : vector<2x1x512xf32> to vector<2x512xf32>
    %440 = arith.truncf %395 : vector<2x128xf32> to vector<2x128xbf16>
    %cst_144 = arith.constant dense<0.000000e+00> : vector<2x512xf32>
    %441 = tpu.matmul %440, %9, %cst_144 {dimension_numbers = #tpu.dot_dimension_numbers<[1], [0], [0], [1], [0, 0, 1, 1], [], []>} : vector<2x128xbf16>, vector<128x512xbf16>, vector<2x512xf32> -> vector<2x512xf32>
    %442 = arith.addf %439, %441 : vector<2x512xf32>
    %443 = vector.extract_strided_slice %442 {offsets = [0, 0], sizes = [2, 128], strides = [1, 1]} : vector<2x512xf32> to vector<2x128xf32>
    %cst_145 = arith.constant 5.000000e-01 : f32
    %444 = vector.broadcast %cst_145 : f32 to vector<2x128xf32>
    %445 = arith.mulf %444, %443 : vector<2x128xf32>
    %446 = math.tanh %445 : vector<2x128xf32>
    %cst_146 = arith.constant 1.000000e+00 : f32
    %447 = vector.broadcast %cst_146 : f32 to vector<2x128xf32>
    %448 = arith.addf %446, %447 : vector<2x128xf32>
    %cst_147 = arith.constant 5.000000e-01 : f32
    %449 = vector.broadcast %cst_147 : f32 to vector<2x128xf32>
    %450 = arith.mulf %449, %448 : vector<2x128xf32>
    %451 = vector.extract_strided_slice %442 {offsets = [0, 128], sizes = [2, 128], strides = [1, 1]} : vector<2x512xf32> to vector<2x128xf32>
    %cst_148 = arith.constant 5.000000e-01 : f32
    %452 = vector.broadcast %cst_148 : f32 to vector<2x128xf32>
    %453 = arith.mulf %452, %451 : vector<2x128xf32>
    %454 = math.tanh %453 : vector<2x128xf32>
    %cst_149 = arith.constant 1.000000e+00 : f32
    %455 = vector.broadcast %cst_149 : f32 to vector<2x128xf32>
    %456 = arith.addf %454, %455 : vector<2x128xf32>
    %cst_150 = arith.constant 5.000000e-01 : f32
    %457 = vector.broadcast %cst_150 : f32 to vector<2x128xf32>
    %458 = arith.mulf %457, %456 : vector<2x128xf32>
    %459 = vector.extract_strided_slice %442 {offsets = [0, 256], sizes = [2, 128], strides = [1, 1]} : vector<2x512xf32> to vector<2x128xf32>
    %460 = math.tanh %459 : vector<2x128xf32>
    %461 = vector.extract_strided_slice %442 {offsets = [0, 384], sizes = [2, 128], strides = [1, 1]} : vector<2x512xf32> to vector<2x128xf32>
    %cst_151 = arith.constant 5.000000e-01 : f32
    %462 = vector.broadcast %cst_151 : f32 to vector<2x128xf32>
    %463 = arith.mulf %462, %461 : vector<2x128xf32>
    %464 = math.tanh %463 : vector<2x128xf32>
    %cst_152 = arith.constant 1.000000e+00 : f32
    %465 = vector.broadcast %cst_152 : f32 to vector<2x128xf32>
    %466 = arith.addf %464, %465 : vector<2x128xf32>
    %cst_153 = arith.constant 5.000000e-01 : f32
    %467 = vector.broadcast %cst_153 : f32 to vector<2x128xf32>
    %468 = arith.mulf %467, %466 : vector<2x128xf32>
    %469 = arith.mulf %458, %393 : vector<2x128xf32>
    %470 = arith.mulf %450, %460 : vector<2x128xf32>
    %471 = arith.addf %469, %470 : vector<2x128xf32>
    %472 = math.tanh %471 : vector<2x128xf32>
    %473 = arith.mulf %468, %472 : vector<2x128xf32>
    %c0_154 = arith.constant 0 : index
    %c5_155 = arith.constant 5 : index
    %c0_156 = arith.constant 0 : index
    %474 = vector.load %arg17[%c0_154, %c5_155, %c0_156] : memref<2x8x256xf32, #tpu.memory_space<vmem>>, vector<2x1x128xf32>
    %475 = vector.shape_cast %474 : vector<2x1x128xf32> to vector<2x128xf32>
    %476 = vector.shape_cast %437 : vector<2x128xf32> to vector<2x1x128xf32>
    tpu.vector_store %arg17[%c0_154, %c5_155, %c0_156], %476 {strides = array<i32>} : memref<2x8x256xf32, #tpu.memory_space<vmem>>, vector<2x1x128xf32>,
    %c0_157 = arith.constant 0 : index
    %c2_158 = arith.constant 2 : index
    %c128_159 = arith.constant 128 : index
    %477 = vector.load %arg17[%c0_157, %c2_158, %c128_159] : memref<2x8x256xf32, #tpu.memory_space<vmem>>, vector<2x1x128xf32>
    %478 = vector.shape_cast %477 : vector<2x1x128xf32> to vector<2x128xf32>
    %479 = vector.shape_cast %473 : vector<2x128xf32> to vector<2x1x128xf32>
    tpu.vector_store %arg17[%c0_157, %c2_158, %c128_159], %479 {strides = array<i32>} : memref<2x8x256xf32, #tpu.memory_space<vmem>>, vector<2x1x128xf32>,
    %480 = vector.extract_strided_slice %7 {offsets = [0, 6, 0], sizes = [2, 1, 512], strides = [1, 1, 1]} : vector<2x8x1024xf32> to vector<2x1x512xf32>
    %481 = vector.shape_cast %480 : vector<2x1x512xf32> to vector<2x512xf32>
    %482 = arith.truncf %437 : vector<2x128xf32> to vector<2x128xbf16>
    %cst_160 = arith.constant dense<0.000000e+00> : vector<2x512xf32>
    %483 = tpu.matmul %482, %8, %cst_160 {dimension_numbers = #tpu.dot_dimension_numbers<[1], [0], [0], [1], [0, 0, 1, 1], [], []>} : vector<2x128xbf16>, vector<128x512xbf16>, vector<2x512xf32> -> vector<2x512xf32>
    %484 = arith.addf %481, %483 : vector<2x512xf32>
    %485 = vector.extract_strided_slice %484 {offsets = [0, 0], sizes = [2, 128], strides = [1, 1]} : vector<2x512xf32> to vector<2x128xf32>
    %cst_161 = arith.constant 5.000000e-01 : f32
    %486 = vector.broadcast %cst_161 : f32 to vector<2x128xf32>
    %487 = arith.mulf %486, %485 : vector<2x128xf32>
    %488 = math.tanh %487 : vector<2x128xf32>
    %cst_162 = arith.constant 1.000000e+00 : f32
    %489 = vector.broadcast %cst_162 : f32 to vector<2x128xf32>
    %490 = arith.addf %488, %489 : vector<2x128xf32>
    %cst_163 = arith.constant 5.000000e-01 : f32
    %491 = vector.broadcast %cst_163 : f32 to vector<2x128xf32>
    %492 = arith.mulf %491, %490 : vector<2x128xf32>
    %493 = vector.extract_strided_slice %484 {offsets = [0, 128], sizes = [2, 128], strides = [1, 1]} : vector<2x512xf32> to vector<2x128xf32>
    %cst_164 = arith.constant 5.000000e-01 : f32
    %494 = vector.broadcast %cst_164 : f32 to vector<2x128xf32>
    %495 = arith.mulf %494, %493 : vector<2x128xf32>
    %496 = math.tanh %495 : vector<2x128xf32>
    %cst_165 = arith.constant 1.000000e+00 : f32
    %497 = vector.broadcast %cst_165 : f32 to vector<2x128xf32>
    %498 = arith.addf %496, %497 : vector<2x128xf32>
    %cst_166 = arith.constant 5.000000e-01 : f32
    %499 = vector.broadcast %cst_166 : f32 to vector<2x128xf32>
    %500 = arith.mulf %499, %498 : vector<2x128xf32>
    %501 = vector.extract_strided_slice %484 {offsets = [0, 256], sizes = [2, 128], strides = [1, 1]} : vector<2x512xf32> to vector<2x128xf32>
    %502 = math.tanh %501 : vector<2x128xf32>
    %503 = vector.extract_strided_slice %484 {offsets = [0, 384], sizes = [2, 128], strides = [1, 1]} : vector<2x512xf32> to vector<2x128xf32>
    %cst_167 = arith.constant 5.000000e-01 : f32
    %504 = vector.broadcast %cst_167 : f32 to vector<2x128xf32>
    %505 = arith.mulf %504, %503 : vector<2x128xf32>
    %506 = math.tanh %505 : vector<2x128xf32>
    %cst_168 = arith.constant 1.000000e+00 : f32
    %507 = vector.broadcast %cst_168 : f32 to vector<2x128xf32>
    %508 = arith.addf %506, %507 : vector<2x128xf32>
    %cst_169 = arith.constant 5.000000e-01 : f32
    %509 = vector.broadcast %cst_169 : f32 to vector<2x128xf32>
    %510 = arith.mulf %509, %508 : vector<2x128xf32>
    %511 = arith.mulf %500, %435 : vector<2x128xf32>
    %512 = arith.mulf %492, %502 : vector<2x128xf32>
    %513 = arith.addf %511, %512 : vector<2x128xf32>
    %514 = math.tanh %513 : vector<2x128xf32>
    %515 = arith.mulf %510, %514 : vector<2x128xf32>
    %516 = vector.extract_strided_slice %7 {offsets = [0, 1, 512], sizes = [2, 1, 512], strides = [1, 1, 1]} : vector<2x8x1024xf32> to vector<2x1x512xf32>
    %517 = vector.shape_cast %516 : vector<2x1x512xf32> to vector<2x512xf32>
    %518 = arith.truncf %473 : vector<2x128xf32> to vector<2x128xbf16>
    %cst_170 = arith.constant dense<0.000000e+00> : vector<2x512xf32>
    %519 = tpu.matmul %518, %9, %cst_170 {dimension_numbers = #tpu.dot_dimension_numbers<[1], [0], [0], [1], [0, 0, 1, 1], [], []>} : vector<2x128xbf16>, vector<128x512xbf16>, vector<2x512xf32> -> vector<2x512xf32>
    %520 = arith.addf %517, %519 : vector<2x512xf32>
    %521 = vector.extract_strided_slice %520 {offsets = [0, 0], sizes = [2, 128], strides = [1, 1]} : vector<2x512xf32> to vector<2x128xf32>
    %cst_171 = arith.constant 5.000000e-01 : f32
    %522 = vector.broadcast %cst_171 : f32 to vector<2x128xf32>
    %523 = arith.mulf %522, %521 : vector<2x128xf32>
    %524 = math.tanh %523 : vector<2x128xf32>
    %cst_172 = arith.constant 1.000000e+00 : f32
    %525 = vector.broadcast %cst_172 : f32 to vector<2x128xf32>
    %526 = arith.addf %524, %525 : vector<2x128xf32>
    %cst_173 = arith.constant 5.000000e-01 : f32
    %527 = vector.broadcast %cst_173 : f32 to vector<2x128xf32>
    %528 = arith.mulf %527, %526 : vector<2x128xf32>
    %529 = vector.extract_strided_slice %520 {offsets = [0, 128], sizes = [2, 128], strides = [1, 1]} : vector<2x512xf32> to vector<2x128xf32>
    %cst_174 = arith.constant 5.000000e-01 : f32
    %530 = vector.broadcast %cst_174 : f32 to vector<2x128xf32>
    %531 = arith.mulf %530, %529 : vector<2x128xf32>
    %532 = math.tanh %531 : vector<2x128xf32>
    %cst_175 = arith.constant 1.000000e+00 : f32
    %533 = vector.broadcast %cst_175 : f32 to vector<2x128xf32>
    %534 = arith.addf %532, %533 : vector<2x128xf32>
    %cst_176 = arith.constant 5.000000e-01 : f32
    %535 = vector.broadcast %cst_176 : f32 to vector<2x128xf32>
    %536 = arith.mulf %535, %534 : vector<2x128xf32>
    %537 = vector.extract_strided_slice %520 {offsets = [0, 256], sizes = [2, 128], strides = [1, 1]} : vector<2x512xf32> to vector<2x128xf32>
    %538 = math.tanh %537 : vector<2x128xf32>
    %539 = vector.extract_strided_slice %520 {offsets = [0, 384], sizes = [2, 128], strides = [1, 1]} : vector<2x512xf32> to vector<2x128xf32>
    %cst_177 = arith.constant 5.000000e-01 : f32
    %540 = vector.broadcast %cst_177 : f32 to vector<2x128xf32>
    %541 = arith.mulf %540, %539 : vector<2x128xf32>
    %542 = math.tanh %541 : vector<2x128xf32>
    %cst_178 = arith.constant 1.000000e+00 : f32
    %543 = vector.broadcast %cst_178 : f32 to vector<2x128xf32>
    %544 = arith.addf %542, %543 : vector<2x128xf32>
    %cst_179 = arith.constant 5.000000e-01 : f32
    %545 = vector.broadcast %cst_179 : f32 to vector<2x128xf32>
    %546 = arith.mulf %545, %544 : vector<2x128xf32>
    %547 = arith.mulf %536, %471 : vector<2x128xf32>
    %548 = arith.mulf %528, %538 : vector<2x128xf32>
    %549 = arith.addf %547, %548 : vector<2x128xf32>
    %550 = math.tanh %549 : vector<2x128xf32>
    %551 = arith.mulf %546, %550 : vector<2x128xf32>
    %c0_180 = arith.constant 0 : index
    %c6_181 = arith.constant 6 : index
    %c0_182 = arith.constant 0 : index
    %552 = vector.load %arg17[%c0_180, %c6_181, %c0_182] : memref<2x8x256xf32, #tpu.memory_space<vmem>>, vector<2x1x128xf32>
    %553 = vector.shape_cast %552 : vector<2x1x128xf32> to vector<2x128xf32>
    %554 = vector.shape_cast %515 : vector<2x128xf32> to vector<2x1x128xf32>
    tpu.vector_store %arg17[%c0_180, %c6_181, %c0_182], %554 {strides = array<i32>} : memref<2x8x256xf32, #tpu.memory_space<vmem>>, vector<2x1x128xf32>,
    %c0_183 = arith.constant 0 : index
    %c1_184 = arith.constant 1 : index
    %c128_185 = arith.constant 128 : index
    %555 = vector.load %arg17[%c0_183, %c1_184, %c128_185] : memref<2x8x256xf32, #tpu.memory_space<vmem>>, vector<2x1x128xf32>
    %556 = vector.shape_cast %555 : vector<2x1x128xf32> to vector<2x128xf32>
    %557 = vector.shape_cast %551 : vector<2x128xf32> to vector<2x1x128xf32>
    tpu.vector_store %arg17[%c0_183, %c1_184, %c128_185], %557 {strides = array<i32>} : memref<2x8x256xf32, #tpu.memory_space<vmem>>, vector<2x1x128xf32>,
    %558 = vector.extract_strided_slice %7 {offsets = [0, 7, 0], sizes = [2, 1, 512], strides = [1, 1, 1]} : vector<2x8x1024xf32> to vector<2x1x512xf32>
    %559 = vector.shape_cast %558 : vector<2x1x512xf32> to vector<2x512xf32>
    %560 = arith.truncf %515 : vector<2x128xf32> to vector<2x128xbf16>
    %cst_186 = arith.constant dense<0.000000e+00> : vector<2x512xf32>
    %561 = tpu.matmul %560, %8, %cst_186 {dimension_numbers = #tpu.dot_dimension_numbers<[1], [0], [0], [1], [0, 0, 1, 1], [], []>} : vector<2x128xbf16>, vector<128x512xbf16>, vector<2x512xf32> -> vector<2x512xf32>
    %562 = arith.addf %559, %561 : vector<2x512xf32>
    %563 = vector.extract_strided_slice %562 {offsets = [0, 0], sizes = [2, 128], strides = [1, 1]} : vector<2x512xf32> to vector<2x128xf32>
    %cst_187 = arith.constant 5.000000e-01 : f32
    %564 = vector.broadcast %cst_187 : f32 to vector<2x128xf32>
    %565 = arith.mulf %564, %563 : vector<2x128xf32>
    %566 = math.tanh %565 : vector<2x128xf32>
    %cst_188 = arith.constant 1.000000e+00 : f32
    %567 = vector.broadcast %cst_188 : f32 to vector<2x128xf32>
    %568 = arith.addf %566, %567 : vector<2x128xf32>
    %cst_189 = arith.constant 5.000000e-01 : f32
    %569 = vector.broadcast %cst_189 : f32 to vector<2x128xf32>
    %570 = arith.mulf %569, %568 : vector<2x128xf32>
    %571 = vector.extract_strided_slice %562 {offsets = [0, 128], sizes = [2, 128], strides = [1, 1]} : vector<2x512xf32> to vector<2x128xf32>
    %cst_190 = arith.constant 5.000000e-01 : f32
    %572 = vector.broadcast %cst_190 : f32 to vector<2x128xf32>
    %573 = arith.mulf %572, %571 : vector<2x128xf32>
    %574 = math.tanh %573 : vector<2x128xf32>
    %cst_191 = arith.constant 1.000000e+00 : f32
    %575 = vector.broadcast %cst_191 : f32 to vector<2x128xf32>
    %576 = arith.addf %574, %575 : vector<2x128xf32>
    %cst_192 = arith.constant 5.000000e-01 : f32
    %577 = vector.broadcast %cst_192 : f32 to vector<2x128xf32>
    %578 = arith.mulf %577, %576 : vector<2x128xf32>
    %579 = vector.extract_strided_slice %562 {offsets = [0, 256], sizes = [2, 128], strides = [1, 1]} : vector<2x512xf32> to vector<2x128xf32>
    %580 = math.tanh %579 : vector<2x128xf32>
    %581 = vector.extract_strided_slice %562 {offsets = [0, 384], sizes = [2, 128], strides = [1, 1]} : vector<2x512xf32> to vector<2x128xf32>
    %cst_193 = arith.constant 5.000000e-01 : f32
    %582 = vector.broadcast %cst_193 : f32 to vector<2x128xf32>
    %583 = arith.mulf %582, %581 : vector<2x128xf32>
    %584 = math.tanh %583 : vector<2x128xf32>
    %cst_194 = arith.constant 1.000000e+00 : f32
    %585 = vector.broadcast %cst_194 : f32 to vector<2x128xf32>
    %586 = arith.addf %584, %585 : vector<2x128xf32>
    %cst_195 = arith.constant 5.000000e-01 : f32
    %587 = vector.broadcast %cst_195 : f32 to vector<2x128xf32>
    %588 = arith.mulf %587, %586 : vector<2x128xf32>
    %589 = arith.mulf %578, %513 : vector<2x128xf32>
    %590 = arith.mulf %570, %580 : vector<2x128xf32>
    %591 = arith.addf %589, %590 : vector<2x128xf32>
    %592 = math.tanh %591 : vector<2x128xf32>
    %593 = arith.mulf %588, %592 : vector<2x128xf32>
    %594 = vector.extract_strided_slice %7 {offsets = [0, 0, 512], sizes = [2, 1, 512], strides = [1, 1, 1]} : vector<2x8x1024xf32> to vector<2x1x512xf32>
    %595 = vector.shape_cast %594 : vector<2x1x512xf32> to vector<2x512xf32>
    %596 = arith.truncf %551 : vector<2x128xf32> to vector<2x128xbf16>
    %cst_196 = arith.constant dense<0.000000e+00> : vector<2x512xf32>
    %597 = tpu.matmul %596, %9, %cst_196 {dimension_numbers = #tpu.dot_dimension_numbers<[1], [0], [0], [1], [0, 0, 1, 1], [], []>} : vector<2x128xbf16>, vector<128x512xbf16>, vector<2x512xf32> -> vector<2x512xf32>
    %598 = arith.addf %595, %597 : vector<2x512xf32>
    %599 = vector.extract_strided_slice %598 {offsets = [0, 0], sizes = [2, 128], strides = [1, 1]} : vector<2x512xf32> to vector<2x128xf32>
    %cst_197 = arith.constant 5.000000e-01 : f32
    %600 = vector.broadcast %cst_197 : f32 to vector<2x128xf32>
    %601 = arith.mulf %600, %599 : vector<2x128xf32>
    %602 = math.tanh %601 : vector<2x128xf32>
    %cst_198 = arith.constant 1.000000e+00 : f32
    %603 = vector.broadcast %cst_198 : f32 to vector<2x128xf32>
    %604 = arith.addf %602, %603 : vector<2x128xf32>
    %cst_199 = arith.constant 5.000000e-01 : f32
    %605 = vector.broadcast %cst_199 : f32 to vector<2x128xf32>
    %606 = arith.mulf %605, %604 : vector<2x128xf32>
    %607 = vector.extract_strided_slice %598 {offsets = [0, 128], sizes = [2, 128], strides = [1, 1]} : vector<2x512xf32> to vector<2x128xf32>
    %cst_200 = arith.constant 5.000000e-01 : f32
    %608 = vector.broadcast %cst_200 : f32 to vector<2x128xf32>
    %609 = arith.mulf %608, %607 : vector<2x128xf32>
    %610 = math.tanh %609 : vector<2x128xf32>
    %cst_201 = arith.constant 1.000000e+00 : f32
    %611 = vector.broadcast %cst_201 : f32 to vector<2x128xf32>
    %612 = arith.addf %610, %611 : vector<2x128xf32>
    %cst_202 = arith.constant 5.000000e-01 : f32
    %613 = vector.broadcast %cst_202 : f32 to vector<2x128xf32>
    %614 = arith.mulf %613, %612 : vector<2x128xf32>
    %615 = vector.extract_strided_slice %598 {offsets = [0, 256], sizes = [2, 128], strides = [1, 1]} : vector<2x512xf32> to vector<2x128xf32>
    %616 = math.tanh %615 : vector<2x128xf32>
    %617 = vector.extract_strided_slice %598 {offsets = [0, 384], sizes = [2, 128], strides = [1, 1]} : vector<2x512xf32> to vector<2x128xf32>
    %cst_203 = arith.constant 5.000000e-01 : f32
    %618 = vector.broadcast %cst_203 : f32 to vector<2x128xf32>
    %619 = arith.mulf %618, %617 : vector<2x128xf32>
    %620 = math.tanh %619 : vector<2x128xf32>
    %cst_204 = arith.constant 1.000000e+00 : f32
    %621 = vector.broadcast %cst_204 : f32 to vector<2x128xf32>
    %622 = arith.addf %620, %621 : vector<2x128xf32>
    %cst_205 = arith.constant 5.000000e-01 : f32
    %623 = vector.broadcast %cst_205 : f32 to vector<2x128xf32>
    %624 = arith.mulf %623, %622 : vector<2x128xf32>
    %625 = arith.mulf %614, %549 : vector<2x128xf32>
    %626 = arith.mulf %606, %616 : vector<2x128xf32>
    %627 = arith.addf %625, %626 : vector<2x128xf32>
    %628 = math.tanh %627 : vector<2x128xf32>
    %629 = arith.mulf %624, %628 : vector<2x128xf32>
    %c0_206 = arith.constant 0 : index
    %c7_207 = arith.constant 7 : index
    %c0_208 = arith.constant 0 : index
    %630 = vector.load %arg17[%c0_206, %c7_207, %c0_208] : memref<2x8x256xf32, #tpu.memory_space<vmem>>, vector<2x1x128xf32>
    %631 = vector.shape_cast %630 : vector<2x1x128xf32> to vector<2x128xf32>
    %632 = vector.shape_cast %593 : vector<2x128xf32> to vector<2x1x128xf32>
    tpu.vector_store %arg17[%c0_206, %c7_207, %c0_208], %632 {strides = array<i32>} : memref<2x8x256xf32, #tpu.memory_space<vmem>>, vector<2x1x128xf32>,
    %c0_209 = arith.constant 0 : index
    %c0_210 = arith.constant 0 : index
    %c128_211 = arith.constant 128 : index
    %633 = vector.load %arg17[%c0_209, %c0_210, %c128_211] : memref<2x8x256xf32, #tpu.memory_space<vmem>>, vector<2x1x128xf32>
    %634 = vector.shape_cast %633 : vector<2x1x128xf32> to vector<2x128xf32>
    %635 = vector.shape_cast %629 : vector<2x128xf32> to vector<2x1x128xf32>
    tpu.vector_store %arg17[%c0_209, %c0_210, %c128_211], %635 {strides = array<i32>} : memref<2x8x256xf32, #tpu.memory_space<vmem>>, vector<2x1x128xf32>,
    %c0_212 = arith.constant 0 : index
    %c0_213 = arith.constant 0 : index
    %c0_214 = arith.constant 0 : index
    %636 = vector.load %arg17[%c0_212, %c0_213, %c0_214] : memref<2x8x256xf32, #tpu.memory_space<vmem>>, vector<2x8x256xf32>
    %637 = vector.shape_cast %636 : vector<2x8x256xf32> to vector<16x256xf32>
    %638 = arith.truncf %637 : vector<16x256xf32> to vector<16x256xbf16>
    %c0_215 = arith.constant 0 : index
    %c0_216 = arith.constant 0 : index
    %639 = vector.load %arg5[%c0_215, %c0_216] : memref<256x128xbf16, #tpu.memory_space<vmem>>, vector<256x128xbf16>
    %cst_217 = arith.constant dense<0.000000e+00> : vector<16x128xf32>
    %640 = tpu.matmul %638, %639, %cst_217 {dimension_numbers = #tpu.dot_dimension_numbers<[1], [0], [0], [1], [0, 0, 1, 1], [], []>} : vector<16x256xbf16>, vector<256x128xbf16>, vector<16x128xf32> -> vector<16x128xf32>
    %c0_218 = arith.constant 0 : index
    %c0_219 = arith.constant 0 : index
    %641 = vector.load %arg6[%c0_218, %c0_219] : memref<1x128xf32, #tpu.memory_space<vmem>>, vector<1x128xf32>
    %642 = vector.broadcast %641 : vector<1x128xf32> to vector<16x128xf32>
    %643 = arith.addf %640, %642 : vector<16x128xf32>
    %644 = vector.shape_cast %643 : vector<16x128xf32> to vector<2x8x128xf32>
    %645 = vector.extract_strided_slice %593 {offsets = [0, 0], sizes = [1, 128], strides = [1, 1]} : vector<2x128xf32> to vector<1x128xf32>
    %646 = vector.extract_strided_slice %593 {offsets = [1, 0], sizes = [1, 128], strides = [1, 1]} : vector<2x128xf32> to vector<1x128xf32>
    %647 = tpu.concatenate %645, %646 in 1 : vector<1x128xf32>, vector<1x128xf32> -> vector<1x256xf32>
    %648 = vector.extract_strided_slice %629 {offsets = [0, 0], sizes = [1, 128], strides = [1, 1]} : vector<2x128xf32> to vector<1x128xf32>
    %649 = vector.extract_strided_slice %629 {offsets = [1, 0], sizes = [1, 128], strides = [1, 1]} : vector<2x128xf32> to vector<1x128xf32>
    %650 = tpu.concatenate %648, %649 in 1 : vector<1x128xf32>, vector<1x128xf32> -> vector<1x256xf32>
    %651 = tpu.concatenate %647, %650 in 0 : vector<1x256xf32>, vector<1x256xf32> -> vector<2x256xf32>
    %652 = arith.truncf %651 : vector<2x256xf32> to vector<2x256xbf16>
    %c0_220 = arith.constant 0 : index
    %c0_221 = arith.constant 0 : index
    %653 = vector.load %arg7[%c0_220, %c0_221] : memref<256x128xbf16, #tpu.memory_space<vmem>>, vector<256x128xbf16>
    %cst_222 = arith.constant dense<0.000000e+00> : vector<2x128xf32>
    %654 = tpu.matmul %652, %653, %cst_222 {dimension_numbers = #tpu.dot_dimension_numbers<[1], [0], [0], [1], [0, 0, 1, 1], [], []>} : vector<2x256xbf16>, vector<256x128xbf16>, vector<2x128xf32> -> vector<2x128xf32>
    %c0_223 = arith.constant 0 : index
    %c0_224 = arith.constant 0 : index
    %655 = vector.load %arg8[%c0_223, %c0_224] : memref<1x128xf32, #tpu.memory_space<vmem>>, vector<1x128xf32>
    %656 = vector.broadcast %655 : vector<1x128xf32> to vector<2x128xf32>
    %657 = arith.addf %654, %656 : vector<2x128xf32>
    %658 = vector.shape_cast %657 : vector<2x128xf32> to vector<2x1x128xf32>
    %659 = vector.broadcast %658 : vector<2x1x128xf32> to vector<2x8x128xf32>
    %660 = arith.addf %644, %659 : vector<2x8x128xf32>
    %661 = math.tanh %660 : vector<2x8x128xf32>
    %c0_225 = arith.constant 0 : index
    %c0_226 = arith.constant 0 : index
    %662 = vector.load %arg9[%c0_225, %c0_226] : memref<1x128xf32, #tpu.memory_space<vmem>>, vector<1x128xf32>
    %663 = vector.shape_cast %662 : vector<1x128xf32> to vector<1x1x128xf32>
    %664 = vector.broadcast %663 : vector<1x1x128xf32> to vector<2x8x128xf32>
    %665 = arith.mulf %661, %664 : vector<2x8x128xf32>
    %cst_227 = arith.constant dense<0.000000e+00> : vector<2x8xf32>
    %666 = vector.multi_reduction <add>, %665, %cst_227 [2] : vector<2x8x128xf32> to vector<2x8xf32>
    %cst_228 = arith.constant dense<0xFF800000> : vector<2xf32>
    %667 = vector.multi_reduction <maximumf>, %666, %cst_228 [1] : vector<2x8xf32> to vector<2xf32>
    %668 = vector.shape_cast %667 : vector<2xf32> to vector<2x1xf32>
    %669 = vector.broadcast %668 : vector<2x1xf32> to vector<2x8xf32>
    %670 = arith.subf %666, %669 : vector<2x8xf32>
    %671 = math.exp %670 : vector<2x8xf32>
    %cst_229 = arith.constant dense<0.000000e+00> : vector<2xf32>
    %672 = vector.multi_reduction <add>, %671, %cst_229 [1] : vector<2x8xf32> to vector<2xf32>
    %673 = vector.shape_cast %672 : vector<2xf32> to vector<2x1xf32>
    %674 = tpu.reciprocal %673 {approx = true} : vector<2x1xf32> -> vector<2x1xf32>
    %675 = vector.broadcast %674 : vector<2x1xf32> to vector<2x8xf32>
    %676 = arith.mulf %671, %675 : vector<2x8xf32>
    %677 = vector.shape_cast %676 : vector<2x8xf32> to vector<2x8x1xf32>
    %678 = vector.broadcast %677 : vector<2x8x1xf32> to vector<2x8x256xf32>
    %679 = arith.mulf %636, %678 : vector<2x8x256xf32>
    %cst_230 = arith.constant dense<0.000000e+00> : vector<2x256xf32>
    %680 = vector.multi_reduction <add>, %679, %cst_230 [1] : vector<2x8x256xf32> to vector<2x256xf32>
    %681 = arith.truncf %680 : vector<2x256xf32> to vector<2x256xbf16>
    %c0_231 = arith.constant 0 : index
    %c0_232 = arith.constant 0 : index
    %682 = vector.load %arg10[%c0_231, %c0_232] : memref<256x32xbf16, #tpu.memory_space<vmem>>, vector<256x32xbf16>
    %cst_233 = arith.constant dense<0.000000e+00> : vector<2x32xf32>
    %683 = tpu.matmul %681, %682, %cst_233 {dimension_numbers = #tpu.dot_dimension_numbers<[1], [0], [0], [1], [0, 0, 1, 1], [], []>} : vector<2x256xbf16>, vector<256x32xbf16>, vector<2x32xf32> -> vector<2x32xf32>
    %c0_234 = arith.constant 0 : index
    %c0_235 = arith.constant 0 : index
    %684 = vector.load %arg11[%c0_234, %c0_235] : memref<1x32xf32, #tpu.memory_space<vmem>>, vector<1x32xf32>
    %685 = vector.broadcast %684 : vector<1x32xf32> to vector<2x32xf32>
    %686 = arith.addf %683, %685 : vector<2x32xf32>
    %c0_236 = arith.constant 0 : index
    %c0_237 = arith.constant 0 : index
    %687 = vector.load %arg12[%c0_236, %c0_237] : memref<1x32xf32, #tpu.memory_space<vmem>>, vector<1x32xf32>
    %688 = vector.broadcast %687 : vector<1x32xf32> to vector<2x32xf32>
    %689 = arith.mulf %686, %688 : vector<2x32xf32>
    %c0_238 = arith.constant 0 : index
    %c0_239 = arith.constant 0 : index
    %690 = vector.load %arg13[%c0_238, %c0_239] : memref<1x32xf32, #tpu.memory_space<vmem>>, vector<1x32xf32>
    %691 = vector.broadcast %690 : vector<1x32xf32> to vector<2x32xf32>
    %692 = arith.addf %689, %691 : vector<2x32xf32>
    %cst_240 = arith.constant 0.000000e+00 : f32
    %693 = vector.broadcast %cst_240 : f32 to vector<2x32xf32>
    %694 = arith.maximumf %692, %693 : vector<2x32xf32>
    %c0_241 = arith.constant 0 : index
    %c0_242 = arith.constant 0 : index
    %695 = vector.load %arg14[%c0_241, %c0_242] : memref<1x32xf32, #tpu.memory_space<vmem>>, vector<1x32xf32>
    %696 = vector.broadcast %695 : vector<1x32xf32> to vector<2x32xf32>
    %697 = arith.mulf %694, %696 : vector<2x32xf32>
    %cst_243 = arith.constant dense<0.000000e+00> : vector<2xf32>
    %698 = vector.multi_reduction <add>, %697, %cst_243 [1] : vector<2x32xf32> to vector<2xf32>
    %699 = vector.shape_cast %698 : vector<2xf32> to vector<2x1xf32>
    %c0_244 = arith.constant 0 : index
    %c0_245 = arith.constant 0 : index
    %700 = vector.load %arg15[%c0_244, %c0_245] : memref<1x1xf32, #tpu.memory_space<vmem>>, vector<1x1xf32>
    %701 = vector.broadcast %700 : vector<1x1xf32> to vector<2x1xf32>
    %702 = arith.addf %699, %701 : vector<2x1xf32>
    %c0_246 = arith.constant 0 : index
    %c0_247 = arith.constant 0 : index
    %703 = vector.load %arg16[%c0_246, %c0_247] : memref<2x1xf32, #tpu.memory_space<vmem>>, vector<2x1xf32>
    tpu.vector_store %arg16[%c0_246, %c0_247], %702 {strides = array<i32>} : memref<2x1xf32, #tpu.memory_space<vmem>>, vector<2x1xf32>,
    return
  }
}

</mosaic_0001>

<bundles_post_ra>
// kernel: hlattn_forward.1
= control target key start
LH: loop header
LB: loop body
LE: loop exit
PB: predicated region body
PF: predicated region fallthrough
CT: control target
= control target key end

     0   :  { %v7707_v3 = vmov 0   ;;  %vm1351_vm0 = vcmask 1041409   ;;  %vm3906_vm1 = vcmask 1040384   ;;  %vm4150_vm2 = vcmask 58368   ;;  %s7689_s1 = inlined_call_operand.vmem [shape: bf16[128,1024], index: 1, kind: input, shape index: {}]   ;;  %s7690_s0 = inlined_call_operand.vmem [shape: bf16[2,8,128], index: 0, kind: input, shape index: {}]   ;;  %s7691_s3 = inlined_call_operand.vmem [shape: bf16[128,512], index: 3, kind: input, shape index: {}]   ;;  %s7692_s4 = inlined_call_operand.vmem [shape: bf16[128,512], index: 4, kind: input, shape index: {}]   ;;  %s7693_s2 = inlined_call_operand.vmem [shape: f32[1,1024], index: 2, kind: input, shape index: {}]   ;;  %s7694_s7 = inlined_call_operand.vmem [shape: bf16[256,128], index: 7, kind: input, shape index: {}]   ;;  %s7695_s5 = inlined_call_operand.vmem [shape: bf16[256,128], index: 5, kind: input, shape index: {}]   ;;  %s7696_s8 = inlined_call_operand.vmem [shape: f32[1,128], index: 8, kind: input, shape index: {}]   ;;  %s7697_s6 = inlined_call_operand.vmem [shape: f32[1,128], index: 6, kind: input, shape index: {}]   ;;  %s7698_s9 = inlined_call_operand.vmem [shape: f32[1,128], index: 9, kind: input, shape index: {}]   ;;  %s7699_s10 = inlined_call_operand.vmem [shape: bf16[256,32], index: 10, kind: input, shape index: {}]   ;;  %s7700_s15 = inlined_call_operand.<no memory space> [shape: f32[1,1], index: 15, kind: input, shape index: {}]   ;;  %s7701_s11 = inlined_call_operand.vmem [shape: f32[1,32], index: 11, kind: input, shape index: {}]   ;;  %s7702_s12 = inlined_call_operand.vmem [shape: f32[1,32], index: 12, kind: input, shape index: {}]   ;;  %s7703_s13 = inlined_call_operand.vmem [shape: f32[1,32], index: 13, kind: input, shape index: {}]   ;;  %s7704_s14 = inlined_call_operand.vmem [shape: f32[1,32], index: 14, kind: input, shape index: {}]   ;;  %s7705_s16 = inlined_call_operand.vmem [shape: f32[2,1], index: 16, kind: output, shape index: {}]  }
   0x1   :  { %7893 = sst [smem:[#allocation57_spill]] %s7689_s1  ;;  %522 = vmatprep.mubr.bf16.mxu0 %v7707_v3  ;;  %565 = vmatprep.mubr.bf16.mxu1 %v7707_v3  ;;  %vm4462_vm3 = vcmask 254976   ;;  %vm4474_vm4 = vcmask 1024  }
   0x2   :  { %s7894_s23 = sld [smem:[#allocation57_spill]]  ;;  %4734 = vset.pattern.permute.xlu0 %v7707_v3  ;;  %4733 = vset.pattern.permute.xlu1 %v7707_v3 }
   0x8   :  { %v58_v0 = vld [vmem:[%s7894_s23] sm:$0xff]  ;;  %v59_v2 = vld [vmem:[%s7894_s23 + $0x8] sm:$0xff]  ;;  %v60_v62 = vld [vmem:[%s7894_s23 + $0x10] sm:$0xff] }
   0x9   :  { %v62_v1 = vld [vmem:[%s7894_s23 + $0x20] sm:$0xff]  ;;  %v63_v5 = vld [vmem:[%s7894_s23 + $0x28] sm:$0xff] }
   0xa   :  { %v4482_v4 = vcombine.high %v58_v0, %v62_v1  ;;  %v4481_v6 = vcombine.low %v58_v0, %v62_v1  ;;  %v66_v7 = vld [vmem:[%s7894_s23 + $0x40] sm:$0xff]  ;;  %v4484_v9 = vcombine.high %v59_v2, %v63_v5  ;;  %v4483_v10 = vcombine.low %v59_v2, %v63_v5  ;;  %v67_v12 = vld [vmem:[%s7894_s23 + $0x48] sm:$0xff]  ;;  %v64_v0 = vld [vmem:[%s7894_s23 + $0x30] sm:$0xff] }
   0xb   :  { %v70_v8 = vld [vmem:[%s7894_s23 + $0x60] sm:$0xff]  ;;  %v71_v13 = vld [vmem:[%s7894_s23 + $0x68] sm:$0xff]  ;;  %v61_v1 = vld [vmem:[%s7894_s23 + $0x18] sm:$0xff] }
   0xc   :  { %v4490_v11 = vcombine.high %v66_v7, %v70_v8  ;;  %v74_v14 = vld [vmem:[%s7894_s23 + $0x80] sm:$0xff]  ;;  %490 = vmatprep.subr.bf16.mxu0 %v4482_v4  ;;  %v4492_v15 = vcombine.high %v67_v12, %v71_v13  ;;  %v75_v17 = vld [vmem:[%s7894_s23 + $0x88] sm:$0xff]  ;;  %533 = vmatprep.subr.bf16.mxu1 %v4484_v9  ;;  %v4489_v19 = vcombine.low %v66_v7, %v70_v8  ;;  %v65_v2 = vld [vmem:[%s7894_s23 + $0x38] sm:$0xff] }
   0xd   :  { %v78_v16 = vld [vmem:[%s7894_s23 + $0xa0] sm:$0xff]  ;;  %v79_v18 = vld [vmem:[%s7894_s23 + $0xa8] sm:$0xff]  ;;  %491 = vmatpush1.bf16.msra.mxu0 %v4481_v6  ;;  %534 = vmatpush1.bf16.msra.mxu1 %v4483_v10  ;;  %v4491_v20 = vcombine.low %v67_v12, %v71_v13  ;;  %v4486_v7 = vcombine.high %v60_v62, %v64_v0  ;;  %v68_v8 = vld [vmem:[%s7894_s23 + $0x50] sm:$0xff]  ;;  %v4488_v10 = vcombine.high %v61_v1, %v65_v2 }
   0xe   :  { %492 = vmatprep.subr.bf16.mxu0 %v4490_v11  ;;  %v4498_v21 = vcombine.high %v74_v14, %v78_v16  ;;  %535 = vmatprep.subr.bf16.mxu1 %v4492_v15  ;;  %v4500_v22 = vcombine.high %v75_v17, %v79_v18  ;;  %v82_v23 = vld [vmem:[%s7894_s23 + $0xc0] sm:$0xff]  ;;  %v83_v25 = vld [vmem:[%s7894_s23 + $0xc8] sm:$0xff]  ;;  %v4497_v27 = vcombine.low %v74_v14, %v78_v16  ;;  %v72_v9 = vld [vmem:[%s7894_s23 + $0x70] sm:$0xff] }
   0xf   :  { %v86_v24 = vld [vmem:[%s7894_s23 + $0xe0] sm:$0xff]  ;;  %v87_v26 = vld [vmem:[%s7894_s23 + $0xe8] sm:$0xff]  ;;  %v4499_v28 = vcombine.low %v75_v17, %v79_v18  ;;  %v69_v11 = vld [vmem:[%s7894_s23 + $0x58] sm:$0xff]  ;;  %v4485_v13 = vcombine.low %v60_v62, %v64_v0  ;;  %v4487_v14 = vcombine.low %v61_v1, %v65_v2  ;;  %v4494_v15 = vcombine.high %v68_v8, %v72_v9 }
  0x10   :  { %v4506_v29 = vcombine.high %v82_v23, %v86_v24  ;;  %v4508_v30 = vcombine.high %v83_v25, %v87_v26  ;;  %v90_v31 = vld [vmem:[%s7894_s23 + $0x100] sm:$0xff]  ;;  %v91_v33 = vld [vmem:[%s7894_s23 + $0x108] sm:$0xff]  ;;  %v4505_v35 = vcombine.low %v82_v23, %v86_v24  ;;  %v4507_v36 = vcombine.low %v83_v25, %v87_v26  ;;  %v73_v12 = vld [vmem:[%s7894_s23 + $0x78] sm:$0xff] }
  0x11   :  { %493 = vmatpush1.bf16.msra.mxu0 %v4489_v19  ;;  %536 = vmatpush1.bf16.msra.mxu1 %v4491_v20  ;;  %v94_v32 = vld [vmem:[%s7894_s23 + $0x120] sm:$0xff]  ;;  %v95_v34 = vld [vmem:[%s7894_s23 + $0x128] sm:$0xff]  ;;  %v76_v16 = vld [vmem:[%s7894_s23 + $0x90] sm:$0xff]  ;;  %v4496_v17 = vcombine.high %v69_v11, %v73_v12 }
  0x12   :  { %494 = vmatprep.subr.bf16.mxu0 %v4498_v21  ;;  %537 = vmatprep.subr.bf16.mxu1 %v4500_v22  ;;  %v4514_v37 = vcombine.high %v90_v31, %v94_v32  ;;  %v4516_v38 = vcombine.high %v91_v33, %v95_v34  ;;  %v98_v39 = vld [vmem:[%s7894_s23 + $0x140] sm:$0xff]  ;;  %v99_v41 = vld [vmem:[%s7894_s23 + $0x148] sm:$0xff]  ;;  %v4513_v43 = vcombine.low %v90_v31, %v94_v32  ;;  %v80_v18 = vld [vmem:[%s7894_s23 + $0xb0] sm:$0xff] }
  0x13   :  { %v102_v40 = vld [vmem:[%s7894_s23 + $0x160] sm:$0xff]  ;;  %v103_v42 = vld [vmem:[%s7894_s23 + $0x168] sm:$0xff]  ;;  %v4515_v44 = vcombine.low %v91_v33, %v95_v34  ;;  %v77_v19 = vld [vmem:[%s7894_s23 + $0x98] sm:$0xff]  ;;  %v4493_v21 = vcombine.low %v68_v8, %v72_v9  ;;  %v4495_v22 = vcombine.low %v69_v11, %v73_v12  ;;  %v4502_v23 = vcombine.high %v76_v16, %v80_v18 }
  0x14   :  { %v4522_v45 = vcombine.high %v98_v39, %v102_v40  ;;  %v4524_v46 = vcombine.high %v99_v41, %v103_v42  ;;  %v106_v47 = vld [vmem:[%s7894_s23 + $0x180] sm:$0xff]  ;;  %v107_v49 = vld [vmem:[%s7894_s23 + $0x188] sm:$0xff]  ;;  %v4521_v51 = vcombine.low %v98_v39, %v102_v40  ;;  %v4523_v52 = vcombine.low %v99_v41, %v103_v42  ;;  %v81_v20 = vld [vmem:[%s7894_s23 + $0xb8] sm:$0xff] }
  0x15   :  { %495 = vmatpush1.bf16.msra.mxu0 %v4497_v27  ;;  %538 = vmatpush1.bf16.msra.mxu1 %v4499_v28  ;;  %v110_v48 = vld [vmem:[%s7894_s23 + $0x1a0] sm:$0xff]  ;;  %v111_v50 = vld [vmem:[%s7894_s23 + $0x1a8] sm:$0xff]  ;;  %v84_v24 = vld [vmem:[%s7894_s23 + $0xd0] sm:$0xff]  ;;  %v4504_v26 = vcombine.high %v77_v19, %v81_v20 }
  0x16   :  { %496 = vmatprep.subr.bf16.mxu0 %v4506_v29  ;;  %539 = vmatprep.subr.bf16.mxu1 %v4508_v30  ;;  %v4530_v53 = vcombine.high %v106_v47, %v110_v48  ;;  %v114_v54 = vld [vmem:[%s7894_s23 + $0x1c0] sm:$0xff]  ;;  %v4532_v56 = vcombine.high %v107_v49, %v111_v50  ;;  %v115_v57 = vld [vmem:[%s7894_s23 + $0x1c8] sm:$0xff]  ;;  %v4529_v59 = vcombine.low %v106_v47, %v110_v48  ;;  %v88_v25 = vld [vmem:[%s7894_s23 + $0xf0] sm:$0xff] }
  0x17   :  { %v118_v55 = vld [vmem:[%s7894_s23 + $0x1e0] sm:$0xff]  ;;  %v119_v58 = vld [vmem:[%s7894_s23 + $0x1e8] sm:$0xff]  ;;  %v4531_v60 = vcombine.low %v107_v49, %v111_v50  ;;  %v85_v27 = vld [vmem:[%s7894_s23 + $0xd8] sm:$0xff]  ;;  %v4501_v29 = vcombine.low %v76_v16, %v80_v18  ;;  %v4503_v30 = vcombine.low %v77_v19, %v81_v20  ;;  %v4510_v31 = vcombine.high %v84_v24, %v88_v25 }
  0x18   :  { %v4538_v61 = vcombine.high %v114_v54, %v118_v55  ;;  %v4540_v63 = vcombine.high %v115_v57, %v119_v58  ;;  %v4537_v4 = vcombine.low %v114_v54, %v118_v55  ;;  %v4539_v5 = vcombine.low %v115_v57, %v119_v58  ;;  %v5540_v6 = vld [vmem:[%s7690_s0] sm:$0xff]   ;;  %v89_v28 = vld [vmem:[%s7894_s23 + $0xf8] sm:$0xff]  ;;  %v92_v32 = vld [vmem:[%s7894_s23 + $0x110] sm:$0xff] }
  0x19   :  { %497 = vmatpush1.bf16.msra.mxu0 %v4505_v35  ;;  %540 = vmatpush1.bf16.msra.mxu1 %v4507_v36  ;;  %v4512_v33 = vcombine.high %v85_v27, %v89_v28  ;;  %v96_v34 = vld [vmem:[%s7894_s23 + $0x130] sm:$0xff]  ;;  %v93_v35 = vld [vmem:[%s7894_s23 + $0x118] sm:$0xff] }
  0x1a   :  { %498 = vmatprep.subr.bf16.mxu0 %v4514_v37  ;;  %541 = vmatprep.subr.bf16.mxu1 %v4516_v38  ;;  %v97_v36 = vld [vmem:[%s7894_s23 + $0x138] sm:$0xff]  ;;  %v4509_v37 = vcombine.low %v84_v24, %v88_v25  ;;  %v4511_v38 = vcombine.low %v85_v27, %v89_v28  ;;  %v4518_v39 = vcombine.high %v92_v32, %v96_v34  ;;  %v100_v40 = vld [vmem:[%s7894_s23 + $0x150] sm:$0xff] }
  0x1b   :  { %v104_v41 = vld [vmem:[%s7894_s23 + $0x170] sm:$0xff]  ;;  %v4520_v42 = vcombine.high %v93_v35, %v97_v36  ;;  %v5649_v8 = vld [vmem:[%s7691_s3 + $0x8] ss:$16 sps:$4 sm:$0xff]   ;;  %v5760_v25 = vld [vmem:[%s7691_s3 + $0xac] ss:$16 sps:$4 sm:$0xff]  }
  0x1c   :  { %v4526_v47 = vcombine.high %v100_v40, %v104_v41  ;;  %v108_v48 = vld [vmem:[%s7894_s23 + $0x190] sm:$0xff]  ;;  %7898 = vst [vmem:[#allocation7_spill] sm:$0xff] %v5649_v8  ;;  %v5675_v12 = vld [vmem:[%s7691_s3 + $0x28] ss:$16 sps:$4 sm:$0xff]   ;;  %7916 = vst [vmem:[#allocation25_spill] sm:$0xff] %v5760_v25 }
  0x1d   :  { %499 = vmatpush1.bf16.msra.mxu0 %v4513_v43  ;;  %542 = vmatpush1.bf16.msra.mxu1 %v4515_v44  ;;  %v101_v43 = vld [vmem:[%s7894_s23 + $0x158] sm:$0xff]  ;;  %v112_v50 = vld [vmem:[%s7894_s23 + $0x1b0] sm:$0xff]  ;;  %7902 = vst [vmem:[#allocation11_spill] sm:$0xff] %v5675_v12 }
  0x1e   :  { %500 = vmatprep.subr.bf16.mxu0 %v4522_v45  ;;  %543 = vmatprep.subr.bf16.mxu1 %v4524_v46  ;;  %v105_v44 = vld [vmem:[%s7894_s23 + $0x178] sm:$0xff]  ;;  %v4517_v45 = vcombine.low %v92_v32, %v96_v34  ;;  %v4519_v46 = vcombine.low %v93_v35, %v97_v36  ;;  %v4534_v55 = vcombine.high %v108_v48, %v112_v50  ;;  %v120_v57 = vld [vmem:[%s7894_s23 + $0x1f0] sm:$0xff] }
  0x1f   :  { %v4528_v49 = vcombine.high %v101_v43, %v105_v44  ;;  %v4527_v54 = vcombine.low %v101_v43, %v105_v44  ;;  %v5654_v9 = vld [vmem:[%s7691_s3 + $0x24] ss:$16 sps:$4 sm:$0xff]   ;;  %v5668_v11 = vld [vmem:[%s7691_s3 + $0x20] ss:$16 sps:$4 sm:$0xff]   ;;  %v5725_v19 = vld [vmem:[%s7691_s3 + $0x68] ss:$16 sps:$4 sm:$0xff]  }
  0x20   :  { %7899 = vst [vmem:[#allocation8_spill] sm:$0xff] %v5654_v9  ;;  %7901 = vst [vmem:[#allocation10_spill] sm:$0xff] %v5668_v11  ;;  %v5706_v16 = vld [vmem:[%s7691_s3 + $0x64] ss:$16 sps:$4 sm:$0xff]   ;;  %v5718_v18 = vld [vmem:[%s7691_s3 + $0x60] ss:$16 sps:$4 sm:$0xff]  }
  0x21   :  { %501 = vmatpush1.bf16.msra.mxu0 %v4521_v51  ;;  %544 = vmatpush1.bf16.msra.mxu1 %v4523_v52  ;;  %v109_v51 = vld [vmem:[%s7894_s23 + $0x198] sm:$0xff]  ;;  %7907 = vst [vmem:[#allocation16_spill] sm:$0xff] %v5706_v16  ;;  %7909 = vst [vmem:[#allocation18_spill] sm:$0xff] %v5718_v18  ;;  %v5730_v20 = vld [vmem:[%s7691_s3 + $0x84] ss:$16 sps:$4 sm:$0xff]  }
  0x22   :  { %502 = vmatprep.subr.bf16.mxu0 %v4530_v53  ;;  %545 = vmatprep.subr.bf16.mxu1 %v4532_v56  ;;  %v113_v52 = vld [vmem:[%s7894_s23 + $0x1b8] sm:$0xff]  ;;  %v4525_v53 = vcombine.low %v100_v40, %v104_v41  ;;  %v116_v56 = vld [vmem:[%s7894_s23 + $0x1d0] sm:$0xff]  ;;  %7910 = vst [vmem:[#allocation19_spill] sm:$0xff] %v5725_v19  ;;  %7911 = vst [vmem:[#allocation20_spill] sm:$0xff] %v5730_v20 }
  0x23   :  { %v4536_v58 = vcombine.high %v109_v51, %v113_v52  ;;  %v4535_v62 = vcombine.low %v109_v51, %v113_v52  ;;  %v4541_v1 = vcombine.low %v116_v56, %v120_v57  ;;  %v5754_v24 = vld [vmem:[%s7691_s3 + $0xa4] ss:$16 sps:$4 sm:$0xff]   ;;  %v5773_v27 = vld [vmem:[%s7691_s3 + $0xa8] ss:$16 sps:$4 sm:$0xff]   ;;  %v5814_v34 = vld [vmem:[%s7691_s3 + $0xe0] ss:$16 sps:$4 sm:$0xff]  }
  0x24   :  { %7915 = vst [vmem:[#allocation24_spill] sm:$0xff] %v5754_v24  ;;  %7918 = vst [vmem:[#allocation27_spill] sm:$0xff] %v5773_v27  ;;  %v5778_v28 = vld [vmem:[%s7691_s3 + $0xc4] ss:$16 sps:$4 sm:$0xff]   ;;  %v5821_v35 = vld [vmem:[%s7691_s3 + $0xe8] ss:$16 sps:$4 sm:$0xff]  }
  0x25   :  { %503 = vmatpush1.bf16.msra.mxu0 %v4529_v59  ;;  %546 = vmatpush1.bf16.msra.mxu1 %v4531_v60  ;;  %v117_v59 = vld [vmem:[%s7894_s23 + $0x1d8] sm:$0xff]  ;;  %7919 = vst [vmem:[#allocation28_spill] sm:$0xff] %v5778_v28  ;;  %v5802_v32 = vld [vmem:[%s7691_s3 + $0xe4] ss:$16 sps:$4 sm:$0xff]   ;;  %7925 = vst [vmem:[#allocation34_spill] sm:$0xff] %v5814_v34 }
  0x26   :  { %504 = vmatprep.subr.bf16.mxu0 %v4538_v61  ;;  %547 = vmatprep.subr.bf16.mxu1 %v4540_v63  ;;  %v121_v60 = vld [vmem:[%s7894_s23 + $0x1f8] sm:$0xff]  ;;  %v4533_v61 = vcombine.low %v108_v48, %v112_v50  ;;  %v4542_v63 = vcombine.high %v116_v56, %v120_v57  ;;  %7923 = vst [vmem:[#allocation32_spill] sm:$0xff] %v5802_v32  ;;  %7926 = vst [vmem:[#allocation35_spill] sm:$0xff] %v5821_v35  ;;  %v5826_v36 = vld [vmem:[%s7692_s4 + $0x4] ss:$16 sps:$4 sm:$0xff]  }
  0x27   :  { %v4544_v0 = vcombine.high %v117_v59, %v121_v60  ;;  %v4543_v2 = vcombine.low %v117_v59, %v121_v60  ;;  %7927 = vst [vmem:[#allocation36_spill] sm:$0xff] %v5826_v36  ;;  %v5850_v40 = vld [vmem:[%s7692_s4 + $0x24] ss:$16 sps:$4 sm:$0xff]   ;;  %v5856_v41 = vld [vmem:[%s7692_s4 + $0x2c] ss:$16 sps:$4 sm:$0xff]  }
  0x28   :  { %v5871_v43 = vld [vmem:[%s7692_s4 + $0x28] ss:$16 sps:$4 sm:$0xff]   ;;  %v5876_v44 = vld [vmem:[%s7692_s4 + $0x44] ss:$16 sps:$4 sm:$0xff]   ;;  %v5914_v50 = vld [vmem:[%s7692_s4 + $0x60] ss:$16 sps:$4 sm:$0xff]  }
  0x29   :  { %505 = vmatpush1.bf16.msra.mxu0 %v4537_v4  ;;  %548 = vmatpush1.bf16.msra.mxu1 %v4539_v5  ;;  %v5633_v4 = vld [vmem:[%s7691_s3 + $0x4] ss:$16 sps:$4 sm:$0xff]   ;;  %v5638_v5 = vld [vmem:[%s7691_s3 + $0xc] ss:$16 sps:$4 sm:$0xff]   ;;  %v5921_v51 = vld [vmem:[%s7692_s4 + $0x68] ss:$16 sps:$4 sm:$0xff]  }
  0x2a   :  { %576 = vmatprep.subr.bf16.mxu0 %v4486_v7  ;;  %619 = vmatprep.subr.bf16.mxu1 %v4488_v10  ;;  %7895 = vst [vmem:[#allocation4_spill] sm:$0xff] %v5633_v4  ;;  %7896 = vst [vmem:[#allocation5_spill] sm:$0xff] %v5638_v5  ;;  %v5643_v7 = vld [vmem:[%s7691_s3] ss:$16 sps:$4 sm:$0xff]   ;;  %v5660_v10 = vld [vmem:[%s7691_s3 + $0x2c] ss:$16 sps:$4 sm:$0xff]  }
  0x2b   :  { %7897 = vst [vmem:[#allocation6_spill] sm:$0xff] %v5643_v7  ;;  %7900 = vst [vmem:[#allocation9_spill] sm:$0xff] %v5660_v10  ;;  %v5902_v48 = vld [vmem:[%s7692_s4 + $0x64] ss:$16 sps:$4 sm:$0xff]   ;;  %v5956_v57 = vld [vmem:[%s7692_s4 + $0xac] ss:$16 sps:$4 sm:$0xff]  }
  0x2c   :  { %523 = vmatmul.mubr.bf16.vlgmr.msra.gmra.mrb[0].mxu0 %v5540_v6  ;;  %566 = vmatmul.mubr.bf16.vlgmr.msra.gmra.mrb[0].mxu1 %v5540_v6  ;;  %v5926_v52 = vld [vmem:[%s7692_s4 + $0x84] ss:$16 sps:$4 sm:$0xff]   ;;  %v5969_v59 = vld [vmem:[%s7692_s4 + $0xa8] ss:$16 sps:$4 sm:$0xff]  }
  0x2d   :  { %577 = vmatpush1.bf16.msra.mxu0 %v4485_v13  ;;  %620 = vmatpush1.bf16.msra.mxu1 %v4487_v14  ;;  %v5686_v13 = vld [vmem:[%s7691_s3 + $0x4c] ss:$16 sps:$4 sm:$0xff]   ;;  %v5694_v14 = vld [vmem:[%s7691_s3 + $0x40] ss:$16 sps:$4 sm:$0xff]   ;;  %v5950_v56 = vld [vmem:[%s7692_s4 + $0xa4] ss:$16 sps:$4 sm:$0xff]  }
  0x2e   :  { %578 = vmatprep.subr.bf16.mxu0 %v4494_v15  ;;  %621 = vmatprep.subr.bf16.mxu1 %v4496_v17  ;;  %7904 = vst [vmem:[#allocation13_spill] sm:$0xff] %v5686_v13  ;;  %7905 = vst [vmem:[#allocation14_spill] sm:$0xff] %v5694_v14  ;;  %v5701_v15 = vld [vmem:[%s7691_s3 + $0x48] ss:$16 sps:$4 sm:$0xff]   ;;  %v5712_v17 = vld [vmem:[%s7691_s3 + $0x6c] ss:$16 sps:$4 sm:$0xff]  }
  0x2f   :  { %608 = vmatprep.mubr.bf16.mxu0 %v7707_v3  ;;  %651 = vmatprep.mubr.bf16.mxu1 %v7707_v3  ;;  %7906 = vst [vmem:[#allocation15_spill] sm:$0xff] %v5701_v15  ;;  %7908 = vst [vmem:[#allocation17_spill] sm:$0xff] %v5712_v17  ;;  %v5974_v60 = vld [vmem:[%s7692_s4 + $0xc4] ss:$16 sps:$4 sm:$0xff]  }
  0x31   :  { %579 = vmatpush1.bf16.msra.mxu0 %v4493_v21  ;;  %622 = vmatpush1.bf16.msra.mxu1 %v4495_v22  ;;  %v5736_v21 = vld [vmem:[%s7691_s3 + $0x8c] ss:$16 sps:$4 sm:$0xff]   ;;  %v5742_v22 = vld [vmem:[%s7691_s3 + $0x80] ss:$16 sps:$4 sm:$0xff]  }
  0x32   :  { %580 = vmatprep.subr.bf16.mxu0 %v4502_v23  ;;  %623 = vmatprep.subr.bf16.mxu1 %v4504_v26  ;;  %7912 = vst [vmem:[#allocation21_spill] sm:$0xff] %v5736_v21  ;;  %7913 = vst [vmem:[#allocation22_spill] sm:$0xff] %v5742_v22  ;;  %v5749_v23 = vld [vmem:[%s7691_s3 + $0x88] ss:$16 sps:$4 sm:$0xff]   ;;  %v5766_v26 = vld [vmem:[%s7691_s3 + $0xa0] ss:$16 sps:$4 sm:$0xff]  }
  0x33   :  { %7914 = vst [vmem:[#allocation23_spill] sm:$0xff] %v5749_v23  ;;  %7917 = vst [vmem:[#allocation26_spill] sm:$0xff] %v5766_v26 }
  0x35   :  { %581 = vmatpush1.bf16.msra.mxu0 %v4501_v29  ;;  %624 = vmatpush1.bf16.msra.mxu1 %v4503_v30  ;;  %v5784_v29 = vld [vmem:[%s7691_s3 + $0xcc] ss:$16 sps:$4 sm:$0xff]   ;;  %v5790_v30 = vld [vmem:[%s7691_s3 + $0xc0] ss:$16 sps:$4 sm:$0xff]  }
  0x36   :  { %582 = vmatprep.subr.bf16.mxu0 %v4510_v31  ;;  %625 = vmatprep.subr.bf16.mxu1 %v4512_v33  ;;  %7920 = vst [vmem:[#allocation29_spill] sm:$0xff] %v5784_v29  ;;  %7921 = vst [vmem:[#allocation30_spill] sm:$0xff] %v5790_v30  ;;  %v5797_v31 = vld [vmem:[%s7691_s3 + $0xc8] ss:$16 sps:$4 sm:$0xff]   ;;  %v5808_v33 = vld [vmem:[%s7691_s3 + $0xec] ss:$16 sps:$4 sm:$0xff]  }
  0x37   :  { %7922 = vst [vmem:[#allocation31_spill] sm:$0xff] %v5797_v31  ;;  %7924 = vst [vmem:[#allocation33_spill] sm:$0xff] %v5808_v33 }
  0x39   :  { %583 = vmatpush1.bf16.msra.mxu0 %v4509_v37  ;;  %626 = vmatpush1.bf16.msra.mxu1 %v4511_v38  ;;  %v5832_v37 = vld [vmem:[%s7692_s4 + $0xc] ss:$16 sps:$4 sm:$0xff]   ;;  %v5838_v38 = vld [vmem:[%s7692_s4] ss:$16 sps:$4 sm:$0xff]  }
  0x3a   :  { %584 = vmatprep.subr.bf16.mxu0 %v4518_v39  ;;  %627 = vmatprep.subr.bf16.mxu1 %v4520_v42  ;;  %7928 = vst [vmem:[#allocation37_spill] sm:$0xff] %v5832_v37  ;;  %v5845_v39 = vld [vmem:[%s7692_s4 + $0x8] ss:$16 sps:$4 sm:$0xff]   ;;  %v5864_v42 = vld [vmem:[%s7692_s4 + $0x20] ss:$16 sps:$4 sm:$0xff]  }
  0x3d   :  { %585 = vmatpush1.bf16.msra.mxu0 %v4517_v45  ;;  %628 = vmatpush1.bf16.msra.mxu1 %v4519_v46  ;;  %v5882_v45 = vld [vmem:[%s7692_s4 + $0x4c] ss:$16 sps:$4 sm:$0xff]   ;;  %v5890_v46 = vld [vmem:[%s7692_s4 + $0x40] ss:$16 sps:$4 sm:$0xff]  }
  0x3e   :  { %586 = vmatprep.subr.bf16.mxu0 %v4526_v47  ;;  %629 = vmatprep.subr.bf16.mxu1 %v4528_v49  ;;  %v5897_v47 = vld [vmem:[%s7692_s4 + $0x48] ss:$16 sps:$4 sm:$0xff]   ;;  %v5908_v49 = vld [vmem:[%s7692_s4 + $0x6c] ss:$16 sps:$4 sm:$0xff]  }
  0x41   :  { %587 = vmatpush1.bf16.msra.mxu0 %v4525_v53  ;;  %630 = vmatpush1.bf16.msra.mxu1 %v4527_v54  ;;  %v5932_v53 = vld [vmem:[%s7692_s4 + $0x8c] ss:$16 sps:$4 sm:$0xff]   ;;  %v5938_v54 = vld [vmem:[%s7692_s4 + $0x80] ss:$16 sps:$4 sm:$0xff]  }
  0x42   :  { %588 = vmatprep.subr.bf16.mxu0 %v4534_v55  ;;  %631 = vmatprep.subr.bf16.mxu1 %v4536_v58  ;;  %v5945_v55 = vld [vmem:[%s7692_s4 + $0x88] ss:$16 sps:$4 sm:$0xff]   ;;  %v5962_v58 = vld [vmem:[%s7692_s4 + $0xa0] ss:$16 sps:$4 sm:$0xff]  }
  0x45   :  { %589 = vmatpush1.bf16.msra.mxu0 %v4533_v61  ;;  %632 = vmatpush1.bf16.msra.mxu1 %v4535_v62  ;;  %v5980_v61 = vld [vmem:[%s7692_s4 + $0xcc] ss:$16 sps:$4 sm:$0xff]   ;;  %v5986_v62 = vld [vmem:[%s7692_s4 + $0xc0] ss:$16 sps:$4 sm:$0xff]  }
  0x46   :  { %590 = vmatprep.subr.bf16.mxu0 %v4542_v63  ;;  %633 = vmatprep.subr.bf16.mxu1 %v4544_v0  ;;  %7929 = vst [vmem:[#allocation38_spill] sm:$0xff] %v5986_v62  ;;  %v5993_v63 = vld [vmem:[%s7692_s4 + $0xc8] ss:$16 sps:$4 sm:$0xff]   ;;  %v5998_v0 = vld [vmem:[%s7692_s4 + $0xe4] ss:$16 sps:$4 sm:$0xff]  }
  0x47   :  { %7930 = vst [vmem:[#allocation39_spill] sm:$0xff] %v5998_v0 }
  0x49   :  { %591 = vmatpush1.bf16.msra.mxu0 %v4541_v1  ;;  %634 = vmatpush1.bf16.msra.mxu1 %v4543_v2  ;;  %v6004_v1 = vld [vmem:[%s7692_s4 + $0xec] ss:$16 sps:$4 sm:$0xff]   ;;  %v6010_v2 = vld [vmem:[%s7692_s4 + $0xe0] ss:$16 sps:$4 sm:$0xff]  }
  0x4a   :  { %886 = vmatprep.subr.bf16.mxu0 %v5633_v4  ;;  %927 = vmatprep.subr.bf16.mxu1 %v5638_v5  ;;  %7931 = vst [vmem:[#allocation40_spill] sm:$0xff] %v6004_v1  ;;  %7932 = vst [vmem:[#allocation41_spill] sm:$0xff] %v6010_v2 }
  0x4c   :  { %609 = vmatmul.mubr.bf16.vlgmr.msra.gmra.mrb[4].mxu0 %v5540_v6  ;;  %652 = vmatmul.mubr.bf16.vlgmr.msra.gmra.mrb[4].mxu1 %v5540_v6  ;;  %v5680_v6 = vld [vmem:[%s7691_s3 + $0x44] ss:$16 sps:$4 sm:$0xff]  }
  0x4d   :  { %887 = vmatpush1.bf16.msra.mxu0 %v5643_v7  ;;  %928 = vmatpush1.bf16.msra.mxu1 %v5649_v8  ;;  %7903 = vst [vmem:[#allocation12_spill] sm:$0xff] %v5680_v6 }
  0x4e   :  { %888 = vmatprep.subr.bf16.mxu0 %v5654_v9  ;;  %929 = vmatprep.subr.bf16.mxu1 %v5660_v10 }
  0x4f   :  { %918 = vmatprep.mubr.bf16.mxu0 %v7707_v3  ;;  %959 = vmatprep.mubr.bf16.mxu1 %v7707_v3 }
  0x51   :  { %889 = vmatpush1.bf16.msra.mxu0 %v5668_v11  ;;  %930 = vmatpush1.bf16.msra.mxu1 %v5675_v12 }
  0x52   :  { %890 = vmatprep.subr.bf16.mxu0 %v5680_v6  ;;  %931 = vmatprep.subr.bf16.mxu1 %v5686_v13 }
  0x55   :  { %891 = vmatpush1.bf16.msra.mxu0 %v5694_v14  ;;  %932 = vmatpush1.bf16.msra.mxu1 %v5701_v15 }
  0x56   :  { %892 = vmatprep.subr.bf16.mxu0 %v5706_v16  ;;  %933 = vmatprep.subr.bf16.mxu1 %v5712_v17 }
  0x59   :  { %893 = vmatpush1.bf16.msra.mxu0 %v5718_v18  ;;  %934 = vmatpush1.bf16.msra.mxu1 %v5725_v19 }
  0x5a   :  { %894 = vmatprep.subr.bf16.mxu0 %v5730_v20  ;;  %935 = vmatprep.subr.bf16.mxu1 %v5736_v21 }
  0x5d   :  { %895 = vmatpush1.bf16.msra.mxu0 %v5742_v22  ;;  %936 = vmatpush1.bf16.msra.mxu1 %v5749_v23 }
  0x5e   :  { %896 = vmatprep.subr.bf16.mxu0 %v5754_v24  ;;  %937 = vmatprep.subr.bf16.mxu1 %v5760_v25 }
  0x61   :  { %897 = vmatpush1.bf16.msra.mxu0 %v5766_v26  ;;  %938 = vmatpush1.bf16.msra.mxu1 %v5773_v27 }
  0x62   :  { %898 = vmatprep.subr.bf16.mxu0 %v5778_v28  ;;  %939 = vmatprep.subr.bf16.mxu1 %v5784_v29 }
  0x65   :  { %899 = vmatpush1.bf16.msra.mxu0 %v5790_v30  ;;  %940 = vmatpush1.bf16.msra.mxu1 %v5797_v31 }
  0x66   :  { %900 = vmatprep.subr.bf16.mxu0 %v5802_v32  ;;  %941 = vmatprep.subr.bf16.mxu1 %v5808_v33 }
  0x69   :  { %901 = vmatpush1.bf16.msra.mxu0 %v5814_v34  ;;  %942 = vmatpush1.bf16.msra.mxu1 %v5821_v35 }
  0x6a   :  { %1188 = vmatprep.subr.bf16.mxu0 %v5826_v36  ;;  %1229 = vmatprep.subr.bf16.mxu1 %v5832_v37 }
  0x6c   :  { %919 = vmatmul.mubr.bf16.vlgmr.msra.gmra.mrb[8].mxu0 %v7707_v3  ;;  %960 = vmatmul.mubr.bf16.vlgmr.msra.gmra.mrb[8].mxu1 %v7707_v3 }
  0x6d   :  { %1189 = vmatpush1.bf16.msra.mxu0 %v5838_v38  ;;  %1230 = vmatpush1.bf16.msra.mxu1 %v5845_v39 }
  0x6e   :  { %1190 = vmatprep.subr.bf16.mxu0 %v5850_v40  ;;  %1231 = vmatprep.subr.bf16.mxu1 %v5856_v41 }
  0x6f   :  { %1220 = vmatprep.mubr.bf16.mxu0 %v7707_v3  ;;  %1261 = vmatprep.mubr.bf16.mxu1 %v7707_v3  ;;  %v6017_v3 = vld [vmem:[%s7692_s4 + $0xe8] ss:$16 sps:$4 sm:$0xff]  }
  0x70   :  { %7933 = vst [vmem:[#allocation42_spill] sm:$0xff] %v6017_v3 }
  0x71   :  { %1191 = vmatpush1.bf16.msra.mxu0 %v5864_v42  ;;  %1232 = vmatpush1.bf16.msra.mxu1 %v5871_v43 }
  0x72   :  { %1192 = vmatprep.subr.bf16.mxu0 %v5876_v44  ;;  %1233 = vmatprep.subr.bf16.mxu1 %v5882_v45 }
  0x75   :  { %1193 = vmatpush1.bf16.msra.mxu0 %v5890_v46  ;;  %1234 = vmatpush1.bf16.msra.mxu1 %v5897_v47 }
  0x76   :  { %1194 = vmatprep.subr.bf16.mxu0 %v5902_v48  ;;  %1235 = vmatprep.subr.bf16.mxu1 %v5908_v49 }
  0x79   :  { %1195 = vmatpush1.bf16.msra.mxu0 %v5914_v50  ;;  %1236 = vmatpush1.bf16.msra.mxu1 %v5921_v51 }
  0x7a   :  { %1196 = vmatprep.subr.bf16.mxu0 %v5926_v52  ;;  %1237 = vmatprep.subr.bf16.mxu1 %v5932_v53 }
  0x7d   :  { %1197 = vmatpush1.bf16.msra.mxu0 %v5938_v54  ;;  %1238 = vmatpush1.bf16.msra.mxu1 %v5945_v55 }
  0x7e   :  { %1198 = vmatprep.subr.bf16.mxu0 %v5950_v56  ;;  %1239 = vmatprep.subr.bf16.mxu1 %v5956_v57 }
  0x81   :  { %1199 = vmatpush1.bf16.msra.mxu0 %v5962_v58  ;;  %1240 = vmatpush1.bf16.msra.mxu1 %v5969_v59 }
  0x82   :  { %1200 = vmatprep.subr.bf16.mxu0 %v5974_v60  ;;  %1241 = vmatprep.subr.bf16.mxu1 %v5980_v61 }
  0x85   :  { %1201 = vmatpush1.bf16.msra.mxu0 %v5986_v62  ;;  %1242 = vmatpush1.bf16.msra.mxu1 %v5993_v63  ;;  %v7934_v62 = vmov 0  }
  0x86   :  { %1202 = vmatprep.subr.bf16.mxu0 %v5998_v0  ;;  %1243 = vmatprep.subr.bf16.mxu1 %v6004_v1 }
  0x89   :  { %1203 = vmatpush1.bf16.msra.mxu0 %v6010_v2  ;;  %1244 = vmatpush1.bf16.msra.mxu1 %v6017_v3 }
  0x8a   :  { %1355 = vmatprep.subr.bf16.mxu0 %v5633_v4  ;;  %1396 = vmatprep.subr.bf16.mxu1 %v5638_v5 }
  0x8c   :  { %1221 = vmatmul.mubr.bf16.vlgmr.msra.gmra.mrb[12].mxu0 %v7934_v62  ;;  %1262 = vmatmul.mubr.bf16.vlgmr.msra.gmra.mrb[12].mxu1 %v7934_v62 }
  0x8d   :  { %1356 = vmatpush1.bf16.msra.mxu0 %v5643_v7  ;;  %1397 = vmatpush1.bf16.msra.mxu1 %v5649_v8 }
  0x8e   :  { %1357 = vmatprep.subr.bf16.mxu0 %v5654_v9  ;;  %1398 = vmatprep.subr.bf16.mxu1 %v5660_v10 }
  0x8f   :  { %1387 = vmatprep.mubr.bf16.mxu0 %v7934_v62  ;;  %1428 = vmatprep.mubr.bf16.mxu1 %v7934_v62 }
  0x91   :  { %1358 = vmatpush1.bf16.msra.mxu0 %v5668_v11  ;;  %1399 = vmatpush1.bf16.msra.mxu1 %v5675_v12 }
  0x92   :  { %1359 = vmatprep.subr.bf16.mxu0 %v5680_v6  ;;  %1400 = vmatprep.subr.bf16.mxu1 %v5686_v13 }
  0x95   :  { %1360 = vmatpush1.bf16.msra.mxu0 %v5694_v14  ;;  %1401 = vmatpush1.bf16.msra.mxu1 %v5701_v15 }
  0x96   :  { %1361 = vmatprep.subr.bf16.mxu0 %v5706_v16  ;;  %1402 = vmatprep.subr.bf16.mxu1 %v5712_v17 }
  0x99   :  { %1362 = vmatpush1.bf16.msra.mxu0 %v5718_v18  ;;  %1403 = vmatpush1.bf16.msra.mxu1 %v5725_v19  ;;  %v6085_v18 = vld [vmem:[%s7693_s2] sm:$0xff] }
  0x9a   :  { %1363 = vmatprep.subr.bf16.mxu0 %v5730_v20  ;;  %1404 = vmatprep.subr.bf16.mxu1 %v5736_v21  ;;  %v7733_v21 = vlaneseq }
  0x9c   :  { %v6077_v20 = vshrl.u32 %v7733_v21, 7 }
  0x9d   :  { %1364 = vmatpush1.bf16.msra.mxu0 %v5742_v22  ;;  %1405 = vmatpush1.bf16.msra.mxu1 %v5749_v23 }
  0x9e   :  { %1365 = vmatprep.subr.bf16.mxu0 %v5754_v24  ;;  %1406 = vmatprep.subr.bf16.mxu1 %v5760_v25  ;;  %7935 = vst [vmem:[#allocation43_spill] sm:$0xff] %v6077_v20  ;;  %v6080_v19 = vsub.s32 0, %v6077_v20  ;;  %v6088_v17 = vsub.s32 1, %v6077_v20  ;;  %v134_v16 = vsub.s32 2, %v6077_v20  ;;  %v138_v9 = vsub.s32 3, %v6077_v20 }
  0xa0   :  { %7936 = vst [vmem:[#allocation44_spill] sm:$0xff] %v6080_v19  ;;  %7937 = vst [vmem:[#allocation45_spill] sm:$0xff] %v6088_v17  ;;  %v127_v15 = vrot.slane %v6085_v18, %v6080_v19  ;;  %v131_v21 = vrot.slane %v6085_v18, %v6088_v17  ;;  %v135_v14 = vrot.slane %v6085_v18, %v134_v16 }
  0xa1   :  { %1366 = vmatpush1.bf16.msra.mxu0 %v5766_v26  ;;  %1407 = vmatpush1.bf16.msra.mxu1 %v5773_v27 }
  0xa2   :  { %1367 = vmatprep.subr.bf16.mxu0 %v5778_v28  ;;  %1408 = vmatprep.subr.bf16.mxu1 %v5784_v29 }
  0xa5   :  { %1368 = vmatpush1.bf16.msra.mxu0 %v5790_v30  ;;  %1409 = vmatpush1.bf16.msra.mxu1 %v5797_v31 }
  0xa6   :  { %1369 = vmatprep.subr.bf16.mxu0 %v5802_v32  ;;  %1410 = vmatprep.subr.bf16.mxu1 %v5808_v33 }
  0xa9   :  { %1370 = vmatpush1.bf16.msra.mxu0 %v5814_v34  ;;  %1411 = vmatpush1.bf16.msra.mxu1 %v5821_v35 }
  0xaa   :  { %1514 = vmatprep.subr.bf16.mxu0 %v5826_v36  ;;  %1555 = vmatprep.subr.bf16.mxu1 %v5832_v37 }
  0xff   :  { %v524_v27 = vpop.f32.mrb[0].mxu0  ;;  %v567_v26 = vpop.f32.mrb[0].mxu1 }
 0x100   :  { %v526_v28 = vpop.f32.mrb[1].mxu0  ;;  %v569_v25 = vpop.f32.mrb[1].mxu1  ;;  %v6096_v13 = vadd.f32 %v524_v27, %v127_v15  ;;  %v6100_v12 = vadd.f32 %v567_v26, %v135_v14 }
 0x101   :  { %v528_v29 = vpop.f32.mrb[2].mxu0  ;;  %v571_v24 = vpop.f32.mrb[2].mxu1  ;;  %v6098_v6 = vadd.f32 %v526_v28, %v131_v21 }
 0x102   :  { %v530_v30 = vpop.f32.mrb[3].mxu0  ;;  %v573_v31 = vpop.f32.mrb[3].mxu1  ;;  %7938 = vst [vmem:[#allocation46_spill] sm:$0xff] %v6096_v13  ;;  %7940 = vst [vmem:[#allocation48_spill] sm:$0xff] %v6100_v12  ;;  %v6102_v10 = vadd.f32 %v528_v29, %v127_v15 }
 0x103   :  { %7939 = vst [vmem:[#allocation47_spill] sm:$0xff] %v6098_v6  ;;  %v6106_v4 = vadd.f32 %v530_v30, %v131_v21  ;;  %v139_v21 = vrot.slane %v6085_v18, %v138_v9  ;;  %v6113_v30 = vadd.f32 %v571_v24, %v135_v14 }
 0x104   :  { %7941 = vst [vmem:[#allocation49_spill] sm:$0xff] %v6102_v10 }
 0x105   :  { %7942 = vst [vmem:[#allocation50_spill] sm:$0xff] %v6106_v4  ;;  %7943 = vst [vmem:[#allocation51_spill] sm:$0xff] %v6113_v30 }
 0x11f   :  { %v6060_v23 = vpop.f32.mrb[4].mxu0  ;;  %v6064_v33 = vpop.f32.mrb[4].mxu1 }
 0x120   :  { %v6062_v32 = vpop.f32.mrb[5].mxu0  ;;  %v6068_v35 = vpop.f32.mrb[5].mxu1 }
 0x121   :  { %v6066_v34 = vpop.f32.mrb[6].mxu0  ;;  %v6072_v37 = vpop.f32.mrb[6].mxu1 }
 0x122   :  { %v6070_v36 = vpop.f32.mrb[7].mxu0  ;;  %v6074_v22 = vpop.f32.mrb[7].mxu1 }
 0x13f   :  { %v920_v11 = vpop.f32.mrb[8].mxu0  ;;  %v961_v19 = vpop.f32.mrb[8].mxu1 }
 0x140   :  { %v972_v8 = vrot.slane %v920_v11, 1  ;;  %v984_v7 = vadd.f32 %v920_v11, %v6096_v13  ;;  %v922_v5 = vpop.f32.mrb[9].mxu0  ;;  %v986_v16 = vadd.f32 %v961_v19, %v6100_v12  ;;  %v963_v17 = vpop.f32.mrb[9].mxu1  ;;  %v974_v29 = vrot.slane %v961_v19, 1 }
 0x141   :  { %v973_v27 = vrot.slane %v922_v5, 1  ;;  %v985_v28 = vadd.f32 %v922_v5, %v6098_v6  ;;  %v924_v26 = vpop.f32.mrb[10].mxu0  ;;  %v965_v1 = vpop.f32.mrb[10].mxu1  ;;  %v6118_v19 = vadd.f32 %v573_v31, %v139_v21 }
 0x142   :  { %v988_v3 = vadd.f32 %v972_v8, %v6102_v10  ;;  %v992_v15 = vmul.f32 0.5, %v984_v7  ;;  %v925_v2 = vpop.f32.mrb[11].mxu0  ;;  %v966_v13 = vpop.f32.mrb[11].mxu1  ;;  %v990_v26 = vadd.f32 %v974_v29, %v6113_v30  ;;  %v975_v7 = vrot.slane %v963_v17, 1 }
 0x143   :  { %v989_v0 = vadd.f32 %v973_v27, %v6106_v4  ;;  %v1000_v11 = vmul.f32 0.5, %v985_v28  ;;  %v6116_v8 = vadd.f32 %v569_v25, %v139_v21  ;;  %7945 = vst [vmem:[#allocation53_spill] sm:$0xff] %v6118_v19 }
 0x144   :  { %v993_v12 = vmul.f32 0.5, %v988_v3  ;;  %4880 = vtanh.f32 %v992_v15  ;;  %v991_v9 = vadd.f32 %v975_v7, %v6118_v19  ;;  %v142_v7 = vsub.s32 4, %v6077_v20 }
 0x145   :  { %4882 = vtanh.f32 %v986_v16  ;;  %v1001_v5 = vmul.f32 0.5, %v989_v0  ;;  %7944 = vst [vmem:[#allocation52_spill] sm:$0xff] %v6116_v8  ;;  %v987_v13 = vadd.f32 %v963_v17, %v6116_v8 }
 0x146   :  { %4884 = vtanh.f32 %v993_v12  ;;  %v1011_v0 = vmul.f32 0.5, %v991_v9 }
 0x147   :  { %4886 = vtanh.f32 %v1000_v11  ;;  %v1010_v3 = vmul.f32 0.5, %v987_v13  ;;  %v146_v13 = vsub.s32 5, %v6077_v20 }
 0x148   :  { %4888 = vtanh.f32 %v1001_v5 }
 0x149   :  { %4890 = vtanh.f32 %v990_v26 }
 0x14a   :  { %4892 = vtanh.f32 %v1010_v3  ;;  %v150_v3 = vsub.s32 6, %v6077_v20 }
 0x14b   :  { %4894 = vtanh.f32 %v1011_v0  ;;  %v147_v0 = vrot.slane %v6085_v18, %v146_v13 }
 0x14e   :  { %v4881_v14 = vpop.eup %4880 }
 0x14f   :  { %v4883_v24 = vpop.eup %4882  ;;  %v996_v1 = vadd.f32 1.0, %v4881_v14 }
 0x150   :  { %v4885_v12 = vpop.eup %4884 }
 0x151   :  { %v4887_v2 = vpop.eup %4886  ;;  %v997_v16 = vadd.f32 1.0, %v4885_v12  ;;  %v998_v27 = vmul.f32 0.5, %v996_v1 }
 0x152   :  { %v4889_v28 = vpop.eup %4888  ;;  %v1004_v25 = vadd.f32 1.0, %v4887_v2 }
 0x153   :  { %v999_v15 = vmul.f32 0.5, %v997_v16  ;;  %v1005_v31 = vadd.f32 1.0, %v4889_v28  ;;  %v1020_v29 = vmul.f32 %v4883_v24, %v998_v27  ;;  %v4891_v11 = vpop.eup %4890  ;;  %v143_v24 = vrot.slane %v6085_v18, %v142_v7 }
 0x154   :  { %v1006_v17 = vmul.f32 0.5, %v1004_v25  ;;  %v4893_v12 = vpop.eup %4892  ;;  %v151_v16 = vrot.slane %v6085_v18, %v150_v3  ;;  %v6138_v28 = vadd.f32 %v6062_v32, %v147_v0 }
 0x155   :  { %v1007_v21 = vmul.f32 0.5, %v1005_v31  ;;  %v1021_v5 = vmul.f32 %v4891_v11, %v999_v15  ;;  %v4895_v2 = vpop.eup %4894  ;;  %v6135_v27 = vadd.f32 %v6060_v23, %v143_v24  ;;  %v1014_v25 = vadd.f32 1.0, %v4893_v12 }
 0x156   :  { %v1018_v26 = vmul.f32 0.0, %v1006_v17  ;;  %v6141_v31 = vadd.f32 %v6066_v34, %v143_v24  ;;  %v6147_v32 = vadd.f32 %v6064_v33, %v151_v16  ;;  %v154_v12 = vsub.s32 7, %v6077_v20 }
 0x157   :  { %v1019_v9 = vmul.f32 0.0, %v1007_v21 }
 0x158   :  { %v6124_v14 = vadd.f32 %v1020_v29, %v1018_v26  ;;  %7948 = vst [vmem:[#allocation56_spill] sm:$0xff] %v6141_v31  ;;  %v1015_v29 = vadd.f32 1.0, %v4895_v2  ;;  %v6144_v26 = vadd.f32 %v6070_v36, %v147_v0 }
 0x159   :  { %v6126_v1 = vadd.f32 %v1021_v5, %v1019_v9 }
 0x15a   :  { %7946 = vst [vmem:[#allocation54_spill] sm:$0xff] %v6124_v14  ;;  %4896 = vtanh.f32 %v6124_v14 }
 0x15b   :  { %7947 = vst [vmem:[#allocation55_spill] sm:$0xff] %v6126_v1  ;;  %4898 = vtanh.f32 %v6126_v1  ;;  %v1016_v1 = vmul.f32 0.5, %v1014_v25  ;;  %v155_v25 = vrot.slane %v6085_v18, %v154_v12 }
 0x15d   :  { %v6164_v18 = vadd.f32 %v6074_v22, %v155_v25 }
 0x15f   :  { %v1222_v15 = vpop.f32.mrb[12].mxu0  ;;  %v1263_v21 = vpop.f32.mrb[12].mxu1 }
 0x160   :  { %v1274_v11 = vrot.slane %v1222_v15, 1  ;;  %v1278_v17 = vrot.slane %v1222_v15, 2  ;;  %v1224_v5 = vpop.f32.mrb[13].mxu0  ;;  %v1276_v7 = vrot.slane %v1263_v21, 1  ;;  %v1265_v9 = vpop.f32.mrb[13].mxu1  ;;  %v1280_v14 = vrot.slane %v1263_v21, 2 }
 0x161   :  { %v1275_v13 = vrot.slane %v1224_v5, 1  ;;  %v1279_v23 = vrot.slane %v1224_v5, 2  ;;  %v1226_v3 = vpop.f32.mrb[14].mxu0  ;;  %v1267_v15 = vpop.f32.mrb[14].mxu1 }
 0x162   :  { %v1290_v34 = vadd.f32 %v1274_v11, %v6135_v27  ;;  %v1294_v24 = vadd.f32 %v1278_v17, %v6141_v31  ;;  %v1227_v2 = vpop.f32.mrb[15].mxu0  ;;  %v1268_v5 = vpop.f32.mrb[15].mxu1  ;;  %v1017_v3 = vmul.f32 0.5, %v1015_v29  ;;  %v1292_v6 = vadd.f32 %v1276_v7, %v6147_v32 }
 0x163   :  { %v1291_v36 = vadd.f32 %v1275_v13, %v6138_v28  ;;  %v1295_v0 = vadd.f32 %v1279_v23, %v6144_v26  ;;  %v6156_v11 = vadd.f32 %v6072_v37, %v151_v16  ;;  %v1277_v7 = vrot.slane %v1265_v9, 1 }
 0x164   :  { %v4897_v19 = vpop.eup %4896  ;;  %v1298_v8 = vmul.f32 0.5, %v1290_v34  ;;  %v1299_v33 = vmul.f32 0.5, %v1294_v24  ;;  %v1281_v24 = vrot.slane %v1265_v9, 2  ;;  %v6161_v37 = vadd.f32 %v6068_v35, %v155_v25 }
 0x165   :  { %v4899_v20 = vpop.eup %4898  ;;  %v1026_v17 = vmul.f32 %v4897_v19, %v1016_v1  ;;  %v1306_v2 = vmul.f32 0.5, %v1291_v36  ;;  %v1307_v13 = vmul.f32 0.5, %v1295_v0  ;;  %v1296_v23 = vadd.f32 %v1280_v14, %v6156_v11 }
 0x166   :  { %v1027_v21 = vmul.f32 %v4899_v20, %v1017_v3  ;;  %4900 = vtanh.f32 %v1298_v8  ;;  %v1293_v8 = vadd.f32 %v1277_v7, %v6161_v37  ;;  %v1297_v1 = vadd.f32 %v1281_v24, %v6164_v18 }
 0x167   :  { %1334 = vst [vmem:[#allocation2] sm:$0x1] %v1026_v17  ;;  %4902 = vtanh.f32 %v1299_v33  ;;  %v1344_v29 = vpack.c.bf16 %v1026_v17, %v1026_v17 }
 0x168   :  { %1335 = vst [vmem:[#allocation2 + $0x10] sm:$0x1] %v1027_v21  ;;  %v1345_v34 = vpack.c.bf16 %v1027_v21, %v1027_v21  ;;  %4904 = vtanh.f32 %v1292_v6  ;;  %v1316_v12 = vmul.f32 0.5, %v1293_v8  ;;  %v1317_v36 = vmul.f32 0.5, %v1297_v1 }
 0x169   :  { %4906 = vtanh.f32 %v1306_v2  ;;  %v1348_v20 = vunpack.c.l.b16 %v1344_v29 }
 0x16a   :  { %v1349_v19 = vunpack.c.l.b16 %v1345_v34  ;;  %4908 = vtanh.f32 %v1307_v13 }
 0x16b   :  { %4910 = vtanh.f32 %v1296_v23 }
 0x16c   :  { %v1350_v14 = vrot.slane %v1349_v19, 7  ;;  %4912 = vtanh.f32 %v1316_v12 }
 0x16d   :  { %4914 = vtanh.f32 %v1317_v36 }
 0x16e   :  { %v1352_v6 = vsel %vm1351_vm0, %v1350_v14, %v1348_v20 }
 0x16f   :  { %v1353_v16 = vpack.c.b16 %v1352_v6, %v1352_v6  ;;  %v7949_v6 = vld [vmem:[#allocation38_spill] sm:$0xff] }
 0x170   :  { %v4901_v9 = vpop.eup %4900 }
 0x171   :  { %v4903_v35 = vpop.eup %4902  ;;  %v1302_v15 = vadd.f32 1.0, %v4901_v9  ;;  %1388 = vmatmul.mubr.bf16.vlgmr.msra.gmra.mrb[16].mxu0 %v1353_v16  ;;  %1429 = vmatmul.mubr.bf16.vlgmr.msra.gmra.mrb[16].mxu1 %v1353_v16  ;;  %v7951_v16 = vld [vmem:[#allocation40_spill] sm:$0xff] }
 0x172   :  { %v4905_v22 = vpop.eup %4904  ;;  %v1303_v0 = vadd.f32 1.0, %v4903_v35  ;;  %1515 = vmatpush1.bf16.msra.mxu0 %v5838_v38  ;;  %1556 = vmatpush1.bf16.msra.mxu1 %v5845_v39  ;;  %v7952_v35 = vld [vmem:[#allocation41_spill] sm:$0xff] }
 0x173   :  { %v4907_v5 = vpop.eup %4906  ;;  %v1304_v3 = vmul.f32 0.5, %v1302_v15  ;;  %1516 = vmatprep.subr.bf16.mxu0 %v5850_v40  ;;  %1557 = vmatprep.subr.bf16.mxu1 %v5856_v41  ;;  %v7953_v15 = vld [vmem:[#allocation42_spill] sm:$0xff] }
 0x174   :  { %v4909_v33 = vpop.eup %4908  ;;  %v1305_v17 = vmul.f32 0.5, %v1303_v0  ;;  %v1310_v2 = vadd.f32 1.0, %v4907_v5  ;;  %1546 = vmatprep.mubr.bf16.mxu0 %v7934_v62  ;;  %1587 = vmatprep.mubr.bf16.mxu1 %v7934_v62  ;;  %v7955_v0 = vld [vmem:[#allocation5_spill] sm:$0xff] }
 0x175   :  { %v4911_v25 = vpop.eup %4910  ;;  %v1311_v21 = vadd.f32 1.0, %v4909_v33  ;;  %v1326_v13 = vmul.f32 %v4905_v22, %v1304_v3  ;;  %v7954_v22 = vld [vmem:[#allocation4_spill] sm:$0xff]  ;;  %v7956_v3 = vld [vmem:[#allocation6_spill] sm:$0xff]  ;;  %v7957_v33 = vld [vmem:[#allocation7_spill] sm:$0xff] }
 0x176   :  { %v1312_v23 = vmul.f32 0.5, %v1310_v2  ;;  %v1327_v29 = vmul.f32 %v4911_v25, %v1305_v17  ;;  %1517 = vmatpush1.bf16.msra.mxu0 %v5864_v42  ;;  %1558 = vmatpush1.bf16.msra.mxu1 %v5871_v43  ;;  %v4913_v8 = vpop.eup %4912  ;;  %v7958_v17 = vld [vmem:[#allocation8_spill] sm:$0xff]  ;;  %v7959_v2 = vld [vmem:[#allocation9_spill] sm:$0xff]  ;;  %v7960_v25 = vld [vmem:[#allocation10_spill] sm:$0xff] }
 0x177   :  { %v1313_v34 = vmul.f32 0.5, %v1311_v21  ;;  %1518 = vmatprep.subr.bf16.mxu0 %v5876_v44  ;;  %1559 = vmatprep.subr.bf16.mxu1 %v5882_v45  ;;  %v4915_v14 = vpop.eup %4914  ;;  %v7961_v21 = vld [vmem:[#allocation11_spill] sm:$0xff] }
 0x178   :  { %v1324_v7 = vmul.f32 0.0, %v1312_v23  ;;  %v7963_v23 = vld [vmem:[#allocation13_spill] sm:$0xff] }
 0x179   :  { %v1325_v24 = vmul.f32 0.0, %v1313_v34  ;;  %v7965_v34 = vld [vmem:[#allocation15_spill] sm:$0xff] }
 0x17a   :  { %v6179_v19 = vadd.f32 %v1326_v13, %v1324_v7  ;;  %1519 = vmatpush1.bf16.msra.mxu0 %v5890_v46  ;;  %1560 = vmatpush1.bf16.msra.mxu1 %v5897_v47  ;;  %v1320_v46 = vadd.f32 1.0, %v4913_v8  ;;  %v1321_v47 = vadd.f32 1.0, %v4915_v14  ;;  %v7962_v13 = vld [vmem:[#allocation12_spill] sm:$0xff]  ;;  %v7968_v8 = vld [vmem:[#allocation18_spill] sm:$0xff]  ;;  %v7969_v14 = vld [vmem:[#allocation19_spill] sm:$0xff] }
 0x17b   :  { %v6183_v20 = vadd.f32 %v1327_v29, %v1325_v24  ;;  %1520 = vmatprep.subr.bf16.mxu0 %v5902_v48  ;;  %1561 = vmatprep.subr.bf16.mxu1 %v5908_v49  ;;  %v7964_v29 = vld [vmem:[#allocation14_spill] sm:$0xff]  ;;  %v7966_v7 = vld [vmem:[#allocation16_spill] sm:$0xff]  ;;  %v7967_v24 = vld [vmem:[#allocation17_spill] sm:$0xff] }
 0x17c   :  { %4916 = vtanh.f32 %v6179_v19  ;;  %v1322_v48 = vmul.f32 0.5, %v1320_v46  ;;  %v7970_v46 = vld [vmem:[#allocation20_spill] sm:$0xff] }
 0x17d   :  { %4918 = vtanh.f32 %v6183_v20 }
 0x17e   :  { %1521 = vmatpush1.bf16.msra.mxu0 %v5914_v50  ;;  %1562 = vmatpush1.bf16.msra.mxu1 %v5921_v51  ;;  %v1323_v50 = vmul.f32 0.5, %v1321_v47  ;;  %v7971_v47 = vld [vmem:[#allocation21_spill] sm:$0xff] }
 0x17f   :  { %1522 = vmatprep.subr.bf16.mxu0 %v5926_v52  ;;  %1563 = vmatprep.subr.bf16.mxu1 %v5932_v53 }
 0x182   :  { %1523 = vmatpush1.bf16.msra.mxu0 %v5938_v54  ;;  %1564 = vmatpush1.bf16.msra.mxu1 %v5945_v55 }
 0x183   :  { %1524 = vmatprep.subr.bf16.mxu0 %v5950_v56  ;;  %1565 = vmatprep.subr.bf16.mxu1 %v5956_v57 }
 0x186   :  { %v4917_v49 = vpop.eup %4916  ;;  %1525 = vmatpush1.bf16.msra.mxu0 %v5962_v58  ;;  %1566 = vmatpush1.bf16.msra.mxu1 %v5969_v59  ;;  %v7950_v58 = vld [vmem:[#allocation39_spill] sm:$0xff] }
 0x187   :  { %v4919_v51 = vpop.eup %4918  ;;  %v1332_v52 = vmul.f32 %v4917_v49, %v1322_v48  ;;  %1526 = vmatprep.subr.bf16.mxu0 %v5974_v60  ;;  %1567 = vmatprep.subr.bf16.mxu1 %v5980_v61  ;;  %v7972_v48 = vld [vmem:[#allocation22_spill] sm:$0xff]  ;;  %v7973_v49 = vld [vmem:[#allocation23_spill] sm:$0xff] }
 0x188   :  { %v1333_v53 = vmul.f32 %v4919_v51, %v1323_v50  ;;  %v7974_v50 = vld [vmem:[#allocation24_spill] sm:$0xff]  ;;  %v7975_v51 = vld [vmem:[#allocation25_spill] sm:$0xff] }
 0x189   :  { %v1338_v54 = vrot.slane %v1332_v52, 7  ;;  %v1503_v55 = vpack.c.bf16 %v1332_v52, %v1332_v52  ;;  %v7976_v52 = vld [vmem:[#allocation26_spill] sm:$0xff] }
 0x18a   :  { %v1339_v1 = vrot.slane %v1333_v53, 7  ;;  %v1504_v56 = vpack.c.bf16 %v1333_v53, %v1333_v53  ;;  %1527 = vmatpush1.bf16.msra.mxu0 %v7949_v6  ;;  %1568 = vmatpush1.bf16.msra.mxu1 %v5993_v63  ;;  %v7977_v53 = vld [vmem:[#allocation27_spill] sm:$0xff]  ;;  %v7982_v6 = vld [vmem:[#allocation32_spill] sm:$0xff] }
 0x18b   :  { %1342 = vst [vmem:[#allocation2 + $0xf] sm:$0x1] %v1338_v54  ;;  %v1507_v57 = vunpack.c.l.b16 %v1503_v55  ;;  %1528 = vmatprep.subr.bf16.mxu0 %v7950_v58  ;;  %1569 = vmatprep.subr.bf16.mxu1 %v7951_v16  ;;  %v7978_v54 = vld [vmem:[#allocation28_spill] sm:$0xff]  ;;  %v7979_v55 = vld [vmem:[#allocation29_spill] sm:$0xff]  ;;  %v7984_v58 = vld [vmem:[#allocation34_spill] sm:$0xff] }
 0x18c   :  { %1343 = vst [vmem:[#allocation2 + $0x1f] sm:$0x1] %v1339_v1  ;;  %v1508_v9 = vunpack.c.l.b16 %v1504_v56  ;;  %v7980_v1 = vld [vmem:[#allocation30_spill] sm:$0xff]  ;;  %v7981_v56 = vld [vmem:[#allocation31_spill] sm:$0xff] }
 0x18d   :  { %v1509_v12 = vrot.slane %v1507_v57, 7  ;;  %v7983_v57 = vld [vmem:[#allocation33_spill] sm:$0xff]  ;;  %v7985_v16 = vld [vmem:[#allocation35_spill] sm:$0xff] }
 0x18e   :  { %1529 = vmatpush1.bf16.msra.mxu0 %v7952_v35  ;;  %1570 = vmatpush1.bf16.msra.mxu1 %v7953_v15  ;;  %v1510_v36 = vrot.slane %v1508_v9, 6  ;;  %v7986_v9 = vld [vmem:[#allocation36_spill] sm:$0xff] }
 0x18f   :  { %1692 = vmatprep.subr.bf16.mxu0 %v7954_v22  ;;  %1733 = vmatprep.subr.bf16.mxu1 %v7955_v0 }
 0x190   :  { %v1511_v63 = vsel %vm1351_vm0, %v1510_v36, %v1509_v12  ;;  %v7987_v12 = vld [vmem:[#allocation37_spill] sm:$0xff] }
 0x191   :  { %v1512_v5 = vpack.c.b16 %v1511_v63, %v1511_v63 }
 0x193   :  { %1547 = vmatmul.mubr.bf16.vlgmr.msra.gmra.mrb[20].mxu0 %v1512_v5  ;;  %1588 = vmatmul.mubr.bf16.vlgmr.msra.gmra.mrb[20].mxu1 %v1512_v5 }
 0x194   :  { %1693 = vmatpush1.bf16.msra.mxu0 %v7956_v3  ;;  %1734 = vmatpush1.bf16.msra.mxu1 %v7957_v33 }
 0x195   :  { %1694 = vmatprep.subr.bf16.mxu0 %v7958_v17  ;;  %1735 = vmatprep.subr.bf16.mxu1 %v7959_v2 }
 0x196   :  { %1724 = vmatprep.mubr.bf16.mxu0 %v7934_v62  ;;  %1765 = vmatprep.mubr.bf16.mxu1 %v7934_v62 }
 0x198   :  { %1695 = vmatpush1.bf16.msra.mxu0 %v7960_v25  ;;  %1736 = vmatpush1.bf16.msra.mxu1 %v7961_v21  ;;  %v7988_v25 = vld [vmem:[#allocation46_spill] sm:$0xff] }
 0x199   :  { %1696 = vmatprep.subr.bf16.mxu0 %v7962_v13  ;;  %1737 = vmatprep.subr.bf16.mxu1 %v7963_v23 }
 0x19c   :  { %1697 = vmatpush1.bf16.msra.mxu0 %v7964_v29  ;;  %1738 = vmatpush1.bf16.msra.mxu1 %v7965_v34 }
 0x19d   :  { %1698 = vmatprep.subr.bf16.mxu0 %v7966_v7  ;;  %1739 = vmatprep.subr.bf16.mxu1 %v7967_v24  ;;  %v7989_v7 = vld [vmem:[#allocation47_spill] sm:$0xff] }
 0x1a0   :  { %1699 = vmatpush1.bf16.msra.mxu0 %v7968_v8  ;;  %1740 = vmatpush1.bf16.msra.mxu1 %v7969_v14 }
 0x1a1   :  { %1700 = vmatprep.subr.bf16.mxu0 %v7970_v46  ;;  %1741 = vmatprep.subr.bf16.mxu1 %v7971_v47  ;;  %v7990_v47 = vld [vmem:[#allocation48_spill] sm:$0xff] }
 0x1a4   :  { %1701 = vmatpush1.bf16.msra.mxu0 %v7972_v48  ;;  %1742 = vmatpush1.bf16.msra.mxu1 %v7973_v49 }
 0x1a5   :  { %1702 = vmatprep.subr.bf16.mxu0 %v7974_v50  ;;  %1743 = vmatprep.subr.bf16.mxu1 %v7975_v51  ;;  %v7991_v50 = vld [vmem:[#allocation52_spill] sm:$0xff] }
 0x1a8   :  { %1703 = vmatpush1.bf16.msra.mxu0 %v7976_v52  ;;  %1744 = vmatpush1.bf16.msra.mxu1 %v7977_v53  ;;  %v7992_v52 = vld [vmem:[#allocation53_spill] sm:$0xff] }
 0x1a9   :  { %1704 = vmatprep.subr.bf16.mxu0 %v7978_v54  ;;  %1745 = vmatprep.subr.bf16.mxu1 %v7979_v55 }
 0x1ac   :  { %1705 = vmatpush1.bf16.msra.mxu0 %v7980_v1  ;;  %1746 = vmatpush1.bf16.msra.mxu1 %v7981_v56 }
 0x1ad   :  { %1706 = vmatprep.subr.bf16.mxu0 %v7982_v6  ;;  %1747 = vmatprep.subr.bf16.mxu1 %v7983_v57 }
 0x1b0   :  { %1707 = vmatpush1.bf16.msra.mxu0 %v7984_v58  ;;  %1748 = vmatpush1.bf16.msra.mxu1 %v7985_v16 }
 0x1b1   :  { %1855 = vmatprep.subr.bf16.mxu0 %v7986_v9  ;;  %1896 = vmatprep.subr.bf16.mxu1 %v7987_v12 }
 0x244   :  { %v1389_v35 = vpop.f32.mrb[16].mxu0  ;;  %v1430_v15 = vpop.f32.mrb[16].mxu1 }
 0x245   :  { %v1441_v36 = vrot.slane %v1389_v35, 7  ;;  %v1457_v22 = vadd.f32 %v1389_v35, %v6102_v10  ;;  %v1391_v0 = vpop.f32.mrb[17].mxu0  ;;  %v1432_v63 = vpop.f32.mrb[17].mxu1  ;;  %v1459_v5 = vadd.f32 %v1430_v15, %v6113_v30  ;;  %v1443_v23 = vrot.slane %v1430_v15, 7 }
 0x246   :  { %v1442_v3 = vrot.slane %v1391_v0, 7  ;;  %v1458_v33 = vadd.f32 %v1391_v0, %v6106_v4  ;;  %v1393_v17 = vpop.f32.mrb[18].mxu0  ;;  %v1434_v2 = vpop.f32.mrb[18].mxu1  ;;  %v1444_v49 = vrot.slane %v1432_v63, 7  ;;  %v1460_v53 = vadd.f32 %v1432_v63, %v7992_v52 }
 0x247   :  { %v1453_v21 = vadd.f32 %v1441_v36, %v7988_v25  ;;  %v1462_v13 = vmul.f32 0.5, %v1457_v22  ;;  %v1394_v29 = vpop.f32.mrb[19].mxu0  ;;  %v1435_v34 = vpop.f32.mrb[19].mxu1  ;;  %v1455_v48 = vadd.f32 %v1443_v23, %v7990_v47  ;;  %v7994_v17 = vld [vmem:[#allocation55_spill] sm:$0xff] }
 0x248   :  { %v1454_v24 = vadd.f32 %v1442_v3, %v7989_v7  ;;  %v1470_v14 = vmul.f32 0.5, %v1458_v33  ;;  %v1456_v51 = vadd.f32 %v1444_v49, %v7991_v50  ;;  %v1480_v6 = vmul.f32 0.5, %v1460_v53 }
 0x249   :  { %v1461_v8 = vmul.f32 0.5, %v1453_v21  ;;  %4920 = vtanh.f32 %v1462_v13  ;;  %v1490_v2 = vrot.slane %v7994_v17, 7 }
 0x24a   :  { %4922 = vtanh.f32 %v1459_v5  ;;  %v1469_v46 = vmul.f32 0.5, %v1454_v24  ;;  %v1479_v55 = vmul.f32 0.5, %v1456_v51  ;;  %v7993_v5 = vld [vmem:[#allocation54_spill] sm:$0xff] }
 0x24b   :  { %4924 = vtanh.f32 %v1461_v8  ;;  %v1489_v3 = vrot.slane %v7993_v5, 7 }
 0x24c   :  { %4926 = vtanh.f32 %v1469_v46 }
 0x24d   :  { %4928 = vtanh.f32 %v1470_v14 }
 0x24e   :  { %4930 = vtanh.f32 %v1455_v48 }
 0x24f   :  { %4932 = vtanh.f32 %v1479_v55 }
 0x250   :  { %4934 = vtanh.f32 %v1480_v6 }
 0x253   :  { %v4921_v54 = vpop.eup %4920 }
 0x254   :  { %v4923_v1 = vpop.eup %4922  ;;  %v1466_v56 = vadd.f32 1.0, %v4921_v54 }
 0x255   :  { %v4925_v57 = vpop.eup %4924 }
 0x256   :  { %v4927_v58 = vpop.eup %4926  ;;  %v1465_v16 = vadd.f32 1.0, %v4925_v57  ;;  %v1468_v9 = vmul.f32 0.5, %v1466_v56 }
 0x257   :  { %v4929_v12 = vpop.eup %4928  ;;  %v1473_v35 = vadd.f32 1.0, %v4927_v58 }
 0x258   :  { %v1467_v15 = vmul.f32 0.5, %v1465_v16  ;;  %v1474_v36 = vadd.f32 1.0, %v4929_v12  ;;  %v1496_v22 = vmul.f32 %v4923_v1, %v1468_v9  ;;  %v4931_v0 = vpop.eup %4930 }
 0x259   :  { %v1475_v63 = vmul.f32 0.5, %v1473_v35  ;;  %v4933_v24 = vpop.eup %4932 }
 0x25a   :  { %v1476_v33 = vmul.f32 0.5, %v1474_v36  ;;  %v1495_v21 = vmul.f32 %v4931_v0, %v1467_v15  ;;  %v4935_v8 = vpop.eup %4934  ;;  %v1483_v14 = vadd.f32 1.0, %v4933_v24 }
 0x25b   :  { %v1493_v13 = vmul.f32 %v1489_v3, %v1475_v63  ;;  %v1484_v46 = vadd.f32 1.0, %v4935_v8 }
 0x25c   :  { %v1494_v23 = vmul.f32 %v1490_v2, %v1476_v33  ;;  %v1485_v1 = vmul.f32 0.5, %v1483_v14 }
 0x25d   :  { %v6254_v29 = vadd.f32 %v1495_v21, %v1493_v13  ;;  %v1486_v12 = vmul.f32 0.5, %v1484_v46 }
 0x25e   :  { %v6256_v34 = vadd.f32 %v1496_v22, %v1494_v23 }
 0x25f   :  { %4936 = vtanh.f32 %v6254_v29 }
 0x260   :  { %4938 = vtanh.f32 %v6256_v34 }
 0x266   :  { %v1548_v48 = vpop.f32.mrb[20].mxu0  ;;  %v1589_v49 = vpop.f32.mrb[20].mxu1 }
 0x267   :  { %v1600_v51 = vrot.slane %v1548_v48, 2  ;;  %v1604_v53 = vrot.slane %v1548_v48, 3  ;;  %v1550_v54 = vpop.f32.mrb[21].mxu0  ;;  %v1591_v55 = vpop.f32.mrb[21].mxu1  ;;  %v1602_v56 = vrot.slane %v1589_v49, 2  ;;  %v1606_v3 = vrot.slane %v1589_v49, 3 }
 0x268   :  { %v1601_v6 = vrot.slane %v1550_v54, 2  ;;  %v1605_v57 = vrot.slane %v1550_v54, 3  ;;  %v1552_v58 = vpop.f32.mrb[22].mxu0  ;;  %v1593_v16 = vpop.f32.mrb[22].mxu1  ;;  %v1607_v54 = vrot.slane %v1591_v55, 3 }
 0x269   :  { %v4937_v9 = vpop.eup %4936  ;;  %v1616_v35 = vadd.f32 %v1600_v51, %v6135_v27  ;;  %v1620_v15 = vadd.f32 %v1604_v53, %v6141_v31  ;;  %v1553_v36 = vpop.f32.mrb[23].mxu0  ;;  %v1618_v24 = vadd.f32 %v1602_v56, %v6147_v32  ;;  %v1622_v49 = vadd.f32 %v1606_v3, %v6156_v11 }
 0x26a   :  { %v1594_v22 = vpop.f32.mrb[23].mxu1  ;;  %v4939_v0 = vpop.eup %4938  ;;  %v1501_v5 = vmul.f32 %v4937_v9, %v1485_v1  ;;  %v1617_v63 = vadd.f32 %v1601_v6, %v6138_v28  ;;  %v1621_v33 = vadd.f32 %v1605_v57, %v6144_v26  ;;  %v1603_v53 = vrot.slane %v1591_v55, 2 }
 0x26b   :  { %v1502_v17 = vmul.f32 %v4939_v0, %v1486_v12  ;;  %v1624_v2 = vmul.f32 0.5, %v1616_v35  ;;  %v1625_v21 = vmul.f32 0.5, %v1620_v15  ;;  %v1623_v58 = vadd.f32 %v1607_v54, %v6164_v18  ;;  %v6344_v54 = vld [vmem:[%s7692_s4 + $0x88] ss:$16 sps:$4 sm:$0xff]  }
 0x26c   :  { %v1668_v13 = vrot.slane %v1501_v5, 1  ;;  %v1682_v23 = vpack.c.bf16 %v1501_v5, %v1501_v5  ;;  %v1632_v8 = vmul.f32 0.5, %v1617_v63  ;;  %v1633_v48 = vmul.f32 0.5, %v1621_v33 }
 0x26d   :  { %v1669_v14 = vrot.slane %v1502_v17, 1  ;;  %v1683_v46 = vpack.c.bf16 %v1502_v17, %v1502_v17  ;;  %4940 = vtanh.f32 %v1624_v2  ;;  %v1619_v56 = vadd.f32 %v1603_v53, %v6161_v37  ;;  %v6338_v53 = vld [vmem:[%s7692_s4 + $0x80] ss:$16 sps:$4 sm:$0xff]  }
 0x26e   :  { %1672 = vst [vmem:[#allocation2 + $0x1] sm:$0x1] %v1668_v13  ;;  %v1686_v51 = vunpack.c.l.b16 %v1682_v23  ;;  %4942 = vtanh.f32 %v1625_v21  ;;  %v1643_v12 = vmul.f32 0.5, %v1623_v58  ;;  %v1652_v33 = vrot.slane %v6179_v19, 1  ;;  %v6296_v19 = vld [vmem:[%s7692_s4 + $0x64] ss:$16 sps:$4 sm:$0xff]  }
 0x26f   :  { %1673 = vst [vmem:[#allocation2 + $0x11] sm:$0x1] %v1669_v14  ;;  %4944 = vtanh.f32 %v1632_v8  ;;  %v1687_v1 = vunpack.c.l.b16 %v1683_v46  ;;  %v1642_v9 = vmul.f32 0.5, %v1619_v56  ;;  %v1653_v21 = vrot.slane %v6183_v20, 1  ;;  %v6302_v20 = vld [vmem:[%s7692_s4 + $0x6c] ss:$16 sps:$4 sm:$0xff]  }
 0x270   :  { %4946 = vtanh.f32 %v1633_v48  ;;  %v1688_v6 = vrot.slane %v1686_v51, 1  ;;  %v6313_v8 = vld [vmem:[%s7692_s4 + $0x60] ss:$16 sps:$4 sm:$0xff]   ;;  %v6319_v14 = vld [vmem:[%s7692_s4 + $0x68] ss:$16 sps:$4 sm:$0xff]  }
 0x271   :  { %4948 = vtanh.f32 %v1618_v24  ;;  %v6326_v46 = vld [vmem:[%s7692_s4 + $0x84] ss:$16 sps:$4 sm:$0xff]   ;;  %v6332_v48 = vld [vmem:[%s7692_s4 + $0x8c] ss:$16 sps:$4 sm:$0xff]   ;;  %v6362_v58 = vld [vmem:[%s7692_s4 + $0xa0] ss:$16 sps:$4 sm:$0xff]  }
 0x272   :  { %4950 = vtanh.f32 %v1622_v49  ;;  %v1689_v57 = vsel %vm1351_vm0, %v1687_v1, %v1688_v6  ;;  %v6350_v6 = vld [vmem:[%s7692_s4 + $0xa4] ss:$16 sps:$4 sm:$0xff]   ;;  %v6356_v56 = vld [vmem:[%s7692_s4 + $0xac] ss:$16 sps:$4 sm:$0xff]  }
 0x273   :  { %v1690_v16 = vpack.c.b16 %v1689_v57, %v1689_v57  ;;  %4952 = vtanh.f32 %v1642_v9 }
 0x274   :  { %4954 = vtanh.f32 %v1643_v12 }
 0x275   :  { %1725 = vmatmul.mubr.bf16.vlgmr.msra.gmra.mrb[24].mxu0 %v1690_v16  ;;  %1766 = vmatmul.mubr.bf16.vlgmr.msra.gmra.mrb[24].mxu1 %v1690_v16 }
 0x276   :  { %1856 = vmatpush1.bf16.msra.mxu0 %v5838_v38  ;;  %1897 = vmatpush1.bf16.msra.mxu1 %v5845_v39 }
 0x277   :  { %v4941_v55 = vpop.eup %4940  ;;  %1857 = vmatprep.subr.bf16.mxu0 %v5850_v40  ;;  %1898 = vmatprep.subr.bf16.mxu1 %v5856_v41 }
 0x278   :  { %v4943_v35 = vpop.eup %4942  ;;  %v1628_v15 = vadd.f32 1.0, %v4941_v55  ;;  %1887 = vmatprep.mubr.bf16.mxu0 %v7934_v62  ;;  %1928 = vmatprep.mubr.bf16.mxu1 %v7934_v62 }
 0x279   :  { %v4945_v36 = vpop.eup %4944  ;;  %v1629_v22 = vadd.f32 1.0, %v4943_v35 }
 0x27a   :  { %v4947_v0 = vpop.eup %4946  ;;  %v1630_v5 = vmul.f32 0.5, %v1628_v15  ;;  %v1636_v3 = vadd.f32 1.0, %v4945_v36  ;;  %1858 = vmatpush1.bf16.msra.mxu0 %v5864_v42  ;;  %1899 = vmatpush1.bf16.msra.mxu1 %v5871_v43  ;;  %v6284_v43 = vld [vmem:[%s7692_s4 + $0x40] ss:$16 sps:$4 sm:$0xff]  }
 0x27b   :  { %v4949_v38 = vpop.eup %4948  ;;  %v1631_v39 = vmul.f32 0.5, %v1629_v22  ;;  %v1637_v40 = vadd.f32 1.0, %v4947_v0  ;;  %1859 = vmatprep.subr.bf16.mxu0 %v5876_v44  ;;  %1900 = vmatprep.subr.bf16.mxu1 %v5882_v45  ;;  %v6290_v44 = vld [vmem:[%s7692_s4 + $0x48] ss:$16 sps:$4 sm:$0xff]   ;;  %v6371_v36 = vld [vmem:[%s7692_s4 + $0xc0] ss:$16 sps:$4 sm:$0xff]  }
 0x27c   :  { %v4951_v41 = vpop.eup %4950  ;;  %v1638_v63 = vmul.f32 0.5, %v1636_v3  ;;  %v1658_v17 = vmul.f32 %v4949_v38, %v1630_v5  ;;  %v6383_v22 = vld [vmem:[%s7692_s4 + $0xe4] ss:$16 sps:$4 sm:$0xff]   ;;  %v6389_v0 = vld [vmem:[%s7692_s4 + $0xec] ss:$16 sps:$4 sm:$0xff]  }
 0x27d   :  { %v1639_v2 = vmul.f32 0.5, %v1637_v40  ;;  %v1659_v13 = vmul.f32 %v4951_v41, %v1631_v39  ;;  %v4953_v51 = vpop.eup %4952  ;;  %7995 = vst [vmem:[#allocation38_spill] sm:$0xff] %v6389_v0  ;;  %v6395_v40 = vld [vmem:[%s7692_s4 + $0xe0] ss:$16 sps:$4 sm:$0xff]   ;;  %v6401_v41 = vld [vmem:[%s7692_s4 + $0xe8] ss:$16 sps:$4 sm:$0xff]  }
 0x27e   :  { %v1656_v42 = vmul.f32 %v1652_v33, %v1638_v63  ;;  %1860 = vmatpush1.bf16.msra.mxu0 %v6284_v43  ;;  %1901 = vmatpush1.bf16.msra.mxu1 %v6290_v44  ;;  %v4955_v49 = vpop.eup %4954  ;;  %v1646_v1 = vadd.f32 1.0, %v4953_v51  ;;  %7996 = vst [vmem:[#allocation39_spill] sm:$0xff] %v6395_v40  ;;  %7997 = vst [vmem:[#allocation40_spill] sm:$0xff] %v6401_v41  ;;  %v6407_v33 = vld [vmem:[%s7691_s3 + $0x4] ss:$16 sps:$4 sm:$0xff]  }
 0x27f   :  { %v1657_v45 = vmul.f32 %v1653_v21, %v1639_v2  ;;  %1861 = vmatprep.subr.bf16.mxu0 %v6296_v19  ;;  %1902 = vmatprep.subr.bf16.mxu1 %v6302_v20  ;;  %v1647_v57 = vadd.f32 1.0, %v4955_v49  ;;  %7998 = vst [vmem:[#allocation41_spill] sm:$0xff] %v6407_v33  ;;  %v6432_v51 = vld [vmem:[%s7691_s3 + $0x24] ss:$16 sps:$4 sm:$0xff]   ;;  %v6438_v49 = vld [vmem:[%s7691_s3 + $0x2c] ss:$16 sps:$4 sm:$0xff]  }
 0x280   :  { %v6305_v23 = vadd.f32 %v1658_v17, %v1656_v42  ;;  %v1648_v16 = vmul.f32 0.5, %v1646_v1  ;;  %v6413_v17 = vld [vmem:[%s7691_s3 + $0xc] ss:$16 sps:$4 sm:$0xff]   ;;  %v6420_v42 = vld [vmem:[%s7691_s3] ss:$16 sps:$4 sm:$0xff]   ;;  %8002 = vst [vmem:[#allocation6_spill] sm:$0xff] %v6432_v51 }
 0x281   :  { %v6307_v24 = vadd.f32 %v1659_v13, %v1657_v45  ;;  %v1649_v55 = vmul.f32 0.5, %v1647_v57  ;;  %7999 = vst [vmem:[#allocation42_spill] sm:$0xff] %v6413_v17  ;;  %8000 = vst [vmem:[#allocation4_spill] sm:$0xff] %v6420_v42  ;;  %v6426_v45 = vld [vmem:[%s7691_s3 + $0x8] ss:$16 sps:$4 sm:$0xff]  }
 0x282   :  { %4956 = vtanh.f32 %v6305_v23  ;;  %1862 = vmatpush1.bf16.msra.mxu0 %v6313_v8  ;;  %1903 = vmatpush1.bf16.msra.mxu1 %v6319_v14  ;;  %8001 = vst [vmem:[#allocation5_spill] sm:$0xff] %v6426_v45  ;;  %8003 = vst [vmem:[#allocation7_spill] sm:$0xff] %v6438_v49  ;;  %v6446_v1 = vld [vmem:[%s7691_s3 + $0x20] ss:$16 sps:$4 sm:$0xff]   ;;  %v6452_v57 = vld [vmem:[%s7691_s3 + $0x28] ss:$16 sps:$4 sm:$0xff]  }
 0x283   :  { %4958 = vtanh.f32 %v6307_v24  ;;  %1863 = vmatprep.subr.bf16.mxu0 %v6326_v46  ;;  %1904 = vmatprep.subr.bf16.mxu1 %v6332_v48  ;;  %8004 = vst [vmem:[#allocation8_spill] sm:$0xff] %v6446_v1  ;;  %8005 = vst [vmem:[#allocation9_spill] sm:$0xff] %v6452_v57 }
 0x286   :  { %1864 = vmatpush1.bf16.msra.mxu0 %v6338_v53  ;;  %1905 = vmatpush1.bf16.msra.mxu1 %v6344_v54 }
 0x287   :  { %1865 = vmatprep.subr.bf16.mxu0 %v6350_v6  ;;  %1906 = vmatprep.subr.bf16.mxu1 %v6356_v56 }
 0x28a   :  { %1866 = vmatpush1.bf16.msra.mxu0 %v6362_v58  ;;  %1907 = vmatpush1.bf16.msra.mxu1 %v5969_v59  ;;  %v6377_v59 = vld [vmem:[%s7692_s4 + $0xc8] ss:$16 sps:$4 sm:$0xff]  }
 0x28b   :  { %1867 = vmatprep.subr.bf16.mxu0 %v5974_v60  ;;  %1908 = vmatprep.subr.bf16.mxu1 %v5980_v61 }
 0x28c   :  { %v4957_v9 = vpop.eup %4956 }
 0x28d   :  { %v4959_v12 = vpop.eup %4958  ;;  %v1664_v35 = vmul.f32 %v4957_v9, %v1648_v16  ;;  %v6458_v16 = vld [vmem:[%s7691_s3 + $0x44] ss:$16 sps:$4 sm:$0xff]   ;;  %v6464_v9 = vld [vmem:[%s7691_s3 + $0x4c] ss:$16 sps:$4 sm:$0xff]  }
 0x28e   :  { %v1665_v15 = vmul.f32 %v4959_v12, %v1649_v55  ;;  %1868 = vmatpush1.bf16.msra.mxu0 %v6371_v36  ;;  %1909 = vmatpush1.bf16.msra.mxu1 %v6377_v59  ;;  %8006 = vst [vmem:[#allocation10_spill] sm:$0xff] %v6458_v16  ;;  %8007 = vst [vmem:[#allocation11_spill] sm:$0xff] %v6464_v9  ;;  %v6470_v55 = vld [vmem:[%s7691_s3 + $0x40] ss:$16 sps:$4 sm:$0xff]   ;;  %v6476_v12 = vld [vmem:[%s7691_s3 + $0x48] ss:$16 sps:$4 sm:$0xff]  }
 0x28f   :  { %v1676_v60 = vrot.slane %v1664_v35, 6  ;;  %v1844_v61 = vpack.c.bf16 %v1664_v35, %v1664_v35  ;;  %1869 = vmatprep.subr.bf16.mxu0 %v6383_v22  ;;  %1910 = vmatprep.subr.bf16.mxu1 %v6389_v0  ;;  %8008 = vst [vmem:[#allocation12_spill] sm:$0xff] %v6470_v55  ;;  %8009 = vst [vmem:[#allocation13_spill] sm:$0xff] %v6476_v12  ;;  %v6482_v35 = vld [vmem:[%s7691_s3 + $0x64] ss:$16 sps:$4 sm:$0xff]  }
 0x290   :  { %v1677_v5 = vrot.slane %v1665_v15, 6  ;;  %v1845_v3 = vpack.c.bf16 %v1665_v15, %v1665_v15  ;;  %8010 = vst [vmem:[#allocation14_spill] sm:$0xff] %v6482_v35  ;;  %v6488_v15 = vld [vmem:[%s7691_s3 + $0x6c] ss:$16 sps:$4 sm:$0xff]  }
 0x291   :  { %1680 = vst [vmem:[#allocation2 + $0xe] sm:$0x1] %v1676_v60  ;;  %v1848_v38 = vunpack.c.l.b16 %v1844_v61  ;;  %8011 = vst [vmem:[#allocation15_spill] sm:$0xff] %v6488_v15  ;;  %v6494_v60 = vld [vmem:[%s7691_s3 + $0x60] ss:$16 sps:$4 sm:$0xff]  }
 0x292   :  { %1681 = vst [vmem:[#allocation2 + $0x1e] sm:$0x1] %v1677_v5  ;;  %v1849_v39 = vunpack.c.l.b16 %v1845_v3  ;;  %1870 = vmatpush1.bf16.msra.mxu0 %v6395_v40  ;;  %1911 = vmatpush1.bf16.msra.mxu1 %v6401_v41  ;;  %8012 = vst [vmem:[#allocation16_spill] sm:$0xff] %v6494_v60  ;;  %v6500_v61 = vld [vmem:[%s7691_s3 + $0x68] ss:$16 sps:$4 sm:$0xff]  }
 0x293   :  { %v1850_v63 = vrot.slane %v1848_v38, 6  ;;  %2034 = vmatprep.subr.bf16.mxu0 %v6407_v33  ;;  %2075 = vmatprep.subr.bf16.mxu1 %v6413_v17  ;;  %8013 = vst [vmem:[#allocation17_spill] sm:$0xff] %v6500_v61  ;;  %v6506_v5 = vld [vmem:[%s7691_s3 + $0x84] ss:$16 sps:$4 sm:$0xff]   ;;  %v6512_v3 = vld [vmem:[%s7691_s3 + $0x8c] ss:$16 sps:$4 sm:$0xff]  }
 0x294   :  { %v1851_v2 = vrot.slane %v1849_v39, 5  ;;  %8014 = vst [vmem:[#allocation18_spill] sm:$0xff] %v6506_v5  ;;  %8015 = vst [vmem:[#allocation19_spill] sm:$0xff] %v6512_v3  ;;  %v6518_v38 = vld [vmem:[%s7691_s3 + $0x80] ss:$16 sps:$4 sm:$0xff]  }
 0x295   :  { %8016 = vst [vmem:[#allocation20_spill] sm:$0xff] %v6518_v38  ;;  %v6524_v39 = vld [vmem:[%s7691_s3 + $0x88] ss:$16 sps:$4 sm:$0xff]  }
 0x296   :  { %v1852_v21 = vsel %vm1351_vm0, %v1851_v2, %v1850_v63  ;;  %8017 = vst [vmem:[#allocation21_spill] sm:$0xff] %v6524_v39  ;;  %v6530_v63 = vld [vmem:[%s7691_s3 + $0xa4] ss:$16 sps:$4 sm:$0xff]   ;;  %v6536_v2 = vld [vmem:[%s7691_s3 + $0xac] ss:$16 sps:$4 sm:$0xff]  }
 0x297   :  { %v1853_v13 = vpack.c.b16 %v1852_v21, %v1852_v21  ;;  %8018 = vst [vmem:[#allocation22_spill] sm:$0xff] %v6530_v63  ;;  %8019 = vst [vmem:[#allocation23_spill] sm:$0xff] %v6536_v2  ;;  %v6542_v21 = vld [vmem:[%s7691_s3 + $0xa0] ss:$16 sps:$4 sm:$0xff]  }
 0x298   :  { %8020 = vst [vmem:[#allocation24_spill] sm:$0xff] %v6542_v21 }
 0x299   :  { %1888 = vmatmul.mubr.bf16.vlgmr.msra.gmra.mrb[28].mxu0 %v1853_v13  ;;  %1929 = vmatmul.mubr.bf16.vlgmr.msra.gmra.mrb[28].mxu1 %v1853_v13  ;;  %v6548_v13 = vld [vmem:[%s7691_s3 + $0xa8] ss:$16 sps:$4 sm:$0xff]  }
 0x29a   :  { %2035 = vmatpush1.bf16.msra.mxu0 %v6420_v42  ;;  %2076 = vmatpush1.bf16.msra.mxu1 %v6426_v45  ;;  %8021 = vst [vmem:[#allocation25_spill] sm:$0xff] %v6548_v13 }
 0x29b   :  { %2036 = vmatprep.subr.bf16.mxu0 %v6432_v51  ;;  %2077 = vmatprep.subr.bf16.mxu1 %v6438_v49 }
 0x29c   :  { %2066 = vmatprep.mubr.bf16.mxu0 %v7934_v62  ;;  %2107 = vmatprep.mubr.bf16.mxu1 %v7934_v62 }
 0x29e   :  { %2037 = vmatpush1.bf16.msra.mxu0 %v6446_v1  ;;  %2078 = vmatpush1.bf16.msra.mxu1 %v6452_v57 }
 0x29f   :  { %2038 = vmatprep.subr.bf16.mxu0 %v6458_v16  ;;  %2079 = vmatprep.subr.bf16.mxu1 %v6464_v9 }
 0x2a2   :  { %2039 = vmatpush1.bf16.msra.mxu0 %v6470_v55  ;;  %2080 = vmatpush1.bf16.msra.mxu1 %v6476_v12 }
 0x2a3   :  { %2040 = vmatprep.subr.bf16.mxu0 %v6482_v35  ;;  %2081 = vmatprep.subr.bf16.mxu1 %v6488_v15 }
 0x2a6   :  { %2041 = vmatpush1.bf16.msra.mxu0 %v6494_v60  ;;  %2082 = vmatpush1.bf16.msra.mxu1 %v6500_v61 }
 0x2a7   :  { %2042 = vmatprep.subr.bf16.mxu0 %v6506_v5  ;;  %2083 = vmatprep.subr.bf16.mxu1 %v6512_v3 }
 0x2aa   :  { %2043 = vmatpush1.bf16.msra.mxu0 %v6518_v38  ;;  %2084 = vmatpush1.bf16.msra.mxu1 %v6524_v39 }
 0x2ab   :  { %2044 = vmatprep.subr.bf16.mxu0 %v6530_v63  ;;  %2085 = vmatprep.subr.bf16.mxu1 %v6536_v2  ;;  %v6554_v63 = vld [vmem:[%s7691_s3 + $0xc4] ss:$16 sps:$4 sm:$0xff]   ;;  %v6560_v2 = vld [vmem:[%s7691_s3 + $0xcc] ss:$16 sps:$4 sm:$0xff]  }
 0x2ac   :  { %8022 = vst [vmem:[#allocation26_spill] sm:$0xff] %v6554_v63  ;;  %8023 = vst [vmem:[#allocation27_spill] sm:$0xff] %v6560_v2 }
 0x2ae   :  { %2045 = vmatpush1.bf16.msra.mxu0 %v6542_v21  ;;  %2086 = vmatpush1.bf16.msra.mxu1 %v6548_v13  ;;  %v6566_v21 = vld [vmem:[%s7691_s3 + $0xc0] ss:$16 sps:$4 sm:$0xff]   ;;  %v6572_v13 = vld [vmem:[%s7691_s3 + $0xc8] ss:$16 sps:$4 sm:$0xff]  }
 0x2af   :  { %2046 = vmatprep.subr.bf16.mxu0 %v6554_v63  ;;  %2087 = vmatprep.subr.bf16.mxu1 %v6560_v2  ;;  %8024 = vst [vmem:[#allocation28_spill] sm:$0xff] %v6566_v21  ;;  %8025 = vst [vmem:[#allocation29_spill] sm:$0xff] %v6572_v13  ;;  %v6578_v63 = vld [vmem:[%s7691_s3 + $0xe4] ss:$16 sps:$4 sm:$0xff]   ;;  %v6584_v2 = vld [vmem:[%s7691_s3 + $0xec] ss:$16 sps:$4 sm:$0xff]  }
 0x2b0   :  { %8026 = vst [vmem:[#allocation30_spill] sm:$0xff] %v6578_v63  ;;  %8027 = vst [vmem:[#allocation31_spill] sm:$0xff] %v6584_v2 }
 0x2b2   :  { %2047 = vmatpush1.bf16.msra.mxu0 %v6566_v21  ;;  %2088 = vmatpush1.bf16.msra.mxu1 %v6572_v13  ;;  %v6590_v21 = vld [vmem:[%s7691_s3 + $0xe0] ss:$16 sps:$4 sm:$0xff]   ;;  %v6596_v13 = vld [vmem:[%s7691_s3 + $0xe8] ss:$16 sps:$4 sm:$0xff]  }
 0x2b3   :  { %2048 = vmatprep.subr.bf16.mxu0 %v6578_v63  ;;  %2089 = vmatprep.subr.bf16.mxu1 %v6584_v2  ;;  %8028 = vst [vmem:[#allocation32_spill] sm:$0xff] %v6590_v21  ;;  %8029 = vst [vmem:[#allocation33_spill] sm:$0xff] %v6596_v13  ;;  %v6602_v63 = vld [vmem:[%s7692_s4 + $0x4] ss:$16 sps:$4 sm:$0xff]   ;;  %v6608_v2 = vld [vmem:[%s7692_s4 + $0xc] ss:$16 sps:$4 sm:$0xff]  }
 0x2b4   :  { %8030 = vst [vmem:[#allocation34_spill] sm:$0xff] %v6602_v63  ;;  %8031 = vst [vmem:[#allocation35_spill] sm:$0xff] %v6608_v2 }
 0x2b6   :  { %2049 = vmatpush1.bf16.msra.mxu0 %v6590_v21  ;;  %2090 = vmatpush1.bf16.msra.mxu1 %v6596_v13 }
 0x2b7   :  { %2197 = vmatprep.subr.bf16.mxu0 %v6602_v63  ;;  %2238 = vmatprep.subr.bf16.mxu1 %v6608_v2 }
 0x348   :  { %v1726_v21 = vpop.f32.mrb[24].mxu0  ;;  %v1767_v39 = vpop.f32.mrb[24].mxu1 }
 0x349   :  { %v1778_v38 = vrot.slane %v1726_v21, 6  ;;  %v1782_v3 = vrot.slane %v1726_v21, 7  ;;  %v1728_v5 = vpop.f32.mrb[25].mxu0  ;;  %v1769_v13 = vpop.f32.mrb[25].mxu1  ;;  %v1780_v55 = vrot.slane %v1767_v39, 6  ;;  %v1784_v57 = vrot.slane %v1767_v39, 7 }
 0x34a   :  { %v1779_v61 = vrot.slane %v1728_v5, 6  ;;  %v1783_v60 = vrot.slane %v1728_v5, 7  ;;  %v1730_v15 = vpop.f32.mrb[26].mxu0  ;;  %v1771_v35 = vpop.f32.mrb[26].mxu1  ;;  %v1781_v5 = vrot.slane %v1769_v13, 6 }
 0x34b   :  { %v1794_v12 = vadd.f32 %v1778_v38, %v7988_v25  ;;  %v1798_v63 = vadd.f32 %v1782_v3, %v6102_v10  ;;  %v1731_v9 = vpop.f32.mrb[27].mxu0  ;;  %v1772_v16 = vpop.f32.mrb[27].mxu1  ;;  %v1796_v15 = vadd.f32 %v1780_v55, %v7990_v47  ;;  %v1800_v35 = vadd.f32 %v1784_v57, %v6113_v30 }
 0x34c   :  { %v1795_v2 = vadd.f32 %v1779_v61, %v7989_v7  ;;  %v1799_v1 = vadd.f32 %v1783_v60, %v6106_v4  ;;  %v1785_v3 = vrot.slane %v1769_v13, 7  ;;  %v1797_v16 = vadd.f32 %v1781_v5, %v7991_v50 }
 0x34d   :  { %v1802_v49 = vmul.f32 0.5, %v1794_v12  ;;  %v1803_v21 = vmul.f32 0.5, %v1798_v63 }
 0x34e   :  { %v1810_v51 = vmul.f32 0.5, %v1795_v2  ;;  %v1811_v45 = vmul.f32 0.5, %v1799_v1  ;;  %v1801_v9 = vadd.f32 %v1785_v3, %v7992_v52  ;;  %v1820_v12 = vmul.f32 0.5, %v1797_v16 }
 0x34f   :  { %4960 = vtanh.f32 %v1802_v49  ;;  %v1831_v3 = vrot.slane %v6256_v34, 7 }
 0x350   :  { %4962 = vtanh.f32 %v1803_v21  ;;  %v1821_v61 = vmul.f32 0.5, %v1801_v9 }
 0x351   :  { %4964 = vtanh.f32 %v1810_v51 }
 0x352   :  { %4966 = vtanh.f32 %v1811_v45 }
 0x353   :  { %4968 = vtanh.f32 %v1796_v15  ;;  %v1830_v15 = vrot.slane %v6254_v29, 7 }
 0x354   :  { %4970 = vtanh.f32 %v1800_v35 }
 0x355   :  { %4972 = vtanh.f32 %v1820_v12 }
 0x356   :  { %4974 = vtanh.f32 %v1821_v61 }
 0x359   :  { %v4961_v60 = vpop.eup %4960 }
 0x35a   :  { %v4963_v1 = vpop.eup %4962  ;;  %v1806_v49 = vadd.f32 1.0, %v4961_v60 }
 0x35b   :  { %v4965_v38 = vpop.eup %4964  ;;  %v1807_v55 = vadd.f32 1.0, %v4963_v1 }
 0x35c   :  { %v4967_v39 = vpop.eup %4966  ;;  %v1808_v63 = vmul.f32 0.5, %v1806_v49  ;;  %v1814_v57 = vadd.f32 1.0, %v4965_v38 }
 0x35d   :  { %v4969_v51 = vpop.eup %4968  ;;  %v1809_v2 = vmul.f32 0.5, %v1807_v55  ;;  %v1815_v45 = vadd.f32 1.0, %v4967_v39 }
 0x35e   :  { %v4971_v13 = vpop.eup %4970  ;;  %v1816_v21 = vmul.f32 0.5, %v1814_v57  ;;  %v1836_v35 = vmul.f32 %v4969_v51, %v1808_v63 }
 0x35f   :  { %v1817_v5 = vmul.f32 0.5, %v1815_v45  ;;  %v1837_v16 = vmul.f32 %v4971_v13, %v1809_v2  ;;  %v4973_v12 = vpop.eup %4972 }
 0x360   :  { %v1834_v9 = vmul.f32 %v1830_v15, %v1816_v21  ;;  %v4975_v61 = vpop.eup %4974  ;;  %v1824_v38 = vadd.f32 1.0, %v4973_v12 }
 0x361   :  { %v1835_v60 = vmul.f32 %v1831_v3, %v1817_v5  ;;  %v1825_v55 = vadd.f32 1.0, %v4975_v61 }
 0x362   :  { %v6621_v1 = vadd.f32 %v1836_v35, %v1834_v9  ;;  %v1826_v63 = vmul.f32 0.5, %v1824_v38 }
 0x363   :  { %v6623_v49 = vadd.f32 %v1837_v16, %v1835_v60  ;;  %v1827_v21 = vmul.f32 0.5, %v1825_v55 }
 0x364   :  { %8032 = vst [vmem:[#allocation36_spill] sm:$0xff] %v6621_v1  ;;  %4976 = vtanh.f32 %v6621_v1 }
 0x365   :  { %8033 = vst [vmem:[#allocation37_spill] sm:$0xff] %v6623_v49  ;;  %4978 = vtanh.f32 %v6623_v49 }
 0x36c   :  { %v1889_v29 = vpop.f32.mrb[28].mxu0  ;;  %v1930_v39 = vpop.f32.mrb[28].mxu1 }
 0x36d   :  { %v1941_v57 = vrot.slane %v1889_v29, 3  ;;  %v1945_v34 = vrot.slane %v1889_v29, 4  ;;  %v1943_v51 = vrot.slane %v1930_v39, 3  ;;  %v1891_v2 = vpop.f32.mrb[29].mxu0  ;;  %v1932_v45 = vpop.f32.mrb[29].mxu1  ;;  %v1947_v61 = vrot.slane %v1930_v39, 4 }
 0x36e   :  { %v4977_v13 = vpop.eup %4976  ;;  %v1942_v15 = vrot.slane %v1891_v2, 3  ;;  %v1946_v35 = vrot.slane %v1891_v2, 4  ;;  %v1893_v5 = vpop.f32.mrb[30].mxu0 }
 0x36f   :  { %v1934_v3 = vpop.f32.mrb[30].mxu1  ;;  %v4979_v16 = vpop.eup %4978  ;;  %v1842_v9 = vmul.f32 %v4977_v13, %v1826_v63  ;;  %v1957_v60 = vadd.f32 %v1941_v57, %v6135_v27  ;;  %v1961_v12 = vadd.f32 %v1945_v34, %v6141_v31  ;;  %v1959_v29 = vadd.f32 %v1943_v51, %v6147_v32 }
 0x370   :  { %v1894_v49 = vpop.f32.mrb[31].mxu0  ;;  %v1935_v38 = vpop.f32.mrb[31].mxu1  ;;  %v1843_v1 = vmul.f32 %v4979_v16, %v1827_v21  ;;  %v1958_v52 = vadd.f32 %v1942_v15, %v6138_v28  ;;  %v1962_v55 = vadd.f32 %v1946_v35, %v6144_v26  ;;  %v1963_v34 = vadd.f32 %v1947_v61, %v6156_v11  ;;  %v6657_v61 = vld [vmem:[%s7692_s4 + $0x2c] ss:$16 sps:$4 sm:$0xff]  }
 0x371   :  { %v2009_v50 = vrot.slane %v1842_v9, 2  ;;  %v2023_v2 = vpack.c.bf16 %v1842_v9, %v1842_v9  ;;  %v1965_v5 = vmul.f32 0.5, %v1957_v60  ;;  %v1966_v3 = vmul.f32 0.5, %v1961_v12  ;;  %v6651_v12 = vld [vmem:[%s7692_s4 + $0x24] ss:$16 sps:$4 sm:$0xff]  }
 0x372   :  { %v2010_v30 = vrot.slane %v1843_v1, 2  ;;  %v2024_v63 = vpack.c.bf16 %v1843_v1, %v1843_v1  ;;  %v1973_v13 = vmul.f32 0.5, %v1958_v52  ;;  %v1974_v39 = vmul.f32 0.5, %v1962_v55 }
 0x373   :  { %2013 = vst [vmem:[#allocation2 + $0x2] sm:$0x1] %v2009_v50  ;;  %v2027_v57 = vunpack.c.l.b16 %v2023_v2  ;;  %4980 = vtanh.f32 %v1965_v5  ;;  %v1944_v51 = vrot.slane %v1932_v45, 3  ;;  %v1948_v15 = vrot.slane %v1932_v45, 4  ;;  %v6645_v45 = vld [vmem:[%s7692_s4 + $0x8] ss:$16 sps:$4 sm:$0xff]  }
 0x374   :  { %2014 = vst [vmem:[#allocation2 + $0x12] sm:$0x1] %v2010_v30  ;;  %v2028_v49 = vunpack.c.l.b16 %v2024_v63  ;;  %4982 = vtanh.f32 %v1966_v3  ;;  %v6639_v30 = vld [vmem:[%s7692_s4] ss:$16 sps:$4 sm:$0xff]  }
 0x375   :  { %4984 = vtanh.f32 %v1959_v29  ;;  %v2029_v21 = vrot.slane %v2027_v57, 2  ;;  %v1960_v50 = vadd.f32 %v1944_v51, %v6161_v37  ;;  %v1964_v16 = vadd.f32 %v1948_v15, %v6164_v18  ;;  %v6671_v57 = vld [vmem:[%s7692_s4 + $0x28] ss:$16 sps:$4 sm:$0xff]   ;;  %v6677_v51 = vld [vmem:[%s7692_s4 + $0x44] ss:$16 sps:$4 sm:$0xff]  }
 0x376   :  { %4986 = vtanh.f32 %v1973_v13  ;;  %v2030_v35 = vrot.slane %v2028_v49, 1  ;;  %v6665_v13 = vld [vmem:[%s7692_s4 + $0x20] ss:$16 sps:$4 sm:$0xff]  }
 0x377   :  { %4988 = vtanh.f32 %v1974_v39  ;;  %v1983_v60 = vmul.f32 0.5, %v1960_v50  ;;  %v1984_v55 = vmul.f32 0.5, %v1964_v16 }
 0x378   :  { %4990 = vtanh.f32 %v1963_v34  ;;  %v2031_v1 = vsel %vm1351_vm0, %v2030_v35, %v2029_v21  ;;  %v6683_v21 = vld [vmem:[%s7692_s4 + $0x4c] ss:$16 sps:$4 sm:$0xff]  }
 0x379   :  { %v2032_v52 = vpack.c.b16 %v2031_v1, %v2031_v1  ;;  %4992 = vtanh.f32 %v1983_v60  ;;  %v1994_v60 = vrot.slane %v6307_v24, 1 }
 0x37a   :  { %4994 = vtanh.f32 %v1984_v55 }
 0x37b   :  { %2067 = vmatmul.mubr.bf16.vlgmr.msra.gmra.mrb[32].mxu0 %v2032_v52  ;;  %2108 = vmatmul.mubr.bf16.vlgmr.msra.gmra.mrb[32].mxu1 %v2032_v52  ;;  %v1993_v52 = vrot.slane %v6305_v23, 1 }
 0x37c   :  { %2198 = vmatpush1.bf16.msra.mxu0 %v6639_v30  ;;  %2239 = vmatpush1.bf16.msra.mxu1 %v6645_v45 }
 0x37d   :  { %v4981_v9 = vpop.eup %4980  ;;  %2199 = vmatprep.subr.bf16.mxu0 %v6651_v12  ;;  %2240 = vmatprep.subr.bf16.mxu1 %v6657_v61 }
 0x37e   :  { %v4983_v38 = vpop.eup %4982  ;;  %v1969_v29 = vadd.f32 1.0, %v4981_v9  ;;  %2229 = vmatprep.mubr.bf16.mxu0 %v7934_v62  ;;  %2270 = vmatprep.mubr.bf16.mxu1 %v7934_v62 }
 0x37f   :  { %v4985_v2 = vpop.eup %4984  ;;  %v1970_v5 = vadd.f32 1.0, %v4983_v38 }
 0x380   :  { %v4987_v3 = vpop.eup %4986  ;;  %v1971_v63 = vmul.f32 0.5, %v1969_v29  ;;  %2200 = vmatpush1.bf16.msra.mxu0 %v6665_v13  ;;  %2241 = vmatpush1.bf16.msra.mxu1 %v6671_v57 }
 0x381   :  { %v4989_v39 = vpop.eup %4988  ;;  %v1972_v49 = vmul.f32 0.5, %v1970_v5  ;;  %v1977_v34 = vadd.f32 1.0, %v4987_v3  ;;  %2201 = vmatprep.subr.bf16.mxu0 %v6677_v51  ;;  %2242 = vmatprep.subr.bf16.mxu1 %v6683_v21 }
 0x382   :  { %v4991_v15 = vpop.eup %4990  ;;  %v1978_v35 = vadd.f32 1.0, %v4989_v39  ;;  %v1999_v1 = vmul.f32 %v4985_v2, %v1971_v63  ;;  %v6710_v63 = vld [vmem:[%s7692_s4 + $0xa8] ss:$16 sps:$4 sm:$0xff]   ;;  %v6716_v39 = vld [vmem:[%s7692_s4 + $0xc4] ss:$16 sps:$4 sm:$0xff]  }
 0x383   :  { %v1979_v50 = vmul.f32 0.5, %v1977_v34  ;;  %v2000_v16 = vmul.f32 %v4991_v15, %v1972_v49  ;;  %v4993_v23 = vpop.eup %4992  ;;  %v6722_v49 = vld [vmem:[%s7692_s4 + $0xcc] ss:$16 sps:$4 sm:$0xff]  }
 0x384   :  { %v1980_v9 = vmul.f32 0.5, %v1978_v35  ;;  %2202 = vmatpush1.bf16.msra.mxu0 %v6284_v43  ;;  %2243 = vmatpush1.bf16.msra.mxu1 %v6290_v44  ;;  %v4995_v24 = vpop.eup %4994  ;;  %v1987_v2 = vadd.f32 1.0, %v4993_v23 }
 0x385   :  { %v1997_v38 = vmul.f32 %v1993_v52, %v1979_v50  ;;  %2203 = vmatprep.subr.bf16.mxu0 %v6296_v19  ;;  %2244 = vmatprep.subr.bf16.mxu1 %v6302_v20  ;;  %v1988_v3 = vadd.f32 1.0, %v4995_v24 }
 0x386   :  { %v1998_v29 = vmul.f32 %v1994_v60, %v1980_v9  ;;  %v1989_v34 = vmul.f32 0.5, %v1987_v2 }
 0x387   :  { %v6692_v5 = vadd.f32 %v1999_v1, %v1997_v38  ;;  %v1990_v35 = vmul.f32 0.5, %v1988_v3 }
 0x388   :  { %v6694_v55 = vadd.f32 %v2000_v16, %v1998_v29  ;;  %2204 = vmatpush1.bf16.msra.mxu0 %v6313_v8  ;;  %2245 = vmatpush1.bf16.msra.mxu1 %v6319_v14 }
 0x389   :  { %4996 = vtanh.f32 %v6692_v5  ;;  %2205 = vmatprep.subr.bf16.mxu0 %v6326_v46  ;;  %2246 = vmatprep.subr.bf16.mxu1 %v6332_v48 }
 0x38a   :  { %4998 = vtanh.f32 %v6694_v55 }
 0x38c   :  { %2206 = vmatpush1.bf16.msra.mxu0 %v6338_v53  ;;  %2247 = vmatpush1.bf16.msra.mxu1 %v6344_v54 }
 0x38d   :  { %2207 = vmatprep.subr.bf16.mxu0 %v6350_v6  ;;  %2248 = vmatprep.subr.bf16.mxu1 %v6356_v56 }
 0x390   :  { %2208 = vmatpush1.bf16.msra.mxu0 %v6362_v58  ;;  %2249 = vmatpush1.bf16.msra.mxu1 %v6710_v63 }
 0x391   :  { %2209 = vmatprep.subr.bf16.mxu0 %v6716_v39  ;;  %2250 = vmatprep.subr.bf16.mxu1 %v6722_v49 }
 0x393   :  { %v4997_v15 = vpop.eup %4996 }
 0x394   :  { %v4999_v1 = vpop.eup %4998  ;;  %v2005_v50 = vmul.f32 %v4997_v15, %v1989_v34  ;;  %2210 = vmatpush1.bf16.msra.mxu0 %v6371_v36  ;;  %2251 = vmatpush1.bf16.msra.mxu1 %v6377_v59  ;;  %v8034_v15 = vld [vmem:[#allocation5_spill] sm:$0xff] }
 0x395   :  { %v2006_v52 = vmul.f32 %v4999_v1, %v1990_v35  ;;  %2211 = vmatprep.subr.bf16.mxu0 %v6383_v22  ;;  %2252 = vmatprep.subr.bf16.mxu1 %v6389_v0  ;;  %v8035_v35 = vld [vmem:[#allocation6_spill] sm:$0xff]  ;;  %v8036_v1 = vld [vmem:[#allocation7_spill] sm:$0xff] }
 0x396   :  { %v2017_v16 = vrot.slane %v2005_v50, 5  ;;  %v2186_v9 = vpack.c.bf16 %v2005_v50, %v2005_v50  ;;  %v8037_v50 = vld [vmem:[#allocation8_spill] sm:$0xff] }
 0x397   :  { %v2018_v60 = vrot.slane %v2006_v52, 5  ;;  %v2187_v38 = vpack.c.bf16 %v2006_v52, %v2006_v52  ;;  %v8038_v52 = vld [vmem:[#allocation9_spill] sm:$0xff] }
 0x398   :  { %2021 = vst [vmem:[#allocation2 + $0xd] sm:$0x1] %v2017_v16  ;;  %v2190_v29 = vunpack.c.l.b16 %v2186_v9  ;;  %2212 = vmatpush1.bf16.msra.mxu0 %v6395_v40  ;;  %2253 = vmatpush1.bf16.msra.mxu1 %v6401_v41  ;;  %v8039_v16 = vld [vmem:[#allocation10_spill] sm:$0xff]  ;;  %v8040_v9 = vld [vmem:[#allocation11_spill] sm:$0xff] }
 0x399   :  { %2022 = vst [vmem:[#allocation2 + $0x1d] sm:$0x1] %v2018_v60  ;;  %v2191_v23 = vunpack.c.l.b16 %v2187_v38  ;;  %2376 = vmatprep.subr.bf16.mxu0 %v6407_v33  ;;  %2417 = vmatprep.subr.bf16.mxu1 %v6413_v17  ;;  %v8041_v60 = vld [vmem:[#allocation12_spill] sm:$0xff]  ;;  %v8042_v38 = vld [vmem:[#allocation13_spill] sm:$0xff] }
 0x39a   :  { %v2192_v24 = vrot.slane %v2190_v29, 5  ;;  %v8043_v29 = vld [vmem:[#allocation14_spill] sm:$0xff] }
 0x39b   :  { %v2193_v2 = vrot.slane %v2191_v23, 4  ;;  %v8044_v23 = vld [vmem:[#allocation15_spill] sm:$0xff] }
 0x39d   :  { %v2194_v3 = vsel %vm1351_vm0, %v2193_v2, %v2192_v24  ;;  %v8045_v24 = vld [vmem:[#allocation16_spill] sm:$0xff]  ;;  %v8046_v2 = vld [vmem:[#allocation17_spill] sm:$0xff] }
 0x39e   :  { %v2195_v34 = vpack.c.b16 %v2194_v3, %v2194_v3  ;;  %v8047_v3 = vld [vmem:[#allocation18_spill] sm:$0xff] }
 0x3a0   :  { %2230 = vmatmul.mubr.bf16.vlgmr.msra.gmra.mrb[36].mxu0 %v2195_v34  ;;  %2271 = vmatmul.mubr.bf16.vlgmr.msra.gmra.mrb[36].mxu1 %v2195_v34  ;;  %v8048_v34 = vld [vmem:[#allocation19_spill] sm:$0xff] }
 0x3a1   :  { %2377 = vmatpush1.bf16.msra.mxu0 %v6420_v42  ;;  %2418 = vmatpush1.bf16.msra.mxu1 %v8034_v15 }
 0x3a2   :  { %2378 = vmatprep.subr.bf16.mxu0 %v8035_v35  ;;  %2419 = vmatprep.subr.bf16.mxu1 %v8036_v1 }
 0x3a3   :  { %2408 = vmatprep.mubr.bf16.mxu0 %v7934_v62  ;;  %2449 = vmatprep.mubr.bf16.mxu1 %v7934_v62 }
 0x3a5   :  { %2379 = vmatpush1.bf16.msra.mxu0 %v8037_v50  ;;  %2420 = vmatpush1.bf16.msra.mxu1 %v8038_v52  ;;  %v8049_v52 = vld [vmem:[#allocation20_spill] sm:$0xff] }
 0x3a6   :  { %2380 = vmatprep.subr.bf16.mxu0 %v8039_v16  ;;  %2421 = vmatprep.subr.bf16.mxu1 %v8040_v9  ;;  %v8050_v16 = vld [vmem:[#allocation21_spill] sm:$0xff]  ;;  %v8051_v9 = vld [vmem:[#allocation22_spill] sm:$0xff] }
 0x3a9   :  { %2381 = vmatpush1.bf16.msra.mxu0 %v8041_v60  ;;  %2422 = vmatpush1.bf16.msra.mxu1 %v8042_v38  ;;  %v8052_v60 = vld [vmem:[#allocation23_spill] sm:$0xff]  ;;  %v8053_v38 = vld [vmem:[#allocation24_spill] sm:$0xff] }
 0x3aa   :  { %2382 = vmatprep.subr.bf16.mxu0 %v8043_v29  ;;  %2423 = vmatprep.subr.bf16.mxu1 %v8044_v23  ;;  %v8054_v29 = vld [vmem:[#allocation25_spill] sm:$0xff]  ;;  %v8055_v23 = vld [vmem:[#allocation26_spill] sm:$0xff] }
 0x3ad   :  { %2383 = vmatpush1.bf16.msra.mxu0 %v8045_v24  ;;  %2424 = vmatpush1.bf16.msra.mxu1 %v8046_v2  ;;  %v8056_v24 = vld [vmem:[#allocation27_spill] sm:$0xff]  ;;  %v8057_v2 = vld [vmem:[#allocation28_spill] sm:$0xff] }
 0x3ae   :  { %2384 = vmatprep.subr.bf16.mxu0 %v8047_v3  ;;  %2425 = vmatprep.subr.bf16.mxu1 %v8048_v34  ;;  %v8058_v3 = vld [vmem:[#allocation29_spill] sm:$0xff]  ;;  %v8059_v34 = vld [vmem:[#allocation30_spill] sm:$0xff] }
 0x3b1   :  { %2385 = vmatpush1.bf16.msra.mxu0 %v8049_v52  ;;  %2426 = vmatpush1.bf16.msra.mxu1 %v8050_v16  ;;  %v8060_v52 = vld [vmem:[#allocation31_spill] sm:$0xff]  ;;  %v8061_v16 = vld [vmem:[#allocation32_spill] sm:$0xff] }
 0x3b2   :  { %2386 = vmatprep.subr.bf16.mxu0 %v8051_v9  ;;  %2427 = vmatprep.subr.bf16.mxu1 %v8052_v60  ;;  %v8062_v9 = vld [vmem:[#allocation33_spill] sm:$0xff]  ;;  %v8063_v60 = vld [vmem:[#allocation34_spill] sm:$0xff] }
 0x3b5   :  { %2387 = vmatpush1.bf16.msra.mxu0 %v8053_v38  ;;  %2428 = vmatpush1.bf16.msra.mxu1 %v8054_v29  ;;  %v8064_v38 = vld [vmem:[#allocation35_spill] sm:$0xff] }
 0x3b6   :  { %2388 = vmatprep.subr.bf16.mxu0 %v8055_v23  ;;  %2429 = vmatprep.subr.bf16.mxu1 %v8056_v24 }
 0x3b9   :  { %2389 = vmatpush1.bf16.msra.mxu0 %v8057_v2  ;;  %2430 = vmatpush1.bf16.msra.mxu1 %v8058_v3 }
 0x3ba   :  { %2390 = vmatprep.subr.bf16.mxu0 %v8059_v34  ;;  %2431 = vmatprep.subr.bf16.mxu1 %v8060_v52 }
 0x3bd   :  { %2391 = vmatpush1.bf16.msra.mxu0 %v8061_v16  ;;  %2432 = vmatpush1.bf16.msra.mxu1 %v8062_v9 }
 0x3be   :  { %2539 = vmatprep.subr.bf16.mxu0 %v8063_v60  ;;  %2580 = vmatprep.subr.bf16.mxu1 %v8064_v38 }
 0x44e   :  { %v2068_v29 = vpop.f32.mrb[32].mxu0  ;;  %v2109_v23 = vpop.f32.mrb[32].mxu1 }
 0x44f   :  { %v2120_v50 = vrot.slane %v2068_v29, 5  ;;  %v2124_v24 = vrot.slane %v2068_v29, 6  ;;  %v2070_v1 = vpop.f32.mrb[33].mxu0  ;;  %v2111_v2 = vpop.f32.mrb[33].mxu1  ;;  %v2122_v42 = vrot.slane %v2109_v23, 5  ;;  %v2126_v60 = vrot.slane %v2109_v23, 6 }
 0x450   :  { %v2121_v35 = vrot.slane %v2070_v1, 5  ;;  %v2125_v3 = vrot.slane %v2070_v1, 6  ;;  %v2072_v15 = vpop.f32.mrb[34].mxu0  ;;  %v2113_v34 = vpop.f32.mrb[34].mxu1  ;;  %v8065_v1 = vld [vmem:[#allocation51_spill] sm:$0xff] }
 0x451   :  { %v2136_v52 = vadd.f32 %v2120_v50, %v7988_v25  ;;  %v2140_v16 = vadd.f32 %v2124_v24, %v6102_v10  ;;  %v2073_v9 = vpop.f32.mrb[35].mxu0  ;;  %v2114_v17 = vpop.f32.mrb[35].mxu1  ;;  %v2138_v15 = vadd.f32 %v2122_v42, %v7990_v47  ;;  %v2142_v50 = vadd.f32 %v2126_v60, %v8065_v1 }
 0x452   :  { %v2137_v38 = vadd.f32 %v2121_v35, %v7989_v7  ;;  %v2141_v33 = vadd.f32 %v2125_v3, %v6106_v4  ;;  %v2123_v34 = vrot.slane %v2111_v2, 5  ;;  %v2127_v24 = vrot.slane %v2111_v2, 6  ;;  %v8066_v17 = vld [vmem:[#allocation52_spill] sm:$0xff]  ;;  %v8067_v9 = vld [vmem:[#allocation53_spill] sm:$0xff] }
 0x453   :  { %v2144_v41 = vmul.f32 0.5, %v2136_v52  ;;  %v2145_v29 = vmul.f32 0.5, %v2140_v16 }
 0x454   :  { %v2152_v40 = vmul.f32 0.5, %v2137_v38  ;;  %v2153_v0 = vmul.f32 0.5, %v2141_v33  ;;  %v2139_v35 = vadd.f32 %v2123_v34, %v8066_v17  ;;  %v2143_v23 = vadd.f32 %v2127_v24, %v8067_v9  ;;  %v8068_v34 = vld [vmem:[#allocation36_spill] sm:$0xff]  ;;  %v8069_v9 = vld [vmem:[#allocation37_spill] sm:$0xff] }
 0x455   :  { %5000 = vtanh.f32 %v2144_v41  ;;  %v2172_v17 = vrot.slane %v8068_v34, 7 }
 0x456   :  { %5002 = vtanh.f32 %v2145_v29  ;;  %v2162_v52 = vmul.f32 0.5, %v2139_v35  ;;  %v2163_v38 = vmul.f32 0.5, %v2143_v23  ;;  %v2173_v23 = vrot.slane %v8069_v9, 7 }
 0x457   :  { %5004 = vtanh.f32 %v2152_v40 }
 0x458   :  { %5006 = vtanh.f32 %v2153_v0 }
 0x459   :  { %5008 = vtanh.f32 %v2138_v15 }
 0x45a   :  { %5010 = vtanh.f32 %v2142_v50 }
 0x45b   :  { %5012 = vtanh.f32 %v2162_v52 }
 0x45c   :  { %5014 = vtanh.f32 %v2163_v38 }
 0x45f   :  { %v5001_v16 = vpop.eup %5000 }
 0x460   :  { %v5003_v33 = vpop.eup %5002  ;;  %v2148_v41 = vadd.f32 1.0, %v5001_v16 }
 0x461   :  { %v5005_v3 = vpop.eup %5004  ;;  %v2149_v42 = vadd.f32 1.0, %v5003_v33 }
 0x462   :  { %v5007_v29 = vpop.eup %5006  ;;  %v2150_v47 = vmul.f32 0.5, %v2148_v41  ;;  %v2156_v60 = vadd.f32 1.0, %v5005_v3 }
 0x463   :  { %v5009_v40 = vpop.eup %5008  ;;  %v2151_v2 = vmul.f32 0.5, %v2149_v42  ;;  %v2157_v0 = vadd.f32 1.0, %v5007_v29 }
 0x464   :  { %v5011_v15 = vpop.eup %5010  ;;  %v2158_v50 = vmul.f32 0.5, %v2156_v60  ;;  %v2178_v24 = vmul.f32 %v5009_v40, %v2150_v47 }
 0x465   :  { %v2159_v35 = vmul.f32 0.5, %v2157_v0  ;;  %v2179_v1 = vmul.f32 %v5011_v15, %v2151_v2  ;;  %v5013_v52 = vpop.eup %5012 }
 0x466   :  { %v2176_v16 = vmul.f32 %v2172_v17, %v2158_v50  ;;  %v5015_v38 = vpop.eup %5014  ;;  %v2166_v3 = vadd.f32 1.0, %v5013_v52 }
 0x467   :  { %v2177_v4 = vmul.f32 %v2173_v23, %v2159_v35  ;;  %v2167_v42 = vadd.f32 1.0, %v5015_v38 }
 0x468   :  { %v6778_v33 = vadd.f32 %v2178_v24, %v2176_v16  ;;  %v2168_v29 = vmul.f32 0.5, %v2166_v3 }
 0x469   :  { %v6780_v41 = vadd.f32 %v2179_v1, %v2177_v4  ;;  %v2169_v9 = vmul.f32 0.5, %v2167_v42 }
 0x46a   :  { %8070 = vst [vmem:[#allocation54_spill] sm:$0xff] %v6778_v33  ;;  %5016 = vtanh.f32 %v6778_v33 }
 0x46b   :  { %8071 = vst [vmem:[#allocation55_spill] sm:$0xff] %v6780_v41  ;;  %5018 = vtanh.f32 %v6780_v41 }
 0x473   :  { %v2231_v47 = vpop.f32.mrb[36].mxu0  ;;  %v2272_v60 = vpop.f32.mrb[36].mxu1 }
 0x474   :  { %v5017_v40 = vpop.eup %5016  ;;  %v2283_v2 = vrot.slane %v2231_v47, 4  ;;  %v2287_v17 = vrot.slane %v2231_v47, 5  ;;  %v2285_v0 = vrot.slane %v2272_v60, 4  ;;  %v2233_v15 = vpop.f32.mrb[37].mxu0  ;;  %v2289_v3 = vrot.slane %v2272_v60, 5 }
 0x475   :  { %v2274_v50 = vpop.f32.mrb[37].mxu1  ;;  %v5019_v4 = vpop.eup %5018  ;;  %v2184_v1 = vmul.f32 %v5017_v40, %v2168_v29  ;;  %v2284_v34 = vrot.slane %v2233_v15, 4  ;;  %v2288_v24 = vrot.slane %v2233_v15, 5 }
 0x476   :  { %v2235_v35 = vpop.f32.mrb[38].mxu0  ;;  %v2276_v23 = vpop.f32.mrb[38].mxu1  ;;  %v2185_v16 = vmul.f32 %v5019_v4, %v2169_v9  ;;  %v2299_v52 = vadd.f32 %v2283_v2, %v6135_v27  ;;  %v2303_v38 = vadd.f32 %v2287_v17, %v6141_v31  ;;  %v2301_v47 = vadd.f32 %v2285_v0, %v6147_v32 }
 0x477   :  { %v2236_v41 = vpop.f32.mrb[39].mxu0  ;;  %v2277_v33 = vpop.f32.mrb[39].mxu1  ;;  %v2351_v42 = vrot.slane %v2184_v1, 3  ;;  %v2365_v7 = vpack.c.bf16 %v2184_v1, %v2184_v1  ;;  %v2300_v10 = vadd.f32 %v2284_v34, %v6138_v28  ;;  %v2304_v9 = vadd.f32 %v2288_v24, %v6144_v26 }
 0x478   :  { %v2352_v25 = vrot.slane %v2185_v16, 3  ;;  %v2366_v29 = vpack.c.bf16 %v2185_v16, %v2185_v16  ;;  %v2307_v40 = vmul.f32 0.5, %v2299_v52  ;;  %v2308_v15 = vmul.f32 0.5, %v2303_v38 }
 0x479   :  { %2355 = vst [vmem:[#allocation2 + $0x3] sm:$0x1] %v2351_v42  ;;  %v2369_v35 = vunpack.c.l.b16 %v2365_v7  ;;  %v2315_v2 = vmul.f32 0.5, %v2300_v10  ;;  %v2305_v33 = vadd.f32 %v2289_v3, %v6156_v11  ;;  %v2316_v41 = vmul.f32 0.5, %v2304_v9 }
 0x47a   :  { %2356 = vst [vmem:[#allocation2 + $0x13] sm:$0x1] %v2352_v25  ;;  %v2370_v17 = vunpack.c.l.b16 %v2366_v29  ;;  %5020 = vtanh.f32 %v2307_v40  ;;  %v2286_v0 = vrot.slane %v2274_v50, 4  ;;  %v2290_v1 = vrot.slane %v2274_v50, 5 }
 0x47b   :  { %5022 = vtanh.f32 %v2308_v15  ;;  %v2371_v60 = vrot.slane %v2369_v35, 3 }
 0x47c   :  { %5024 = vtanh.f32 %v2301_v47  ;;  %v2372_v4 = vrot.slane %v2370_v17, 2  ;;  %v2302_v10 = vadd.f32 %v2286_v0, %v6161_v37  ;;  %v2306_v25 = vadd.f32 %v2290_v1, %v6164_v18 }
 0x47d   :  { %5026 = vtanh.f32 %v2315_v2  ;;  %v2336_v0 = vrot.slane %v6694_v55, 1 }
 0x47e   :  { %5028 = vtanh.f32 %v2316_v41  ;;  %v2373_v34 = vsel %vm1351_vm0, %v2372_v4, %v2371_v60  ;;  %v2325_v24 = vmul.f32 0.5, %v2302_v10  ;;  %v2326_v52 = vmul.f32 0.5, %v2306_v25  ;;  %v8073_v10 = vld [vmem:[#allocation39_spill] sm:$0xff]  ;;  %v8074_v25 = vld [vmem:[#allocation40_spill] sm:$0xff] }
 0x47f   :  { %5030 = vtanh.f32 %v2305_v33  ;;  %v2374_v7 = vpack.c.b16 %v2373_v34, %v2373_v34  ;;  %v2335_v33 = vrot.slane %v6692_v5, 1 }
 0x480   :  { %5032 = vtanh.f32 %v2325_v24 }
 0x481   :  { %2409 = vmatmul.mubr.bf16.vlgmr.msra.gmra.mrb[40].mxu0 %v2374_v7  ;;  %2450 = vmatmul.mubr.bf16.vlgmr.msra.gmra.mrb[40].mxu1 %v2374_v7  ;;  %5034 = vtanh.f32 %v2326_v52 }
 0x482   :  { %2540 = vmatpush1.bf16.msra.mxu0 %v6639_v30  ;;  %2581 = vmatpush1.bf16.msra.mxu1 %v6645_v45 }
 0x483   :  { %2541 = vmatprep.subr.bf16.mxu0 %v6651_v12  ;;  %2582 = vmatprep.subr.bf16.mxu1 %v6657_v61 }
 0x484   :  { %v5021_v50 = vpop.eup %5020  ;;  %2571 = vmatprep.mubr.bf16.mxu0 %v7934_v62  ;;  %2612 = vmatprep.mubr.bf16.mxu1 %v7934_v62 }
 0x485   :  { %v5023_v23 = vpop.eup %5022  ;;  %v2311_v16 = vadd.f32 1.0, %v5021_v50 }
 0x486   :  { %v5025_v38 = vpop.eup %5024  ;;  %v2312_v3 = vadd.f32 1.0, %v5023_v23  ;;  %2542 = vmatpush1.bf16.msra.mxu0 %v6665_v13  ;;  %2583 = vmatpush1.bf16.msra.mxu1 %v6671_v57 }
 0x487   :  { %v5027_v42 = vpop.eup %5026  ;;  %v2313_v47 = vmul.f32 0.5, %v2311_v16  ;;  %2543 = vmatprep.subr.bf16.mxu0 %v6677_v51  ;;  %2584 = vmatprep.subr.bf16.mxu1 %v6683_v21 }
 0x488   :  { %v5029_v29 = vpop.eup %5028  ;;  %v2314_v40 = vmul.f32 0.5, %v2312_v3  ;;  %v2319_v15 = vadd.f32 1.0, %v5027_v42  ;;  %v8078_v3 = vld [vmem:[#allocation5_spill] sm:$0xff]  ;;  %v8079_v42 = vld [vmem:[#allocation6_spill] sm:$0xff] }
 0x489   :  { %v5031_v35 = vpop.eup %5030  ;;  %v2320_v9 = vadd.f32 1.0, %v5029_v29  ;;  %v2341_v2 = vmul.f32 %v5025_v38, %v2313_v47  ;;  %v8077_v38 = vld [vmem:[#allocation4_spill] sm:$0xff]  ;;  %v8080_v47 = vld [vmem:[#allocation7_spill] sm:$0xff] }
 0x48a   :  { %v2321_v17 = vmul.f32 0.5, %v2319_v15  ;;  %v2342_v41 = vmul.f32 %v5031_v35, %v2314_v40  ;;  %2544 = vmatpush1.bf16.msra.mxu0 %v6284_v43  ;;  %2585 = vmatpush1.bf16.msra.mxu1 %v6290_v44  ;;  %v5033_v43 = vpop.eup %5032  ;;  %v8081_v29 = vld [vmem:[#allocation8_spill] sm:$0xff]  ;;  %v8082_v40 = vld [vmem:[#allocation9_spill] sm:$0xff]  ;;  %v8083_v15 = vld [vmem:[#allocation10_spill] sm:$0xff] }
 0x48b   :  { %v2322_v60 = vmul.f32 0.5, %v2320_v9  ;;  %2545 = vmatprep.subr.bf16.mxu0 %v6296_v19  ;;  %2586 = vmatprep.subr.bf16.mxu1 %v6302_v20  ;;  %v5035_v44 = vpop.eup %5034  ;;  %v2329_v19 = vadd.f32 1.0, %v5033_v43  ;;  %v8084_v35 = vld [vmem:[#allocation11_spill] sm:$0xff]  ;;  %v8085_v9 = vld [vmem:[#allocation12_spill] sm:$0xff]  ;;  %v8094_v43 = vld [vmem:[#allocation21_spill] sm:$0xff] }
 0x48c   :  { %v2339_v4 = vmul.f32 %v2335_v33, %v2321_v17  ;;  %v2330_v20 = vadd.f32 1.0, %v5035_v44  ;;  %v8087_v17 = vld [vmem:[#allocation14_spill] sm:$0xff]  ;;  %v8088_v33 = vld [vmem:[#allocation15_spill] sm:$0xff] }
 0x48d   :  { %v2340_v1 = vmul.f32 %v2336_v0, %v2322_v60  ;;  %v8090_v60 = vld [vmem:[#allocation17_spill] sm:$0xff]  ;;  %v8091_v0 = vld [vmem:[#allocation18_spill] sm:$0xff] }
 0x48e   :  { %v6809_v34 = vadd.f32 %v2341_v2, %v2339_v4  ;;  %2546 = vmatpush1.bf16.msra.mxu0 %v6313_v8  ;;  %2587 = vmatpush1.bf16.msra.mxu1 %v6319_v14  ;;  %v2331_v8 = vmul.f32 0.5, %v2329_v19  ;;  %v8086_v2 = vld [vmem:[#allocation13_spill] sm:$0xff]  ;;  %v8092_v4 = vld [vmem:[#allocation19_spill] sm:$0xff]  ;;  %v8095_v44 = vld [vmem:[#allocation22_spill] sm:$0xff] }
 0x48f   :  { %v6813_v5 = vadd.f32 %v2342_v41, %v2340_v1  ;;  %2547 = vmatprep.subr.bf16.mxu0 %v6326_v46  ;;  %2588 = vmatprep.subr.bf16.mxu1 %v6332_v48  ;;  %v2332_v46 = vmul.f32 0.5, %v2330_v20  ;;  %v8089_v41 = vld [vmem:[#allocation16_spill] sm:$0xff]  ;;  %v8096_v19 = vld [vmem:[#allocation23_spill] sm:$0xff] }
 0x490   :  { %5036 = vtanh.f32 %v6809_v34  ;;  %v8093_v1 = vld [vmem:[#allocation20_spill] sm:$0xff] }
 0x491   :  { %5038 = vtanh.f32 %v6813_v5  ;;  %v8097_v20 = vld [vmem:[#allocation24_spill] sm:$0xff] }
 0x492   :  { %2548 = vmatpush1.bf16.msra.mxu0 %v6338_v53  ;;  %2589 = vmatpush1.bf16.msra.mxu1 %v6344_v54  ;;  %v8072_v54 = vld [vmem:[#allocation38_spill] sm:$0xff] }
 0x493   :  { %2549 = vmatprep.subr.bf16.mxu0 %v6350_v6  ;;  %2590 = vmatprep.subr.bf16.mxu1 %v6356_v56 }
 0x496   :  { %2550 = vmatpush1.bf16.msra.mxu0 %v6362_v58  ;;  %2591 = vmatpush1.bf16.msra.mxu1 %v6710_v63 }
 0x497   :  { %2551 = vmatprep.subr.bf16.mxu0 %v6716_v39  ;;  %2592 = vmatprep.subr.bf16.mxu1 %v6722_v49 }
 0x49a   :  { %v5037_v14 = vpop.eup %5036  ;;  %2552 = vmatpush1.bf16.msra.mxu0 %v6371_v36  ;;  %2593 = vmatpush1.bf16.msra.mxu1 %v6377_v59  ;;  %v8075_v36 = vld [vmem:[#allocation41_spill] sm:$0xff]  ;;  %v8076_v59 = vld [vmem:[#allocation42_spill] sm:$0xff] }
 0x49b   :  { %v5039_v48 = vpop.eup %5038  ;;  %v2347_v53 = vmul.f32 %v5037_v14, %v2331_v8  ;;  %2553 = vmatprep.subr.bf16.mxu0 %v6383_v22  ;;  %2594 = vmatprep.subr.bf16.mxu1 %v8072_v54  ;;  %v8098_v8 = vld [vmem:[#allocation25_spill] sm:$0xff]  ;;  %v8099_v14 = vld [vmem:[#allocation26_spill] sm:$0xff] }
 0x49c   :  { %v2348_v6 = vmul.f32 %v5039_v48, %v2332_v46  ;;  %v8100_v46 = vld [vmem:[#allocation27_spill] sm:$0xff]  ;;  %v8101_v48 = vld [vmem:[#allocation28_spill] sm:$0xff]  ;;  %v8103_v54 = vld [vmem:[#allocation30_spill] sm:$0xff] }
 0x49d   :  { %v2359_v56 = vrot.slane %v2347_v53, 4  ;;  %v2528_v58 = vpack.c.bf16 %v2347_v53, %v2347_v53  ;;  %v8102_v53 = vld [vmem:[#allocation29_spill] sm:$0xff] }
 0x49e   :  { %v2360_v55 = vrot.slane %v2348_v6, 4  ;;  %v2529_v7 = vpack.c.bf16 %v2348_v6, %v2348_v6  ;;  %2554 = vmatpush1.bf16.msra.mxu0 %v8073_v10  ;;  %2595 = vmatpush1.bf16.msra.mxu1 %v8074_v25  ;;  %v8104_v6 = vld [vmem:[#allocation31_spill] sm:$0xff] }
 0x49f   :  { %2363 = vst [vmem:[#allocation2 + $0xc] sm:$0x1] %v2359_v56  ;;  %v2532_v50 = vunpack.c.l.b16 %v2528_v58  ;;  %2718 = vmatprep.subr.bf16.mxu0 %v8075_v36  ;;  %2759 = vmatprep.subr.bf16.mxu1 %v8076_v59  ;;  %v8105_v56 = vld [vmem:[#allocation32_spill] sm:$0xff]  ;;  %v8106_v58 = vld [vmem:[#allocation33_spill] sm:$0xff] }
 0x4a0   :  { %2364 = vst [vmem:[#allocation2 + $0x1c] sm:$0x1] %v2360_v55  ;;  %v2533_v24 = vunpack.c.l.b16 %v2529_v7  ;;  %v8107_v55 = vld [vmem:[#allocation34_spill] sm:$0xff]  ;;  %v8108_v7 = vld [vmem:[#allocation35_spill] sm:$0xff] }
 0x4a1   :  { %v2534_v22 = vrot.slane %v2532_v50, 4 }
 0x4a2   :  { %v2535_v23 = vrot.slane %v2533_v24, 3 }
 0x4a4   :  { %v2536_v16 = vsel %vm1351_vm0, %v2535_v23, %v2534_v22 }
 0x4a5   :  { %v2537_v52 = vpack.c.b16 %v2536_v16, %v2536_v16 }
 0x4a7   :  { %2572 = vmatmul.mubr.bf16.vlgmr.msra.gmra.mrb[44].mxu0 %v2537_v52  ;;  %2613 = vmatmul.mubr.bf16.vlgmr.msra.gmra.mrb[44].mxu1 %v2537_v52 }
 0x4a8   :  { %2719 = vmatpush1.bf16.msra.mxu0 %v8077_v38  ;;  %2760 = vmatpush1.bf16.msra.mxu1 %v8078_v3  ;;  %v8109_v38 = vld [vmem:[#allocation46_spill] sm:$0xff] }
 0x4a9   :  { %2720 = vmatprep.subr.bf16.mxu0 %v8079_v42  ;;  %2761 = vmatprep.subr.bf16.mxu1 %v8080_v47  ;;  %v8110_v42 = vld [vmem:[#allocation49_spill] sm:$0xff] }
 0x4aa   :  { %2750 = vmatprep.mubr.bf16.mxu0 %v7934_v62  ;;  %2791 = vmatprep.mubr.bf16.mxu1 %v7934_v62 }
 0x4ac   :  { %2721 = vmatpush1.bf16.msra.mxu0 %v8081_v29  ;;  %2762 = vmatpush1.bf16.msra.mxu1 %v8082_v40 }
 0x4ad   :  { %2722 = vmatprep.subr.bf16.mxu0 %v8083_v15  ;;  %2763 = vmatprep.subr.bf16.mxu1 %v8084_v35 }
 0x4b0   :  { %2723 = vmatpush1.bf16.msra.mxu0 %v8085_v9  ;;  %2764 = vmatpush1.bf16.msra.mxu1 %v8086_v2  ;;  %v8111_v9 = vld [vmem:[#allocation47_spill] sm:$0xff] }
 0x4b1   :  { %2724 = vmatprep.subr.bf16.mxu0 %v8087_v17  ;;  %2765 = vmatprep.subr.bf16.mxu1 %v8088_v33  ;;  %v8112_v17 = vld [vmem:[#allocation50_spill] sm:$0xff] }
 0x4b4   :  { %2725 = vmatpush1.bf16.msra.mxu0 %v8089_v41  ;;  %2766 = vmatpush1.bf16.msra.mxu1 %v8090_v60 }
 0x4b5   :  { %2726 = vmatprep.subr.bf16.mxu0 %v8091_v0  ;;  %2767 = vmatprep.subr.bf16.mxu1 %v8092_v4 }
 0x4b8   :  { %2727 = vmatpush1.bf16.msra.mxu0 %v8093_v1  ;;  %2768 = vmatpush1.bf16.msra.mxu1 %v8094_v43  ;;  %v8113_v1 = vld [vmem:[#allocation48_spill] sm:$0xff] }
 0x4b9   :  { %2728 = vmatprep.subr.bf16.mxu0 %v8095_v44  ;;  %2769 = vmatprep.subr.bf16.mxu1 %v8096_v19  ;;  %v8114_v44 = vld [vmem:[#allocation51_spill] sm:$0xff] }
 0x4bc   :  { %2729 = vmatpush1.bf16.msra.mxu0 %v8097_v20  ;;  %2770 = vmatpush1.bf16.msra.mxu1 %v8098_v8 }
 0x4bd   :  { %2730 = vmatprep.subr.bf16.mxu0 %v8099_v14  ;;  %2771 = vmatprep.subr.bf16.mxu1 %v8100_v46  ;;  %v8115_v14 = vld [vmem:[#allocation52_spill] sm:$0xff] }
 0x4c0   :  { %2731 = vmatpush1.bf16.msra.mxu0 %v8101_v48  ;;  %2772 = vmatpush1.bf16.msra.mxu1 %v8102_v53  ;;  %v8116_v48 = vld [vmem:[#allocation53_spill] sm:$0xff] }
 0x4c1   :  { %2732 = vmatprep.subr.bf16.mxu0 %v8103_v54  ;;  %2773 = vmatprep.subr.bf16.mxu1 %v8104_v6 }
 0x4c4   :  { %2733 = vmatpush1.bf16.msra.mxu0 %v8105_v56  ;;  %2774 = vmatpush1.bf16.msra.mxu1 %v8106_v58 }
 0x4c5   :  { %2881 = vmatprep.subr.bf16.mxu0 %v8107_v55  ;;  %2922 = vmatprep.subr.bf16.mxu1 %v8108_v7 }
 0x554   :  { %v2410_v10 = vpop.f32.mrb[40].mxu0  ;;  %v2451_v25 = vpop.f32.mrb[40].mxu1 }
 0x555   :  { %v2462_v50 = vrot.slane %v2410_v10, 4  ;;  %v2466_v36 = vrot.slane %v2410_v10, 5  ;;  %v2412_v59 = vpop.f32.mrb[41].mxu0  ;;  %v2453_v24 = vpop.f32.mrb[41].mxu1  ;;  %v2464_v29 = vrot.slane %v2451_v25, 4  ;;  %v2468_v35 = vrot.slane %v2451_v25, 5 }
 0x556   :  { %v2463_v22 = vrot.slane %v2412_v59, 4  ;;  %v2467_v23 = vrot.slane %v2412_v59, 5  ;;  %v2414_v16 = vpop.f32.mrb[42].mxu0  ;;  %v2455_v52 = vpop.f32.mrb[42].mxu1  ;;  %v2465_v20 = vrot.slane %v2453_v24, 4  ;;  %v2469_v8 = vrot.slane %v2453_v24, 5 }
 0x557   :  { %v2478_v3 = vadd.f32 %v2462_v50, %v8109_v38  ;;  %v2482_v47 = vadd.f32 %v2466_v36, %v8110_v42  ;;  %v2415_v40 = vpop.f32.mrb[43].mxu0  ;;  %v2456_v15 = vpop.f32.mrb[43].mxu1  ;;  %v2480_v43 = vadd.f32 %v2464_v29, %v8113_v1  ;;  %v2484_v19 = vadd.f32 %v2468_v35, %v8114_v44  ;;  %v8117_v52 = vld [vmem:[#allocation54_spill] sm:$0xff] }
 0x558   :  { %v2479_v2 = vadd.f32 %v2463_v22, %v8111_v9  ;;  %v2483_v33 = vadd.f32 %v2467_v23, %v8112_v17  ;;  %v2481_v46 = vadd.f32 %v2465_v20, %v8115_v14  ;;  %v2485_v53 = vadd.f32 %v2469_v8, %v8116_v48  ;;  %v8118_v40 = vld [vmem:[#allocation55_spill] sm:$0xff] }
 0x559   :  { %v2486_v41 = vmul.f32 0.5, %v2478_v3  ;;  %v2487_v60 = vmul.f32 0.5, %v2482_v47  ;;  %v2514_v3 = vrot.slane %v8117_v52, 7  ;;  %v2515_v15 = vrot.slane %v8118_v40, 7 }
 0x55a   :  { %v2494_v0 = vmul.f32 0.5, %v2479_v2  ;;  %v2495_v4 = vmul.f32 0.5, %v2483_v33  ;;  %v2504_v54 = vmul.f32 0.5, %v2481_v46  ;;  %v2505_v56 = vmul.f32 0.5, %v2485_v53 }
 0x55b   :  { %5040 = vtanh.f32 %v2486_v41 }
 0x55c   :  { %5042 = vtanh.f32 %v2487_v60 }
 0x55d   :  { %5044 = vtanh.f32 %v2494_v0 }
 0x55e   :  { %5046 = vtanh.f32 %v2495_v4 }
 0x55f   :  { %5048 = vtanh.f32 %v2480_v43 }
 0x560   :  { %5050 = vtanh.f32 %v2484_v19 }
 0x561   :  { %5052 = vtanh.f32 %v2504_v54 }
 0x562   :  { %5054 = vtanh.f32 %v2505_v56 }
 0x565   :  { %v5041_v6 = vpop.eup %5040 }
 0x566   :  { %v5043_v58 = vpop.eup %5042  ;;  %v2490_v55 = vadd.f32 1.0, %v5041_v6 }
 0x567   :  { %v5045_v7 = vpop.eup %5044  ;;  %v2491_v10 = vadd.f32 1.0, %v5043_v58 }
 0x568   :  { %v5047_v25 = vpop.eup %5046  ;;  %v2492_v50 = vmul.f32 0.5, %v2490_v55  ;;  %v2498_v36 = vadd.f32 1.0, %v5045_v7 }
 0x569   :  { %v5049_v59 = vpop.eup %5048  ;;  %v2493_v24 = vmul.f32 0.5, %v2491_v10  ;;  %v2499_v22 = vadd.f32 1.0, %v5047_v25 }
 0x56a   :  { %v5051_v23 = vpop.eup %5050  ;;  %v2500_v16 = vmul.f32 0.5, %v2498_v36  ;;  %v2520_v47 = vmul.f32 %v5049_v59, %v2492_v50 }
 0x56b   :  { %v2501_v29 = vmul.f32 0.5, %v2499_v22  ;;  %v2521_v35 = vmul.f32 %v5051_v23, %v2493_v24  ;;  %v5053_v0 = vpop.eup %5052 }
 0x56c   :  { %v2518_v2 = vmul.f32 %v2514_v3, %v2500_v16  ;;  %v5055_v4 = vpop.eup %5054  ;;  %v2508_v43 = vadd.f32 1.0, %v5053_v0 }
 0x56d   :  { %v2519_v33 = vmul.f32 %v2515_v15, %v2501_v29  ;;  %v2509_v19 = vadd.f32 1.0, %v5055_v4 }
 0x56e   :  { %v6880_v41 = vadd.f32 %v2520_v47, %v2518_v2  ;;  %v2510_v20 = vmul.f32 0.5, %v2508_v43 }
 0x56f   :  { %v6882_v60 = vadd.f32 %v2521_v35, %v2519_v33  ;;  %v2511_v46 = vmul.f32 0.5, %v2509_v19 }
 0x570   :  { %5056 = vtanh.f32 %v6880_v41 }
 0x571   :  { %5058 = vtanh.f32 %v6882_v60 }
 0x57a   :  { %v5057_v8 = vpop.eup %5056  ;;  %v2573_v53 = vpop.f32.mrb[44].mxu0 }
 0x57b   :  { %v2614_v54 = vpop.f32.mrb[44].mxu1  ;;  %v5059_v6 = vpop.eup %5058  ;;  %v2526_v56 = vmul.f32 %v5057_v8, %v2510_v20  ;;  %v2625_v58 = vrot.slane %v2573_v53, 5  ;;  %v2629_v55 = vrot.slane %v2573_v53, 6 }
 0x57c   :  { %v2627_v7 = vrot.slane %v2614_v54, 5  ;;  %v2575_v10 = vpop.f32.mrb[45].mxu0  ;;  %v2616_v25 = vpop.f32.mrb[45].mxu1  ;;  %v2527_v50 = vmul.f32 %v5059_v6, %v2511_v46  ;;  %v2631_v35 = vrot.slane %v2614_v54, 6 }
 0x57d   :  { %v2626_v36 = vrot.slane %v2575_v10, 5  ;;  %v2630_v59 = vrot.slane %v2575_v10, 6  ;;  %v2577_v24 = vpop.f32.mrb[46].mxu0  ;;  %v2618_v22 = vpop.f32.mrb[46].mxu1  ;;  %v2693_v23 = vrot.slane %v2526_v56, 4  ;;  %v2707_v16 = vpack.c.bf16 %v2526_v56, %v2526_v56 }
 0x57e   :  { %v2641_v52 = vadd.f32 %v2625_v58, %v6135_v27  ;;  %v2645_v3 = vadd.f32 %v2629_v55, %v6141_v31  ;;  %v2578_v47 = vpop.f32.mrb[47].mxu0  ;;  %v2619_v29 = vpop.f32.mrb[47].mxu1  ;;  %v2694_v40 = vrot.slane %v2527_v50, 4  ;;  %v2708_v15 = vpack.c.bf16 %v2527_v50, %v2527_v50 }
 0x57f   :  { %v2643_v2 = vadd.f32 %v2627_v7, %v6147_v32  ;;  %2697 = vst [vmem:[#allocation2 + $0x4] sm:$0x1] %v2693_v23  ;;  %v2711_v33 = vunpack.c.l.b16 %v2707_v16  ;;  %v2642_v43 = vadd.f32 %v2626_v36, %v6138_v28  ;;  %v2646_v20 = vadd.f32 %v2630_v59, %v6144_v26 }
 0x580   :  { %v2649_v0 = vmul.f32 0.5, %v2641_v52  ;;  %v2650_v4 = vmul.f32 0.5, %v2645_v3  ;;  %2698 = vst [vmem:[#allocation2 + $0x14] sm:$0x1] %v2694_v40  ;;  %v2712_v19 = vunpack.c.l.b16 %v2708_v15  ;;  %v2647_v53 = vadd.f32 %v2631_v35, %v6156_v11  ;;  %v6921_v15 = vld [vmem:[%s7692_s4 + $0x64] ss:$16 sps:$4 sm:$0xff]  }
 0x581   :  { %v2657_v8 = vmul.f32 0.5, %v2642_v43  ;;  %v2713_v46 = vrot.slane %v2711_v33, 4  ;;  %v2658_v6 = vmul.f32 0.5, %v2646_v20  ;;  %v2628_v56 = vrot.slane %v2616_v25, 5  ;;  %v6927_v35 = vld [vmem:[%s7692_s4 + $0x6c] ss:$16 sps:$4 sm:$0xff]  }
 0x582   :  { %5060 = vtanh.f32 %v2649_v0  ;;  %v2714_v54 = vrot.slane %v2712_v19, 3  ;;  %v2632_v58 = vrot.slane %v2616_v25, 6  ;;  %v2678_v33 = vrot.slane %v6813_v5, 1  ;;  %v6940_v43 = vld [vmem:[%s7692_s4 + $0x68] ss:$16 sps:$4 sm:$0xff]  }
 0x583   :  { %5062 = vtanh.f32 %v2650_v4  ;;  %v2644_v10 = vadd.f32 %v2628_v56, %v6161_v37  ;;  %v6934_v4 = vld [vmem:[%s7692_s4 + $0x60] ss:$16 sps:$4 sm:$0xff]   ;;  %v6948_v5 = vld [vmem:[%s7692_s4 + $0x84] ss:$16 sps:$4 sm:$0xff]   ;;  %v6954_v20 = vld [vmem:[%s7692_s4 + $0x8c] ss:$16 sps:$4 sm:$0xff]  }
 0x584   :  { %5064 = vtanh.f32 %v2643_v2  ;;  %v2715_v55 = vsel %vm1351_vm0, %v2714_v54, %v2713_v46  ;;  %v2648_v50 = vadd.f32 %v2632_v58, %v6164_v18  ;;  %v6964_v46 = vld [vmem:[%s7692_s4 + $0x80] ss:$16 sps:$4 sm:$0xff]   ;;  %v6976_v54 = vld [vmem:[%s7692_s4 + $0xa4] ss:$16 sps:$4 sm:$0xff]   ;;  %v6982_v56 = vld [vmem:[%s7692_s4 + $0xac] ss:$16 sps:$4 sm:$0xff]  }
 0x585   :  { %5066 = vtanh.f32 %v2657_v8  ;;  %v2716_v7 = vpack.c.b16 %v2715_v55, %v2715_v55  ;;  %v2667_v36 = vmul.f32 0.5, %v2644_v10 }
 0x586   :  { %5068 = vtanh.f32 %v2658_v6  ;;  %v2668_v22 = vmul.f32 0.5, %v2648_v50 }
 0x587   :  { %5070 = vtanh.f32 %v2647_v53  ;;  %2751 = vmatmul.mubr.bf16.vlgmr.msra.gmra.mrb[48].mxu0 %v2716_v7  ;;  %2792 = vmatmul.mubr.bf16.vlgmr.msra.gmra.mrb[48].mxu1 %v2716_v7  ;;  %v6970_v53 = vld [vmem:[%s7692_s4 + $0x88] ss:$16 sps:$4 sm:$0xff]   ;;  %v6988_v7 = vld [vmem:[%s7692_s4 + $0xa0] ss:$16 sps:$4 sm:$0xff]  }
 0x588   :  { %2882 = vmatpush1.bf16.msra.mxu0 %v6639_v30  ;;  %2923 = vmatpush1.bf16.msra.mxu1 %v6645_v45  ;;  %5072 = vtanh.f32 %v2667_v36  ;;  %v7003_v36 = vld [vmem:[%s7692_s4 + $0xc8] ss:$16 sps:$4 sm:$0xff]  }
 0x589   :  { %2883 = vmatprep.subr.bf16.mxu0 %v6651_v12  ;;  %2924 = vmatprep.subr.bf16.mxu1 %v6657_v61  ;;  %5074 = vtanh.f32 %v2668_v22 }
 0x58a   :  { %2913 = vmatprep.mubr.bf16.mxu0 %v7934_v62  ;;  %2954 = vmatprep.mubr.bf16.mxu1 %v7934_v62 }
 0x58c   :  { %v5061_v25 = vpop.eup %5060  ;;  %2884 = vmatpush1.bf16.msra.mxu0 %v6665_v13  ;;  %2925 = vmatpush1.bf16.msra.mxu1 %v6671_v57  ;;  %v6908_v13 = vld [vmem:[%s7692_s4 + $0x40] ss:$16 sps:$4 sm:$0xff]   ;;  %v6914_v57 = vld [vmem:[%s7692_s4 + $0x48] ss:$16 sps:$4 sm:$0xff]  }
 0x58d   :  { %v5063_v59 = vpop.eup %5062  ;;  %v2653_v24 = vadd.f32 1.0, %v5061_v25  ;;  %2885 = vmatprep.subr.bf16.mxu0 %v6677_v51  ;;  %2926 = vmatprep.subr.bf16.mxu1 %v6683_v21  ;;  %v2677_v21 = vrot.slane %v6809_v34, 1  ;;  %v6997_v25 = vld [vmem:[%s7692_s4 + $0xc0] ss:$16 sps:$4 sm:$0xff]  }
 0x58e   :  { %v5065_v30 = vpop.eup %5064  ;;  %v2654_v23 = vadd.f32 1.0, %v5063_v59 }
 0x58f   :  { %v5067_v45 = vpop.eup %5066  ;;  %v2655_v12 = vmul.f32 0.5, %v2653_v24 }
 0x590   :  { %v5069_v61 = vpop.eup %5068  ;;  %v2656_v16 = vmul.f32 0.5, %v2654_v23  ;;  %v2661_v52 = vadd.f32 1.0, %v5067_v45  ;;  %2886 = vmatpush1.bf16.msra.mxu0 %v6908_v13  ;;  %2927 = vmatpush1.bf16.msra.mxu1 %v6914_v57 }
 0x591   :  { %v5071_v3 = vpop.eup %5070  ;;  %v2662_v47 = vadd.f32 1.0, %v5069_v61  ;;  %v2683_v29 = vmul.f32 %v5065_v30, %v2655_v12  ;;  %2887 = vmatprep.subr.bf16.mxu0 %v6921_v15  ;;  %2928 = vmatprep.subr.bf16.mxu1 %v6927_v35  ;;  %v7021_v12 = vld [vmem:[%s7692_s4 + $0xe0] ss:$16 sps:$4 sm:$0xff]   ;;  %v7027_v61 = vld [vmem:[%s7692_s4 + $0xe8] ss:$16 sps:$4 sm:$0xff]  }
 0x592   :  { %v2663_v51 = vmul.f32 0.5, %v2661_v52  ;;  %v2684_v40 = vmul.f32 %v5071_v3, %v2656_v16  ;;  %v5073_v6 = vpop.eup %5072  ;;  %8121 = vst [vmem:[#allocation38_spill] sm:$0xff] %v7021_v12  ;;  %8122 = vst [vmem:[#allocation39_spill] sm:$0xff] %v7027_v61  ;;  %v7033_v3 = vld [vmem:[%s7691_s3 + $0x4] ss:$16 sps:$4 sm:$0xff]  }
 0x593   :  { %v2664_v2 = vmul.f32 0.5, %v2662_v47  ;;  %v5075_v58 = vpop.eup %5074  ;;  %v2671_v55 = vadd.f32 1.0, %v5073_v6  ;;  %v7039_v47 = vld [vmem:[%s7691_s3 + $0xc] ss:$16 sps:$4 sm:$0xff]   ;;  %v7058_v6 = vld [vmem:[%s7691_s3 + $0x24] ss:$16 sps:$4 sm:$0xff]  }
 0x594   :  { %v2681_v0 = vmul.f32 %v2677_v21, %v2663_v51  ;;  %2888 = vmatpush1.bf16.msra.mxu0 %v6934_v4  ;;  %2929 = vmatpush1.bf16.msra.mxu1 %v6940_v43  ;;  %v2672_v10 = vadd.f32 1.0, %v5075_v58  ;;  %8124 = vst [vmem:[#allocation41_spill] sm:$0xff] %v7058_v6  ;;  %v7064_v58 = vld [vmem:[%s7691_s3 + $0x2c] ss:$16 sps:$4 sm:$0xff]  }
 0x595   :  { %v2682_v34 = vmul.f32 %v2678_v33, %v2664_v2  ;;  %2889 = vmatprep.subr.bf16.mxu0 %v6948_v5  ;;  %2930 = vmatprep.subr.bf16.mxu1 %v6954_v20  ;;  %v2673_v50 = vmul.f32 0.5, %v2671_v55  ;;  %8125 = vst [vmem:[#allocation42_spill] sm:$0xff] %v7064_v58  ;;  %v7072_v55 = vld [vmem:[%s7691_s3 + $0x20] ss:$16 sps:$4 sm:$0xff]  }
 0x596   :  { %v6943_v19 = vadd.f32 %v2683_v29, %v2681_v0  ;;  %v2674_v59 = vmul.f32 0.5, %v2672_v10  ;;  %v7046_v0 = vld [vmem:[%s7691_s3] ss:$16 sps:$4 sm:$0xff]   ;;  %8126 = vst [vmem:[#allocation4_spill] sm:$0xff] %v7072_v55  ;;  %v7078_v10 = vld [vmem:[%s7691_s3 + $0x28] ss:$16 sps:$4 sm:$0xff]  }
 0x597   :  { %v6957_v8 = vadd.f32 %v2684_v40, %v2682_v34  ;;  %v7052_v34 = vld [vmem:[%s7691_s3 + $0x8] ss:$16 sps:$4 sm:$0xff]   ;;  %8127 = vst [vmem:[#allocation5_spill] sm:$0xff] %v7078_v10 }
 0x598   :  { %5076 = vtanh.f32 %v6943_v19  ;;  %2890 = vmatpush1.bf16.msra.mxu0 %v6964_v46  ;;  %2931 = vmatpush1.bf16.msra.mxu1 %v6970_v53  ;;  %8123 = vst [vmem:[#allocation40_spill] sm:$0xff] %v7052_v34 }
 0x599   :  { %5078 = vtanh.f32 %v6957_v8  ;;  %2891 = vmatprep.subr.bf16.mxu0 %v6976_v54  ;;  %2932 = vmatprep.subr.bf16.mxu1 %v6982_v56 }
 0x59c   :  { %2892 = vmatpush1.bf16.msra.mxu0 %v6988_v7  ;;  %2933 = vmatpush1.bf16.msra.mxu1 %v6710_v63 }
 0x59d   :  { %2893 = vmatprep.subr.bf16.mxu0 %v6716_v39  ;;  %2934 = vmatprep.subr.bf16.mxu1 %v6722_v49  ;;  %v7009_v39 = vld [vmem:[%s7692_s4 + $0xe4] ss:$16 sps:$4 sm:$0xff]   ;;  %v7015_v49 = vld [vmem:[%s7692_s4 + $0xec] ss:$16 sps:$4 sm:$0xff]  }
 0x59e   :  { %8119 = vst [vmem:[#allocation36_spill] sm:$0xff] %v7009_v39  ;;  %8120 = vst [vmem:[#allocation37_spill] sm:$0xff] %v7015_v49 }
 0x5a0   :  { %2894 = vmatpush1.bf16.msra.mxu0 %v6997_v25  ;;  %2935 = vmatpush1.bf16.msra.mxu1 %v7003_v36 }
 0x5a1   :  { %2895 = vmatprep.subr.bf16.mxu0 %v7009_v39  ;;  %2936 = vmatprep.subr.bf16.mxu1 %v7015_v49 }
 0x5a2   :  { %v5077_v63 = vpop.eup %5076 }
 0x5a3   :  { %v5079_v24 = vpop.eup %5078  ;;  %v2689_v22 = vmul.f32 %v5077_v63, %v2673_v50  ;;  %v7084_v50 = vld [vmem:[%s7691_s3 + $0x44] ss:$16 sps:$4 sm:$0xff]   ;;  %v7090_v63 = vld [vmem:[%s7691_s3 + $0x4c] ss:$16 sps:$4 sm:$0xff]  }
 0x5a4   :  { %v2690_v30 = vmul.f32 %v5079_v24, %v2674_v59  ;;  %2896 = vmatpush1.bf16.msra.mxu0 %v7021_v12  ;;  %2937 = vmatpush1.bf16.msra.mxu1 %v7027_v61  ;;  %8128 = vst [vmem:[#allocation6_spill] sm:$0xff] %v7084_v50  ;;  %8129 = vst [vmem:[#allocation7_spill] sm:$0xff] %v7090_v63  ;;  %v7096_v59 = vld [vmem:[%s7691_s3 + $0x40] ss:$16 sps:$4 sm:$0xff]   ;;  %v7102_v24 = vld [vmem:[%s7691_s3 + $0x48] ss:$16 sps:$4 sm:$0xff]  }
 0x5a5   :  { %v2701_v23 = vrot.slane %v2689_v22, 3  ;;  %v2870_v45 = vpack.c.bf16 %v2689_v22, %v2689_v22  ;;  %3060 = vmatprep.subr.bf16.mxu0 %v7033_v3  ;;  %3101 = vmatprep.subr.bf16.mxu1 %v7039_v47  ;;  %8130 = vst [vmem:[#allocation8_spill] sm:$0xff] %v7096_v59  ;;  %8131 = vst [vmem:[#allocation9_spill] sm:$0xff] %v7102_v24  ;;  %v7108_v22 = vld [vmem:[%s7691_s3 + $0x64] ss:$16 sps:$4 sm:$0xff]  }
 0x5a6   :  { %v2702_v16 = vrot.slane %v2690_v30, 3  ;;  %v2871_v52 = vpack.c.bf16 %v2690_v30, %v2690_v30  ;;  %8132 = vst [vmem:[#allocation10_spill] sm:$0xff] %v7108_v22  ;;  %v7114_v30 = vld [vmem:[%s7691_s3 + $0x6c] ss:$16 sps:$4 sm:$0xff]  }
 0x5a7   :  { %2705 = vst [vmem:[#allocation2 + $0xb] sm:$0x1] %v2701_v23  ;;  %v2874_v29 = vunpack.c.l.b16 %v2870_v45  ;;  %8133 = vst [vmem:[#allocation11_spill] sm:$0xff] %v7114_v30  ;;  %v7120_v23 = vld [vmem:[%s7691_s3 + $0x60] ss:$16 sps:$4 sm:$0xff]  }
 0x5a8   :  { %2706 = vst [vmem:[#allocation2 + $0x1b] sm:$0x1] %v2702_v16  ;;  %v2875_v51 = vunpack.c.l.b16 %v2871_v52  ;;  %8134 = vst [vmem:[#allocation12_spill] sm:$0xff] %v7120_v23  ;;  %v7126_v45 = vld [vmem:[%s7691_s3 + $0x68] ss:$16 sps:$4 sm:$0xff]  }
 0x5a9   :  { %v2876_v21 = vrot.slane %v2874_v29, 3  ;;  %8135 = vst [vmem:[#allocation13_spill] sm:$0xff] %v7126_v45  ;;  %v7132_v16 = vld [vmem:[%s7691_s3 + $0x84] ss:$16 sps:$4 sm:$0xff]   ;;  %v7138_v52 = vld [vmem:[%s7691_s3 + $0x8c] ss:$16 sps:$4 sm:$0xff]  }
 0x5aa   :  { %v2877_v40 = vrot.slane %v2875_v51, 2  ;;  %8136 = vst [vmem:[#allocation14_spill] sm:$0xff] %v7132_v16  ;;  %8137 = vst [vmem:[#allocation15_spill] sm:$0xff] %v7138_v52  ;;  %v7144_v29 = vld [vmem:[%s7691_s3 + $0x80] ss:$16 sps:$4 sm:$0xff]  }
 0x5ab   :  { %8138 = vst [vmem:[#allocation16_spill] sm:$0xff] %v7144_v29  ;;  %v7150_v51 = vld [vmem:[%s7691_s3 + $0x88] ss:$16 sps:$4 sm:$0xff]  }
 0x5ac   :  { %v2878_v2 = vsel %vm1351_vm0, %v2877_v40, %v2876_v21  ;;  %8139 = vst [vmem:[#allocation17_spill] sm:$0xff] %v7150_v51  ;;  %v7156_v21 = vld [vmem:[%s7691_s3 + $0xa4] ss:$16 sps:$4 sm:$0xff]   ;;  %v7162_v40 = vld [vmem:[%s7691_s3 + $0xac] ss:$16 sps:$4 sm:$0xff]  }
 0x5ad   :  { %v2879_v33 = vpack.c.b16 %v2878_v2, %v2878_v2  ;;  %8140 = vst [vmem:[#allocation18_spill] sm:$0xff] %v7156_v21  ;;  %8141 = vst [vmem:[#allocation19_spill] sm:$0xff] %v7162_v40  ;;  %v7168_v2 = vld [vmem:[%s7691_s3 + $0xa0] ss:$16 sps:$4 sm:$0xff]  }
 0x5ae   :  { %8142 = vst [vmem:[#allocation20_spill] sm:$0xff] %v7168_v2 }
 0x5af   :  { %2914 = vmatmul.mubr.bf16.vlgmr.msra.gmra.mrb[52].mxu0 %v2879_v33  ;;  %2955 = vmatmul.mubr.bf16.vlgmr.msra.gmra.mrb[52].mxu1 %v2879_v33  ;;  %v7174_v33 = vld [vmem:[%s7691_s3 + $0xa8] ss:$16 sps:$4 sm:$0xff]  }
 0x5b0   :  { %3061 = vmatpush1.bf16.msra.mxu0 %v7046_v0  ;;  %3102 = vmatpush1.bf16.msra.mxu1 %v7052_v34  ;;  %8143 = vst [vmem:[#allocation21_spill] sm:$0xff] %v7174_v33 }
 0x5b1   :  { %3062 = vmatprep.subr.bf16.mxu0 %v7058_v6  ;;  %3103 = vmatprep.subr.bf16.mxu1 %v7064_v58 }
 0x5b2   :  { %3092 = vmatprep.mubr.bf16.mxu0 %v7934_v62  ;;  %3133 = vmatprep.mubr.bf16.mxu1 %v7934_v62 }
 0x5b4   :  { %3063 = vmatpush1.bf16.msra.mxu0 %v7072_v55  ;;  %3104 = vmatpush1.bf16.msra.mxu1 %v7078_v10 }
 0x5b5   :  { %3064 = vmatprep.subr.bf16.mxu0 %v7084_v50  ;;  %3105 = vmatprep.subr.bf16.mxu1 %v7090_v63 }
 0x5b8   :  { %3065 = vmatpush1.bf16.msra.mxu0 %v7096_v59  ;;  %3106 = vmatpush1.bf16.msra.mxu1 %v7102_v24 }
 0x5b9   :  { %3066 = vmatprep.subr.bf16.mxu0 %v7108_v22  ;;  %3107 = vmatprep.subr.bf16.mxu1 %v7114_v30 }
 0x5bc   :  { %3067 = vmatpush1.bf16.msra.mxu0 %v7120_v23  ;;  %3108 = vmatpush1.bf16.msra.mxu1 %v7126_v45 }
 0x5bd   :  { %3068 = vmatprep.subr.bf16.mxu0 %v7132_v16  ;;  %3109 = vmatprep.subr.bf16.mxu1 %v7138_v52 }
 0x5c0   :  { %3069 = vmatpush1.bf16.msra.mxu0 %v7144_v29  ;;  %3110 = vmatpush1.bf16.msra.mxu1 %v7150_v51 }
 0x5c1   :  { %3070 = vmatprep.subr.bf16.mxu0 %v7156_v21  ;;  %3111 = vmatprep.subr.bf16.mxu1 %v7162_v40  ;;  %v7180_v21 = vld [vmem:[%s7691_s3 + $0xc4] ss:$16 sps:$4 sm:$0xff]   ;;  %v7186_v40 = vld [vmem:[%s7691_s3 + $0xcc] ss:$16 sps:$4 sm:$0xff]  }
 0x5c2   :  { %8144 = vst [vmem:[#allocation22_spill] sm:$0xff] %v7180_v21  ;;  %8145 = vst [vmem:[#allocation23_spill] sm:$0xff] %v7186_v40 }
 0x5c4   :  { %3071 = vmatpush1.bf16.msra.mxu0 %v7168_v2  ;;  %3112 = vmatpush1.bf16.msra.mxu1 %v7174_v33  ;;  %v7192_v2 = vld [vmem:[%s7691_s3 + $0xc0] ss:$16 sps:$4 sm:$0xff]   ;;  %v7198_v33 = vld [vmem:[%s7691_s3 + $0xc8] ss:$16 sps:$4 sm:$0xff]  }
 0x5c5   :  { %3072 = vmatprep.subr.bf16.mxu0 %v7180_v21  ;;  %3113 = vmatprep.subr.bf16.mxu1 %v7186_v40  ;;  %8146 = vst [vmem:[#allocation24_spill] sm:$0xff] %v7192_v2  ;;  %8147 = vst [vmem:[#allocation25_spill] sm:$0xff] %v7198_v33  ;;  %v7204_v21 = vld [vmem:[%s7691_s3 + $0xe4] ss:$16 sps:$4 sm:$0xff]   ;;  %v7210_v40 = vld [vmem:[%s7691_s3 + $0xec] ss:$16 sps:$4 sm:$0xff]  }
 0x5c6   :  { %8148 = vst [vmem:[#allocation26_spill] sm:$0xff] %v7204_v21  ;;  %8149 = vst [vmem:[#allocation27_spill] sm:$0xff] %v7210_v40 }
 0x5c8   :  { %3073 = vmatpush1.bf16.msra.mxu0 %v7192_v2  ;;  %3114 = vmatpush1.bf16.msra.mxu1 %v7198_v33  ;;  %v7216_v2 = vld [vmem:[%s7691_s3 + $0xe0] ss:$16 sps:$4 sm:$0xff]   ;;  %v7222_v33 = vld [vmem:[%s7691_s3 + $0xe8] ss:$16 sps:$4 sm:$0xff]  }
 0x5c9   :  { %3074 = vmatprep.subr.bf16.mxu0 %v7204_v21  ;;  %3115 = vmatprep.subr.bf16.mxu1 %v7210_v40  ;;  %8150 = vst [vmem:[#allocation28_spill] sm:$0xff] %v7216_v2  ;;  %8151 = vst [vmem:[#allocation29_spill] sm:$0xff] %v7222_v33  ;;  %v7228_v21 = vld [vmem:[%s7692_s4 + $0x4] ss:$16 sps:$4 sm:$0xff]   ;;  %v7234_v40 = vld [vmem:[%s7692_s4 + $0xc] ss:$16 sps:$4 sm:$0xff]  }
 0x5ca   :  { %8152 = vst [vmem:[#allocation30_spill] sm:$0xff] %v7228_v21  ;;  %8153 = vst [vmem:[#allocation31_spill] sm:$0xff] %v7234_v40 }
 0x5cc   :  { %3075 = vmatpush1.bf16.msra.mxu0 %v7216_v2  ;;  %3116 = vmatpush1.bf16.msra.mxu1 %v7222_v33 }
 0x5cd   :  { %3223 = vmatprep.subr.bf16.mxu0 %v7228_v21  ;;  %3264 = vmatprep.subr.bf16.mxu1 %v7234_v40 }
 0x65a   :  { %v2752_v2 = vpop.f32.mrb[48].mxu0  ;;  %v2793_v51 = vpop.f32.mrb[48].mxu1 }
 0x65b   :  { %v2804_v29 = vrot.slane %v2752_v2, 3  ;;  %v2808_v52 = vrot.slane %v2752_v2, 4  ;;  %v2754_v16 = vpop.f32.mrb[49].mxu0  ;;  %v2795_v33 = vpop.f32.mrb[49].mxu1  ;;  %v2806_v59 = vrot.slane %v2793_v51, 3  ;;  %v2810_v10 = vrot.slane %v2793_v51, 4 }
 0x65c   :  { %v2805_v45 = vrot.slane %v2754_v16, 3  ;;  %v2809_v23 = vrot.slane %v2754_v16, 4  ;;  %v2756_v30 = vpop.f32.mrb[50].mxu0  ;;  %v2797_v22 = vpop.f32.mrb[50].mxu1  ;;  %v2807_v16 = vrot.slane %v2795_v33, 3 }
 0x65d   :  { %v2820_v24 = vadd.f32 %v2804_v29, %v8109_v38  ;;  %v2824_v21 = vadd.f32 %v2808_v52, %v8110_v42  ;;  %v2757_v63 = vpop.f32.mrb[51].mxu0  ;;  %v2798_v50 = vpop.f32.mrb[51].mxu1  ;;  %v2822_v30 = vadd.f32 %v2806_v59, %v8113_v1  ;;  %v2826_v22 = vadd.f32 %v2810_v10, %v8114_v44 }
 0x65e   :  { %v2821_v40 = vadd.f32 %v2805_v45, %v8111_v9  ;;  %v2825_v55 = vadd.f32 %v2809_v23, %v8112_v17  ;;  %v2811_v52 = vrot.slane %v2795_v33, 4  ;;  %v2823_v50 = vadd.f32 %v2807_v16, %v8115_v14 }
 0x65f   :  { %v2828_v58 = vmul.f32 0.5, %v2820_v24  ;;  %v2829_v2 = vmul.f32 0.5, %v2824_v21 }
 0x660   :  { %v2836_v6 = vmul.f32 0.5, %v2821_v40  ;;  %v2837_v34 = vmul.f32 0.5, %v2825_v55  ;;  %v2827_v63 = vadd.f32 %v2811_v52, %v8116_v48  ;;  %v2846_v24 = vmul.f32 0.5, %v2823_v50 }
 0x661   :  { %5080 = vtanh.f32 %v2828_v58  ;;  %v2857_v52 = vrot.slane %v6882_v60, 7 }
 0x662   :  { %5082 = vtanh.f32 %v2829_v2  ;;  %v2847_v45 = vmul.f32 0.5, %v2827_v63 }
 0x663   :  { %5084 = vtanh.f32 %v2836_v6 }
 0x664   :  { %5086 = vtanh.f32 %v2837_v34 }
 0x665   :  { %5088 = vtanh.f32 %v2822_v30  ;;  %v2856_v30 = vrot.slane %v6880_v41, 7 }
 0x666   :  { %5090 = vtanh.f32 %v2826_v22 }
 0x667   :  { %5092 = vtanh.f32 %v2846_v24 }
 0x668   :  { %5094 = vtanh.f32 %v2847_v45 }
 0x66b   :  { %v5081_v23 = vpop.eup %5080 }
 0x66c   :  { %v5083_v55 = vpop.eup %5082  ;;  %v2832_v58 = vadd.f32 1.0, %v5081_v23 }
 0x66d   :  { %v5085_v29 = vpop.eup %5084  ;;  %v2833_v59 = vadd.f32 1.0, %v5083_v55 }
 0x66e   :  { %v5087_v51 = vpop.eup %5086  ;;  %v2834_v21 = vmul.f32 0.5, %v2832_v58  ;;  %v2840_v10 = vadd.f32 1.0, %v5085_v29 }
 0x66f   :  { %v5089_v6 = vpop.eup %5088  ;;  %v2835_v40 = vmul.f32 0.5, %v2833_v59  ;;  %v2841_v34 = vadd.f32 1.0, %v5087_v51 }
 0x670   :  { %v5091_v33 = vpop.eup %5090  ;;  %v2842_v2 = vmul.f32 0.5, %v2840_v10  ;;  %v2862_v22 = vmul.f32 %v5089_v6, %v2834_v21 }
 0x671   :  { %v2843_v16 = vmul.f32 0.5, %v2841_v34  ;;  %v2863_v50 = vmul.f32 %v5091_v33, %v2835_v40  ;;  %v5093_v24 = vpop.eup %5092 }
 0x672   :  { %v2860_v63 = vmul.f32 %v2856_v30, %v2842_v2  ;;  %v5095_v45 = vpop.eup %5094  ;;  %v2850_v29 = vadd.f32 1.0, %v5093_v24 }
 0x673   :  { %v2861_v23 = vmul.f32 %v2857_v52, %v2843_v16  ;;  %v2851_v59 = vadd.f32 1.0, %v5095_v45 }
 0x674   :  { %v7247_v55 = vadd.f32 %v2862_v22, %v2860_v63  ;;  %v2852_v41 = vmul.f32 0.5, %v2850_v29 }
 0x675   :  { %v7249_v58 = vadd.f32 %v2863_v50, %v2861_v23  ;;  %v2853_v21 = vmul.f32 0.5, %v2851_v59 }
 0x676   :  { %8154 = vst [vmem:[#allocation32_spill] sm:$0xff] %v7247_v55  ;;  %5096 = vtanh.f32 %v7247_v55 }
 0x677   :  { %8155 = vst [vmem:[#allocation33_spill] sm:$0xff] %v7249_v58  ;;  %5098 = vtanh.f32 %v7249_v58 }
 0x680   :  { %v5097_v51 = vpop.eup %5096 }
 0x681   :  { %v5099_v10 = vpop.eup %5098  ;;  %v2868_v60 = vmul.f32 %v5097_v51, %v2852_v41 }
 0x682   :  { %v2915_v6 = vpop.f32.mrb[52].mxu0  ;;  %v2956_v40 = vpop.f32.mrb[52].mxu1  ;;  %v2869_v34 = vmul.f32 %v5099_v10, %v2853_v21 }
 0x683   :  { %v2967_v33 = vrot.slane %v2915_v6, 6  ;;  %v2971_v2 = vrot.slane %v2915_v6, 7  ;;  %v2969_v30 = vrot.slane %v2956_v40, 6  ;;  %v2917_v22 = vpop.f32.mrb[53].mxu0  ;;  %v2958_v16 = vpop.f32.mrb[53].mxu1  ;;  %v3035_v52 = vrot.slane %v2868_v60, 5 }
 0x684   :  { %v3049_v50 = vpack.c.bf16 %v2868_v60, %v2868_v60  ;;  %v2968_v63 = vrot.slane %v2917_v22, 6  ;;  %v2919_v23 = vpop.f32.mrb[54].mxu0  ;;  %v2960_v58 = vpop.f32.mrb[54].mxu1  ;;  %v3036_v24 = vrot.slane %v2869_v34, 5  ;;  %v3050_v45 = vpack.c.bf16 %v2869_v34, %v2869_v34 }
 0x685   :  { %v2983_v29 = vadd.f32 %v2967_v33, %v6135_v27  ;;  %v2987_v59 = vadd.f32 %v2971_v2, %v6141_v31  ;;  %v2920_v41 = vpop.f32.mrb[55].mxu0  ;;  %v2961_v51 = vpop.f32.mrb[55].mxu1  ;;  %3039 = vst [vmem:[#allocation2 + $0x5] sm:$0x1] %v3035_v52  ;;  %v2973_v10 = vrot.slane %v2956_v40, 7  ;;  %v2985_v6 = vadd.f32 %v2969_v30, %v6147_v32 }
 0x686   :  { %v3053_v21 = vunpack.c.l.b16 %v3049_v50  ;;  %v2972_v55 = vrot.slane %v2917_v22, 7  ;;  %3040 = vst [vmem:[#allocation2 + $0x15] sm:$0x1] %v3036_v24  ;;  %v3054_v48 = vunpack.c.l.b16 %v3050_v45  ;;  %v2984_v58 = vadd.f32 %v2968_v63, %v6138_v28  ;;  %v7277_v63 = vld [vmem:[%s7692_s4 + $0x24] ss:$16 sps:$4 sm:$0xff]  }
 0x687   :  { %v2991_v60 = vmul.f32 0.5, %v2983_v29  ;;  %v2992_v14 = vmul.f32 0.5, %v2987_v59  ;;  %v2989_v52 = vadd.f32 %v2973_v10, %v6156_v11  ;;  %v2970_v40 = vrot.slane %v2958_v16, 6  ;;  %v7283_v45 = vld [vmem:[%s7692_s4 + $0x2c] ss:$16 sps:$4 sm:$0xff]  }
 0x688   :  { %v2988_v34 = vadd.f32 %v2972_v55, %v6144_v26  ;;  %v2999_v33 = vmul.f32 0.5, %v2984_v58  ;;  %v3055_v23 = vrot.slane %v3053_v21, 5  ;;  %v3056_v2 = vrot.slane %v3054_v48, 4  ;;  %v7270_v48 = vld [vmem:[%s7692_s4 + $0x8] ss:$16 sps:$4 sm:$0xff]  }
 0x689   :  { %5100 = vtanh.f32 %v2991_v60  ;;  %v2974_v22 = vrot.slane %v2958_v16, 7  ;;  %v2986_v55 = vadd.f32 %v2970_v40, %v6161_v37  ;;  %v7291_v41 = vld [vmem:[%s7692_s4 + $0x20] ss:$16 sps:$4 sm:$0xff]   ;;  %v7297_v51 = vld [vmem:[%s7692_s4 + $0x28] ss:$16 sps:$4 sm:$0xff]  }
 0x68a   :  { %5102 = vtanh.f32 %v2992_v14  ;;  %v3000_v50 = vmul.f32 0.5, %v2988_v34  ;;  %v3057_v30 = vsel %vm1351_vm0, %v3056_v2, %v3055_v23  ;;  %v7264_v14 = vld [vmem:[%s7692_s4] ss:$16 sps:$4 sm:$0xff]   ;;  %v7303_v60 = vld [vmem:[%s7692_s4 + $0x44] ss:$16 sps:$4 sm:$0xff]  }
 0x68b   :  { %5104 = vtanh.f32 %v2985_v6  ;;  %v3058_v24 = vpack.c.b16 %v3057_v30, %v3057_v30  ;;  %v2990_v16 = vadd.f32 %v2974_v22, %v6164_v18  ;;  %v3009_v59 = vmul.f32 0.5, %v2986_v55  ;;  %v7309_v58 = vld [vmem:[%s7692_s4 + $0x4c] ss:$16 sps:$4 sm:$0xff]  }
 0x68c   :  { %5106 = vtanh.f32 %v2999_v33 }
 0x68d   :  { %5108 = vtanh.f32 %v3000_v50  ;;  %3093 = vmatmul.mubr.bf16.vlgmr.msra.gmra.mrb[56].mxu0 %v3058_v24  ;;  %3134 = vmatmul.mubr.bf16.vlgmr.msra.gmra.mrb[56].mxu1 %v3058_v24  ;;  %v3010_v6 = vmul.f32 0.5, %v2990_v16  ;;  %v3019_v16 = vrot.slane %v6943_v19, 1 }
 0x68e   :  { %5110 = vtanh.f32 %v2989_v52  ;;  %3224 = vmatpush1.bf16.msra.mxu0 %v7264_v14  ;;  %3265 = vmatpush1.bf16.msra.mxu1 %v7270_v48 }
 0x68f   :  { %3225 = vmatprep.subr.bf16.mxu0 %v7277_v63  ;;  %3266 = vmatprep.subr.bf16.mxu1 %v7283_v45  ;;  %5112 = vtanh.f32 %v3009_v59 }
 0x690   :  { %3255 = vmatprep.mubr.bf16.mxu0 %v7934_v62  ;;  %3296 = vmatprep.mubr.bf16.mxu1 %v7934_v62  ;;  %5114 = vtanh.f32 %v3010_v6 }
 0x692   :  { %3226 = vmatpush1.bf16.msra.mxu0 %v7291_v41  ;;  %3267 = vmatpush1.bf16.msra.mxu1 %v7297_v51 }
 0x693   :  { %v5101_v29 = vpop.eup %5100  ;;  %3227 = vmatprep.subr.bf16.mxu0 %v7303_v60  ;;  %3268 = vmatprep.subr.bf16.mxu1 %v7309_v58 }
 0x694   :  { %v5103_v21 = vpop.eup %5102  ;;  %v2995_v10 = vadd.f32 1.0, %v5101_v29 }
 0x695   :  { %v5105_v34 = vpop.eup %5104  ;;  %v2996_v33 = vadd.f32 1.0, %v5103_v21 }
 0x696   :  { %v5107_v23 = vpop.eup %5106  ;;  %v2997_v2 = vmul.f32 0.5, %v2995_v10  ;;  %3228 = vmatpush1.bf16.msra.mxu0 %v6908_v13  ;;  %3269 = vmatpush1.bf16.msra.mxu1 %v6914_v57  ;;  %v3020_v10 = vrot.slane %v6957_v8, 1 }
 0x697   :  { %v5109_v52 = vpop.eup %5108  ;;  %v2998_v50 = vmul.f32 0.5, %v2996_v33  ;;  %v3003_v40 = vadd.f32 1.0, %v5107_v23  ;;  %3229 = vmatprep.subr.bf16.mxu0 %v6921_v15  ;;  %3270 = vmatprep.subr.bf16.mxu1 %v6927_v35  ;;  %v7336_v23 = vld [vmem:[%s7692_s4 + $0xa8] ss:$16 sps:$4 sm:$0xff]  }
 0x698   :  { %v5111_v30 = vpop.eup %5110  ;;  %v3004_v22 = vadd.f32 1.0, %v5109_v52  ;;  %v3025_v24 = vmul.f32 %v5105_v34, %v2997_v2  ;;  %v7342_v52 = vld [vmem:[%s7692_s4 + $0xc4] ss:$16 sps:$4 sm:$0xff]  }
 0x699   :  { %v3005_v55 = vmul.f32 0.5, %v3003_v40  ;;  %v3026_v29 = vmul.f32 %v5111_v30, %v2998_v50  ;;  %v5113_v19 = vpop.eup %5112  ;;  %v7348_v50 = vld [vmem:[%s7692_s4 + $0xcc] ss:$16 sps:$4 sm:$0xff]  }
 0x69a   :  { %v3006_v21 = vmul.f32 0.5, %v3004_v22  ;;  %3230 = vmatpush1.bf16.msra.mxu0 %v6934_v4  ;;  %3271 = vmatpush1.bf16.msra.mxu1 %v6940_v43  ;;  %v5115_v8 = vpop.eup %5114  ;;  %v3013_v2 = vadd.f32 1.0, %v5113_v19 }
 0x69b   :  { %v3023_v59 = vmul.f32 %v3019_v16, %v3005_v55  ;;  %3231 = vmatprep.subr.bf16.mxu0 %v6948_v5  ;;  %3272 = vmatprep.subr.bf16.mxu1 %v6954_v20  ;;  %v3014_v40 = vadd.f32 1.0, %v5115_v8 }
 0x69c   :  { %v3024_v33 = vmul.f32 %v3020_v10, %v3006_v21  ;;  %v3015_v30 = vmul.f32 0.5, %v3013_v2 }
 0x69d   :  { %v7322_v6 = vadd.f32 %v3025_v24, %v3023_v59  ;;  %v3016_v24 = vmul.f32 0.5, %v3014_v40 }
 0x69e   :  { %v7324_v34 = vadd.f32 %v3026_v29, %v3024_v33  ;;  %3232 = vmatpush1.bf16.msra.mxu0 %v6964_v46  ;;  %3273 = vmatpush1.bf16.msra.mxu1 %v6970_v53 }
 0x69f   :  { %5116 = vtanh.f32 %v7322_v6  ;;  %3233 = vmatprep.subr.bf16.mxu0 %v6976_v54  ;;  %3274 = vmatprep.subr.bf16.mxu1 %v6982_v56 }
 0x6a0   :  { %5118 = vtanh.f32 %v7324_v34 }
 0x6a2   :  { %3234 = vmatpush1.bf16.msra.mxu0 %v6988_v7  ;;  %3275 = vmatpush1.bf16.msra.mxu1 %v7336_v23 }
 0x6a3   :  { %3235 = vmatprep.subr.bf16.mxu0 %v7342_v52  ;;  %3276 = vmatprep.subr.bf16.mxu1 %v7348_v50 }
 0x6a6   :  { %3236 = vmatpush1.bf16.msra.mxu0 %v6997_v25  ;;  %3277 = vmatpush1.bf16.msra.mxu1 %v7003_v36 }
 0x6a7   :  { %3237 = vmatprep.subr.bf16.mxu0 %v7009_v39  ;;  %3278 = vmatprep.subr.bf16.mxu1 %v7015_v49 }
 0x6a9   :  { %v5117_v22 = vpop.eup %5116 }
 0x6aa   :  { %v5119_v55 = vpop.eup %5118  ;;  %v3031_v16 = vmul.f32 %v5117_v22, %v3015_v30  ;;  %3238 = vmatpush1.bf16.msra.mxu0 %v7021_v12  ;;  %3279 = vmatpush1.bf16.msra.mxu1 %v7027_v61 }
 0x6ab   :  { %v3032_v29 = vmul.f32 %v5119_v55, %v3016_v24  ;;  %3398 = vmatprep.subr.bf16.mxu0 %v7033_v3  ;;  %3439 = vmatprep.subr.bf16.mxu1 %v7039_v47  ;;  %v8156_v24 = vld [vmem:[#allocation40_spill] sm:$0xff]  ;;  %v8157_v3 = vld [vmem:[#allocation41_spill] sm:$0xff]  ;;  %v8158_v47 = vld [vmem:[#allocation42_spill] sm:$0xff] }
 0x6ac   :  { %v3043_v21 = vrot.slane %v3031_v16, 2  ;;  %v3212_v10 = vpack.c.bf16 %v3031_v16, %v3031_v16  ;;  %v8159_v55 = vld [vmem:[#allocation4_spill] sm:$0xff]  ;;  %v8160_v16 = vld [vmem:[#allocation5_spill] sm:$0xff] }
 0x6ad   :  { %v3044_v59 = vrot.slane %v3032_v29, 2  ;;  %v3213_v33 = vpack.c.bf16 %v3032_v29, %v3032_v29  ;;  %v8161_v29 = vld [vmem:[#allocation6_spill] sm:$0xff] }
 0x6ae   :  { %3047 = vst [vmem:[#allocation2 + $0xa] sm:$0x1] %v3043_v21  ;;  %v3216_v19 = vunpack.c.l.b16 %v3212_v10  ;;  %v8162_v21 = vld [vmem:[#allocation7_spill] sm:$0xff]  ;;  %v8163_v10 = vld [vmem:[#allocation8_spill] sm:$0xff] }
 0x6af   :  { %3048 = vst [vmem:[#allocation2 + $0x1a] sm:$0x1] %v3044_v59  ;;  %v3217_v8 = vunpack.c.l.b16 %v3213_v33  ;;  %v8165_v59 = vld [vmem:[#allocation10_spill] sm:$0xff]  ;;  %v8166_v33 = vld [vmem:[#allocation11_spill] sm:$0xff] }
 0x6b0   :  { %v3218_v2 = vrot.slane %v3216_v19, 2  ;;  %v8167_v19 = vld [vmem:[#allocation12_spill] sm:$0xff] }
 0x6b1   :  { %v3219_v40 = vrot.slane %v3217_v8, 1  ;;  %v8168_v8 = vld [vmem:[#allocation13_spill] sm:$0xff] }
 0x6b3   :  { %v3220_v30 = vsel %vm1351_vm0, %v3219_v40, %v3218_v2  ;;  %v8169_v2 = vld [vmem:[#allocation14_spill] sm:$0xff]  ;;  %v8170_v40 = vld [vmem:[#allocation15_spill] sm:$0xff] }
 0x6b4   :  { %v3221_v22 = vpack.c.b16 %v3220_v30, %v3220_v30  ;;  %v8171_v30 = vld [vmem:[#allocation16_spill] sm:$0xff] }
 0x6b6   :  { %3256 = vmatmul.mubr.bf16.vlgmr.msra.gmra.mrb[60].mxu0 %v3221_v22  ;;  %3297 = vmatmul.mubr.bf16.vlgmr.msra.gmra.mrb[60].mxu1 %v3221_v22  ;;  %v8172_v22 = vld [vmem:[#allocation17_spill] sm:$0xff] }
 0x6b7   :  { %3399 = vmatpush1.bf16.msra.mxu0 %v7046_v0  ;;  %3440 = vmatpush1.bf16.msra.mxu1 %v8156_v24  ;;  %v8164_v0 = vld [vmem:[#allocation9_spill] sm:$0xff]  ;;  %v8173_v24 = vld [vmem:[#allocation18_spill] sm:$0xff] }
 0x6b8   :  { %3400 = vmatprep.subr.bf16.mxu0 %v8157_v3  ;;  %3441 = vmatprep.subr.bf16.mxu1 %v8158_v47  ;;  %v8174_v3 = vld [vmem:[#allocation19_spill] sm:$0xff]  ;;  %v8175_v47 = vld [vmem:[#allocation20_spill] sm:$0xff] }
 0x6b9   :  { %3430 = vmatprep.mubr.bf16.mxu0 %v7934_v62  ;;  %3471 = vmatprep.mubr.bf16.mxu1 %v7934_v62 }
 0x6bb   :  { %3401 = vmatpush1.bf16.msra.mxu0 %v8159_v55  ;;  %3442 = vmatpush1.bf16.msra.mxu1 %v8160_v16  ;;  %v8176_v55 = vld [vmem:[#allocation21_spill] sm:$0xff]  ;;  %v8177_v16 = vld [vmem:[#allocation22_spill] sm:$0xff] }
 0x6bc   :  { %3402 = vmatprep.subr.bf16.mxu0 %v8161_v29  ;;  %3443 = vmatprep.subr.bf16.mxu1 %v8162_v21  ;;  %v8178_v29 = vld [vmem:[#allocation23_spill] sm:$0xff]  ;;  %v8179_v21 = vld [vmem:[#allocation24_spill] sm:$0xff] }
 0x6bf   :  { %3403 = vmatpush1.bf16.msra.mxu0 %v8163_v10  ;;  %3444 = vmatpush1.bf16.msra.mxu1 %v8164_v0  ;;  %v8180_v10 = vld [vmem:[#allocation25_spill] sm:$0xff]  ;;  %v8181_v0 = vld [vmem:[#allocation26_spill] sm:$0xff] }
 0x6c0   :  { %3404 = vmatprep.subr.bf16.mxu0 %v8165_v59  ;;  %3445 = vmatprep.subr.bf16.mxu1 %v8166_v33  ;;  %v8182_v59 = vld [vmem:[#allocation27_spill] sm:$0xff]  ;;  %v8183_v33 = vld [vmem:[#allocation28_spill] sm:$0xff] }
 0x6c3   :  { %3405 = vmatpush1.bf16.msra.mxu0 %v8167_v19  ;;  %3446 = vmatpush1.bf16.msra.mxu1 %v8168_v8  ;;  %v8184_v19 = vld [vmem:[#allocation29_spill] sm:$0xff]  ;;  %v8185_v8 = vld [vmem:[#allocation30_spill] sm:$0xff] }
 0x6c4   :  { %3406 = vmatprep.subr.bf16.mxu0 %v8169_v2  ;;  %3447 = vmatprep.subr.bf16.mxu1 %v8170_v40  ;;  %v8186_v2 = vld [vmem:[#allocation31_spill] sm:$0xff] }
 0x6c7   :  { %3407 = vmatpush1.bf16.msra.mxu0 %v8171_v30  ;;  %3448 = vmatpush1.bf16.msra.mxu1 %v8172_v22 }
 0x6c8   :  { %3408 = vmatprep.subr.bf16.mxu0 %v8173_v24  ;;  %3449 = vmatprep.subr.bf16.mxu1 %v8174_v3 }
 0x6cb   :  { %3409 = vmatpush1.bf16.msra.mxu0 %v8175_v47  ;;  %3450 = vmatpush1.bf16.msra.mxu1 %v8176_v55 }
 0x6cc   :  { %3410 = vmatprep.subr.bf16.mxu0 %v8177_v16  ;;  %3451 = vmatprep.subr.bf16.mxu1 %v8178_v29 }
 0x6cf   :  { %3411 = vmatpush1.bf16.msra.mxu0 %v8179_v21  ;;  %3452 = vmatpush1.bf16.msra.mxu1 %v8180_v10 }
 0x6d0   :  { %3412 = vmatprep.subr.bf16.mxu0 %v8181_v0  ;;  %3453 = vmatprep.subr.bf16.mxu1 %v8182_v59 }
 0x6d3   :  { %3413 = vmatpush1.bf16.msra.mxu0 %v8183_v33  ;;  %3454 = vmatpush1.bf16.msra.mxu1 %v8184_v19 }
 0x6d4   :  { %3560 = vmatprep.subr.bf16.mxu0 %v8185_v8  ;;  %3601 = vmatprep.subr.bf16.mxu1 %v8186_v2 }
 0x760   :  { %v3094_v40 = vpop.f32.mrb[56].mxu0  ;;  %v3135_v30 = vpop.f32.mrb[56].mxu1 }
 0x761   :  { %v3146_v22 = vrot.slane %v3094_v40, 2  ;;  %v3150_v24 = vrot.slane %v3094_v40, 3  ;;  %v3096_v3 = vpop.f32.mrb[57].mxu0  ;;  %v3137_v47 = vpop.f32.mrb[57].mxu1  ;;  %v3148_v59 = vrot.slane %v3135_v30, 2  ;;  %v3152_v8 = vrot.slane %v3135_v30, 3 }
 0x762   :  { %v3147_v55 = vrot.slane %v3096_v3, 2  ;;  %v3151_v16 = vrot.slane %v3096_v3, 3  ;;  %v3098_v29 = vpop.f32.mrb[58].mxu0  ;;  %v3139_v21 = vpop.f32.mrb[58].mxu1  ;;  %v8187_v30 = vld [vmem:[#allocation52_spill] sm:$0xff] }
 0x763   :  { %v3162_v10 = vadd.f32 %v3146_v22, %v8109_v38  ;;  %v3166_v0 = vadd.f32 %v3150_v24, %v8110_v42  ;;  %v3099_v33 = vpop.f32.mrb[59].mxu0  ;;  %v3140_v19 = vpop.f32.mrb[59].mxu1  ;;  %v3164_v3 = vadd.f32 %v3148_v59, %v8113_v1  ;;  %v3168_v22 = vadd.f32 %v3152_v8, %v8114_v44  ;;  %v8188_v21 = vld [vmem:[#allocation53_spill] sm:$0xff] }
 0x764   :  { %v3163_v2 = vadd.f32 %v3147_v55, %v8111_v9  ;;  %v3167_v61 = vadd.f32 %v3151_v16, %v8112_v17  ;;  %v3149_v29 = vrot.slane %v3137_v47, 2  ;;  %v3153_v24 = vrot.slane %v3137_v47, 3 }
 0x765   :  { %v3170_v12 = vmul.f32 0.5, %v3162_v10  ;;  %v3171_v40 = vmul.f32 0.5, %v3166_v0 }
 0x766   :  { %v3178_v49 = vmul.f32 0.5, %v3163_v2  ;;  %v3179_v39 = vmul.f32 0.5, %v3167_v61  ;;  %v3165_v55 = vadd.f32 %v3149_v29, %v8187_v30  ;;  %v3169_v16 = vadd.f32 %v3153_v24, %v8188_v21  ;;  %v8189_v29 = vld [vmem:[#allocation32_spill] sm:$0xff]  ;;  %v8190_v21 = vld [vmem:[#allocation33_spill] sm:$0xff] }
 0x767   :  { %5120 = vtanh.f32 %v3170_v12  ;;  %v3198_v30 = vrot.slane %v8189_v29, 7 }
 0x768   :  { %5122 = vtanh.f32 %v3171_v40  ;;  %v3188_v10 = vmul.f32 0.5, %v3165_v55  ;;  %v3189_v33 = vmul.f32 0.5, %v3169_v16  ;;  %v3199_v16 = vrot.slane %v8190_v21, 7 }
 0x769   :  { %5124 = vtanh.f32 %v3178_v49 }
 0x76a   :  { %5126 = vtanh.f32 %v3179_v39 }
 0x76b   :  { %5128 = vtanh.f32 %v3164_v3 }
 0x76c   :  { %5130 = vtanh.f32 %v3168_v22 }
 0x76d   :  { %5132 = vtanh.f32 %v3188_v10 }
 0x76e   :  { %5134 = vtanh.f32 %v3189_v33 }
 0x771   :  { %v5121_v0 = vpop.eup %5120 }
 0x772   :  { %v5123_v61 = vpop.eup %5122  ;;  %v3174_v12 = vadd.f32 1.0, %v5121_v0 }
 0x773   :  { %v5125_v19 = vpop.eup %5124  ;;  %v3175_v59 = vadd.f32 1.0, %v5123_v61 }
 0x774   :  { %v5127_v2 = vpop.eup %5126  ;;  %v3176_v40 = vmul.f32 0.5, %v3174_v12  ;;  %v3182_v8 = vadd.f32 1.0, %v5125_v19 }
 0x775   :  { %v5129_v49 = vpop.eup %5128  ;;  %v3177_v47 = vmul.f32 0.5, %v3175_v59  ;;  %v3183_v39 = vadd.f32 1.0, %v5127_v2 }
 0x776   :  { %v5131_v3 = vpop.eup %5130  ;;  %v3184_v22 = vmul.f32 0.5, %v3182_v8  ;;  %v3204_v24 = vmul.f32 %v5129_v49, %v3176_v40 }
 0x777   :  { %v3185_v55 = vmul.f32 0.5, %v3183_v39  ;;  %v3205_v44 = vmul.f32 %v5131_v3, %v3177_v47  ;;  %v5133_v10 = vpop.eup %5132 }
 0x778   :  { %v3202_v0 = vmul.f32 %v3198_v30, %v3184_v22  ;;  %v5135_v33 = vpop.eup %5134  ;;  %v3192_v19 = vadd.f32 1.0, %v5133_v10 }
 0x779   :  { %v3203_v1 = vmul.f32 %v3199_v16, %v3185_v55  ;;  %v3193_v59 = vadd.f32 1.0, %v5135_v33 }
 0x77a   :  { %v7404_v61 = vadd.f32 %v3204_v24, %v3202_v0  ;;  %v3194_v2 = vmul.f32 0.5, %v3192_v19 }
 0x77b   :  { %v7406_v12 = vadd.f32 %v3205_v44, %v3203_v1  ;;  %v3195_v8 = vmul.f32 0.5, %v3193_v59 }
 0x77c   :  { %5136 = vtanh.f32 %v7404_v61 }
 0x77d   :  { %8191 = vst [vmem:[#allocation34_spill] sm:$0xff] %v7406_v12  ;;  %5138 = vtanh.f32 %v7406_v12 }
 0x786   :  { %v5137_v40 = vpop.eup %5136 }
 0x787   :  { %v5139_v49 = vpop.eup %5138  ;;  %v3210_v21 = vmul.f32 %v5137_v40, %v3194_v2 }
 0x788   :  { %v3211_v47 = vmul.f32 %v5139_v49, %v3195_v8 }
 0x789   :  { %v3257_v30 = vpop.f32.mrb[60].mxu0  ;;  %v3298_v39 = vpop.f32.mrb[60].mxu1  ;;  %v3373_v3 = vrot.slane %v3210_v21, 6  ;;  %v3387_v22 = vpack.c.bf16 %v3210_v21, %v3210_v21 }
 0x78a   :  { %v3309_v1 = vrot.slane %v3257_v30, 7  ;;  %v3325_v44 = vadd.f32 %v3257_v30, %v6141_v31  ;;  %v3259_v29 = vpop.f32.mrb[61].mxu0  ;;  %v3300_v24 = vpop.f32.mrb[61].mxu1  ;;  %v3374_v55 = vrot.slane %v3211_v47, 6  ;;  %v3388_v16 = vpack.c.bf16 %v3211_v47, %v3211_v47 }
 0x78b   :  { %v3311_v0 = vrot.slane %v3298_v39, 7  ;;  %v3327_v10 = vadd.f32 %v3298_v39, %v6156_v11  ;;  %v3261_v33 = vpop.f32.mrb[62].mxu0  ;;  %v3302_v19 = vpop.f32.mrb[62].mxu1  ;;  %3377 = vst [vmem:[#allocation2 + $0x6] sm:$0x1] %v3373_v3  ;;  %v3391_v59 = vunpack.c.l.b16 %v3387_v22  ;;  %v3310_v8 = vrot.slane %v3259_v29, 7 }
 0x78c   :  { %v3321_v2 = vadd.f32 %v3309_v1, %v6135_v27  ;;  %v3330_v40 = vmul.f32 0.5, %v3325_v44  ;;  %v3262_v49 = vpop.f32.mrb[63].mxu0  ;;  %v3303_v21 = vpop.f32.mrb[63].mxu1  ;;  %3378 = vst [vmem:[#allocation2 + $0x16] sm:$0x1] %v3374_v55  ;;  %v3392_v12 = vunpack.c.l.b16 %v3388_v16  ;;  %v3326_v30 = vadd.f32 %v3259_v29, %v6144_v26 }
 0x78d   :  { %v3322_v47 = vadd.f32 %v3310_v8, %v6138_v28  ;;  %v3393_v33 = vrot.slane %v3391_v59, 6  ;;  %v3323_v3 = vadd.f32 %v3311_v0, %v6147_v32  ;;  %v3312_v44 = vrot.slane %v3300_v24, 7 }
 0x78e   :  { %v3329_v31 = vmul.f32 0.5, %v3321_v2  ;;  %5140 = vtanh.f32 %v3330_v40  ;;  %v3338_v39 = vmul.f32 0.5, %v3326_v30  ;;  %v3394_v1 = vrot.slane %v3392_v12, 5 }
 0x78f   :  { %5142 = vtanh.f32 %v3327_v10  ;;  %v3337_v22 = vmul.f32 0.5, %v3322_v47  ;;  %v3328_v29 = vadd.f32 %v3300_v24, %v6164_v18  ;;  %v3324_v19 = vadd.f32 %v3312_v44, %v6161_v37  ;;  %v4832_v44 = vld [vmem:[%s7694_s7 + $0x40] sm:$0xff]  }
 0x790   :  { %5144 = vtanh.f32 %v3329_v31  ;;  %v3395_v55 = vsel %vm1351_vm0, %v3394_v1, %v3393_v33  ;;  %v8194_v33 = vld [vmem:[#allocation38_spill] sm:$0xff] }
 0x791   :  { %5146 = vtanh.f32 %v3338_v39  ;;  %v3396_v16 = vpack.c.b16 %v3395_v55, %v3395_v55  ;;  %v3348_v12 = vmul.f32 0.5, %v3328_v29  ;;  %v3347_v10 = vmul.f32 0.5, %v3324_v19  ;;  %v4833_v55 = vld [vmem:[%s7694_s7] sm:$0xff]   ;;  %v4836_v19 = vld [vmem:[%s7694_s7 + $0x8] sm:$0xff]  }
 0x792   :  { %5148 = vtanh.f32 %v3337_v22  ;;  %v4835_v29 = vld [vmem:[%s7695_s5 + $0x40] sm:$0xff]  }
 0x793   :  { %5150 = vtanh.f32 %v3323_v3  ;;  %3431 = vmatmul.mubr.bf16.vlgmr.msra.gmra.mrb[64].mxu0 %v3396_v16  ;;  %3472 = vmatmul.mubr.bf16.vlgmr.msra.gmra.mrb[64].mxu1 %v3396_v16  ;;  %v4834_v16 = vld [vmem:[%s7694_s7 + $0x48] sm:$0xff]  }
 0x794   :  { %3561 = vmatpush1.bf16.msra.mxu0 %v7264_v14  ;;  %3602 = vmatpush1.bf16.msra.mxu1 %v7270_v48  ;;  %5152 = vtanh.f32 %v3348_v12  ;;  %v4838_v12 = vld [vmem:[%s7694_s7 + $0x50] sm:$0xff]  }
 0x795   :  { %3562 = vmatprep.subr.bf16.mxu0 %v7277_v63  ;;  %3603 = vmatprep.subr.bf16.mxu1 %v7283_v45  ;;  %5154 = vtanh.f32 %v3347_v10  ;;  %v4841_v10 = vld [vmem:[%s7695_s5 + $0x8] sm:$0xff]  }
 0x796   :  { %3592 = vmatprep.mubr.bf16.mxu0 %v7934_v62  ;;  %3633 = vmatprep.mubr.bf16.mxu1 %v7934_v62 }
 0x798   :  { %v5141_v31 = vpop.eup %5140  ;;  %3563 = vmatpush1.bf16.msra.mxu0 %v7291_v41  ;;  %3604 = vmatpush1.bf16.msra.mxu1 %v7297_v51  ;;  %v3358_v41 = vrot.slane %v7324_v34, 1 }
 0x799   :  { %v5143_v0 = vpop.eup %5142  ;;  %v3334_v24 = vadd.f32 1.0, %v5141_v31  ;;  %3564 = vmatprep.subr.bf16.mxu0 %v7303_v60  ;;  %3605 = vmatprep.subr.bf16.mxu1 %v7309_v58  ;;  %v3357_v60 = vrot.slane %v7322_v6, 1  ;;  %v4837_v31 = vld [vmem:[%s7695_s5] sm:$0xff]  }
 0x79a   :  { %v5145_v59 = vpop.eup %5144 }
 0x79b   :  { %v5147_v14 = vpop.eup %5146  ;;  %v3333_v48 = vadd.f32 1.0, %v5145_v59  ;;  %v3336_v2 = vmul.f32 0.5, %v3334_v24  ;;  %v4840_v24 = vld [vmem:[%s7694_s7 + $0x10] sm:$0xff]   ;;  %v4842_v59 = vld [vmem:[%s7694_s7 + $0x58] sm:$0xff]  }
 0x79c   :  { %v5149_v63 = vpop.eup %5148  ;;  %v3342_v45 = vadd.f32 1.0, %v5147_v14  ;;  %3565 = vmatpush1.bf16.msra.mxu0 %v6908_v13  ;;  %3606 = vmatpush1.bf16.msra.mxu1 %v6914_v57  ;;  %v4843_v14 = vld [vmem:[%s7695_s5 + $0x50] sm:$0xff]  }
 0x79d   :  { %v3335_v40 = vmul.f32 0.5, %v3333_v48  ;;  %v3341_v62 = vadd.f32 1.0, %v5149_v63  ;;  %v3364_v8 = vmul.f32 %v5143_v0, %v3336_v2  ;;  %v5151_v49 = vpop.eup %5150  ;;  %3566 = vmatprep.subr.bf16.mxu0 %v6921_v15  ;;  %3607 = vmatprep.subr.bf16.mxu1 %v6927_v35  ;;  %v4839_v0 = vld [vmem:[%s7695_s5 + $0x48] sm:$0xff]   ;;  %v4844_v48 = vld [vmem:[%s7694_s7 + $0x18] sm:$0xff]   ;;  %v4845_v2 = vld [vmem:[%s7695_s5 + $0x10] sm:$0xff]  }
 0x79e   :  { %v3344_v21 = vmul.f32 0.5, %v3342_v45  ;;  %v5153_v13 = vpop.eup %5152  ;;  %v4846_v63 = vld [vmem:[%s7694_s7 + $0x60] sm:$0xff]   ;;  %v4847_v45 = vld [vmem:[%s7695_s5 + $0x58] sm:$0xff]  }
 0x79f   :  { %v3343_v51 = vmul.f32 0.5, %v3341_v62  ;;  %v3363_v30 = vmul.f32 %v5151_v49, %v3335_v40  ;;  %v5155_v57 = vpop.eup %5154  ;;  %v3352_v15 = vadd.f32 1.0, %v5153_v13  ;;  %v4848_v40 = vld [vmem:[%s7694_s7 + $0x20] sm:$0xff]   ;;  %v4849_v62 = vld [vmem:[%s7695_s5 + $0x18] sm:$0xff]   ;;  %v4859_v13 = vld [vmem:[%s7695_s5 + $0x70] sm:$0xff]  }
 0x7a0   :  { %v3362_v58 = vmul.f32 %v3358_v41, %v3344_v21  ;;  %3567 = vmatpush1.bf16.msra.mxu0 %v6934_v4  ;;  %3608 = vmatpush1.bf16.msra.mxu1 %v6940_v43  ;;  %v3351_v35 = vadd.f32 1.0, %v5155_v57  ;;  %v4851_v49 = vld [vmem:[%s7695_s5 + $0x60] sm:$0xff]   ;;  %v4852_v21 = vld [vmem:[%s7694_s7 + $0x28] sm:$0xff]   ;;  %v4860_v57 = vld [vmem:[%s7694_s7 + $0x38] sm:$0xff]  }
 0x7a1   :  { %v3361_v47 = vmul.f32 %v3357_v60, %v3343_v51  ;;  %3568 = vmatprep.subr.bf16.mxu0 %v6948_v5  ;;  %3609 = vmatprep.subr.bf16.mxu1 %v6954_v20  ;;  %v3354_v4 = vmul.f32 0.5, %v3352_v15  ;;  %v4853_v41 = vld [vmem:[%s7695_s5 + $0x20] sm:$0xff]   ;;  %v4854_v51 = vld [vmem:[%s7694_s7 + $0x70] sm:$0xff]   ;;  %v4855_v60 = vld [vmem:[%s7695_s5 + $0x68] sm:$0xff]  }
 0x7a2   :  { %v7435_v39 = vadd.f32 %v3364_v8, %v3362_v58  ;;  %v3353_v5 = vmul.f32 0.5, %v3351_v35  ;;  %v4850_v8 = vld [vmem:[%s7694_s7 + $0x68] sm:$0xff]   ;;  %v4861_v15 = vld [vmem:[%s7695_s5 + $0x30] sm:$0xff]   ;;  %v4862_v35 = vld [vmem:[%s7695_s5 + $0x78] sm:$0xff]  }
 0x7a3   :  { %v7439_v34 = vadd.f32 %v3363_v30, %v3361_v47  ;;  %v4856_v30 = vld [vmem:[%s7694_s7 + $0x30] sm:$0xff]   ;;  %v4857_v58 = vld [vmem:[%s7695_s5 + $0x28] sm:$0xff]   ;;  %v4858_v47 = vld [vmem:[%s7694_s7 + $0x78] sm:$0xff]  }
 0x7a4   :  { %5156 = vtanh.f32 %v7435_v39  ;;  %3569 = vmatpush1.bf16.msra.mxu0 %v6964_v46  ;;  %3610 = vmatpush1.bf16.msra.mxu1 %v6970_v53  ;;  %v8192_v53 = vld [vmem:[#allocation36_spill] sm:$0xff] }
 0x7a5   :  { %5158 = vtanh.f32 %v7439_v34  ;;  %3570 = vmatprep.subr.bf16.mxu0 %v6976_v54  ;;  %3611 = vmatprep.subr.bf16.mxu1 %v6982_v56  ;;  %v8193_v54 = vld [vmem:[#allocation37_spill] sm:$0xff] }
 0x7a8   :  { %3571 = vmatpush1.bf16.msra.mxu0 %v6988_v7  ;;  %3612 = vmatpush1.bf16.msra.mxu1 %v7336_v23 }
 0x7a9   :  { %3572 = vmatprep.subr.bf16.mxu0 %v7342_v52  ;;  %3613 = vmatprep.subr.bf16.mxu1 %v7348_v50  ;;  %v8195_v50 = vld [vmem:[#allocation39_spill] sm:$0xff] }
 0x7ac   :  { %3573 = vmatpush1.bf16.msra.mxu0 %v6997_v25  ;;  %3614 = vmatpush1.bf16.msra.mxu1 %v7003_v36 }
 0x7ad   :  { %3574 = vmatprep.subr.bf16.mxu0 %v8192_v53  ;;  %3615 = vmatprep.subr.bf16.mxu1 %v8193_v54 }
 0x7ae   :  { %v5157_v43 = vpop.eup %5156 }
 0x7af   :  { %v5159_v20 = vpop.eup %5158  ;;  %v3370_v46 = vmul.f32 %v5157_v43, %v3354_v4  ;;  %v4863_v4 = vld [vmem:[%s7695_s5 + $0x38] sm:$0xff]  }
 0x7b0   :  { %v3369_v56 = vmul.f32 %v5159_v20, %v3353_v5  ;;  %3575 = vmatpush1.bf16.msra.mxu0 %v8194_v33  ;;  %3616 = vmatpush1.bf16.msra.mxu1 %v8195_v50 }
 0x7b1   :  { %v3382_v7 = vrot.slane %v3370_v46, 1  ;;  %v3551_v52 = vpack.c.bf16 %v3370_v46, %v3370_v46  ;;  %4687 = vmatprep.subr.bf16.mxu1 %v4832_v44  ;;  %4665 = vmatprep.subr.bf16.mxu0 %v4835_v29 }
 0x7b2   :  { %v3381_v6 = vrot.slane %v3369_v56, 1  ;;  %v3550_v23 = vpack.c.bf16 %v3369_v56, %v3369_v56 }
 0x7b3   :  { %3386 = vst [vmem:[#allocation2 + $0x19] sm:$0x1] %v3382_v7  ;;  %v3555_v3 = vunpack.c.l.b16 %v3551_v52 }
 0x7b4   :  { %3385 = vst [vmem:[#allocation2 + $0x9] sm:$0x1] %v3381_v6  ;;  %v3554_v25 = vunpack.c.l.b16 %v3550_v23 }
 0x7b6   :  { %v3556_v36 = vrot.slane %v3554_v25, 1 }
 0x7b8   :  { %v3557_v22 = vsel %vm1351_vm0, %v3555_v3, %v3556_v36 }
 0x7b9   :  { %v3558_v1 = vpack.c.b16 %v3557_v22, %v3557_v22 }
 0x7bb   :  { %3593 = vmatmul.mubr.bf16.vlgmr.msra.gmra.mrb[68].mxu0 %v3558_v1  ;;  %3634 = vmatmul.mubr.bf16.vlgmr.msra.gmra.mrb[68].mxu1 %v3558_v1 }
 0x7bc   :  { %4688 = vmatpush3.bf16.msra.mxu1 %v4833_v55  ;;  %4666 = vmatpush3.bf16.msra.mxu0 %v4837_v31 }
 0x7bd   :  { %4689 = vmatprep.subr.bf16.mxu1 %v4834_v16  ;;  %4667 = vmatprep.subr.bf16.mxu0 %v4839_v0 }
 0x7c0   :  { %4690 = vmatpush3.bf16.msra.mxu1 %v4836_v19  ;;  %4668 = vmatpush3.bf16.msra.mxu0 %v4841_v10  ;;  %v8196_v19 = vld [vmem:[#allocation48_spill] sm:$0xff]  ;;  %v8199_v10 = vld [vmem:[#allocation53_spill] sm:$0xff] }
 0x7c1   :  { %4691 = vmatprep.subr.bf16.mxu1 %v4838_v12  ;;  %4669 = vmatprep.subr.bf16.mxu0 %v4843_v14  ;;  %v8197_v12 = vld [vmem:[#allocation51_spill] sm:$0xff] }
 0x7c4   :  { %4692 = vmatpush3.bf16.msra.mxu1 %v4840_v24  ;;  %4670 = vmatpush3.bf16.msra.mxu0 %v4845_v2  ;;  %v8198_v24 = vld [vmem:[#allocation52_spill] sm:$0xff] }
 0x7c5   :  { %4693 = vmatprep.subr.bf16.mxu1 %v4842_v59  ;;  %4671 = vmatprep.subr.bf16.mxu0 %v4847_v45 }
 0x7c8   :  { %4694 = vmatpush3.bf16.msra.mxu1 %v4844_v48  ;;  %4672 = vmatpush3.bf16.msra.mxu0 %v4849_v62 }
 0x7c9   :  { %4695 = vmatprep.subr.bf16.mxu1 %v4846_v63  ;;  %4673 = vmatprep.subr.bf16.mxu0 %v4851_v49 }
 0x7cc   :  { %4696 = vmatpush3.bf16.msra.mxu1 %v4848_v40  ;;  %4674 = vmatpush3.bf16.msra.mxu0 %v4853_v41 }
 0x7cd   :  { %4697 = vmatprep.subr.bf16.mxu1 %v4850_v8  ;;  %4675 = vmatprep.subr.bf16.mxu0 %v4855_v60 }
 0x7d0   :  { %4698 = vmatpush3.bf16.msra.mxu1 %v4852_v21  ;;  %4676 = vmatpush3.bf16.msra.mxu0 %v4857_v58  ;;  %v3536_v58 = vrot.slane %v7404_v61, 7 }
 0x7d1   :  { %4699 = vmatprep.subr.bf16.mxu1 %v4854_v51  ;;  %4677 = vmatprep.subr.bf16.mxu0 %v4859_v13 }
 0x7d4   :  { %4700 = vmatpush3.bf16.msra.mxu1 %v4856_v30  ;;  %4678 = vmatpush3.bf16.msra.mxu0 %v4861_v15 }
 0x7d5   :  { %4701 = vmatprep.subr.bf16.mxu1 %v4858_v47  ;;  %4679 = vmatprep.subr.bf16.mxu0 %v4862_v35 }
 0x7d8   :  { %4702 = vmatpush3.bf16.msra.mxu1 %v4860_v57  ;;  %4680 = vmatpush3.bf16.msra.mxu0 %v4863_v4  ;;  %v8200_v57 = vld [vmem:[#allocation34_spill] sm:$0xff] }
 0x7d9   :  { %v3537_v15 = vrot.slane %v8200_v57, 7  ;;  %v3695_v57 = vrot.slane %v7435_v39, 1 }
 0x866   :  { %v3432_v43 = vpop.f32.mrb[64].mxu0  ;;  %v3473_v5 = vpop.f32.mrb[64].mxu1 }
 0x867   :  { %v3484_v20 = vrot.slane %v3432_v43, 1  ;;  %v3488_v46 = vrot.slane %v3432_v43, 2  ;;  %v3434_v53 = vpop.f32.mrb[65].mxu0  ;;  %v3475_v54 = vpop.f32.mrb[65].mxu1  ;;  %v3486_v50 = vrot.slane %v3473_v5, 1  ;;  %v3490_v36 = vrot.slane %v3473_v5, 2 }
 0x868   :  { %v3485_v56 = vrot.slane %v3434_v53, 1  ;;  %v3489_v7 = vrot.slane %v3434_v53, 2  ;;  %v3436_v6 = vpop.f32.mrb[66].mxu0  ;;  %v3477_v23 = vpop.f32.mrb[66].mxu1  ;;  %v3487_v0 = vrot.slane %v3475_v54, 1 }
 0x869   :  { %v3500_v52 = vadd.f32 %v3484_v20, %v8109_v38  ;;  %v3504_v33 = vadd.f32 %v3488_v46, %v8110_v42  ;;  %v3437_v25 = vpop.f32.mrb[67].mxu0  ;;  %v3478_v3 = vpop.f32.mrb[67].mxu1  ;;  %v3502_v31 = vadd.f32 %v3486_v50, %v8196_v19  ;;  %v3506_v38 = vadd.f32 %v3490_v36, %v8197_v12 }
 0x86a   :  { %v3501_v22 = vadd.f32 %v3485_v56, %v8111_v9  ;;  %v3505_v1 = vadd.f32 %v3489_v7, %v8112_v17  ;;  %v3491_v42 = vrot.slane %v3475_v54, 2  ;;  %v3503_v9 = vadd.f32 %v3487_v0, %v8198_v24 }
 0x86b   :  { %v3508_v44 = vmul.f32 0.5, %v3500_v52  ;;  %v3509_v55 = vmul.f32 0.5, %v3504_v33 }
 0x86c   :  { %v3516_v16 = vmul.f32 0.5, %v3501_v22  ;;  %v3517_v29 = vmul.f32 0.5, %v3505_v1  ;;  %v3507_v17 = vadd.f32 %v3491_v42, %v8199_v10  ;;  %v3526_v59 = vmul.f32 0.5, %v3503_v9 }
 0x86d   :  { %5160 = vtanh.f32 %v3508_v44 }
 0x86e   :  { %5162 = vtanh.f32 %v3509_v55  ;;  %v3527_v40 = vmul.f32 0.5, %v3507_v17 }
 0x86f   :  { %5164 = vtanh.f32 %v3516_v16 }
 0x870   :  { %5166 = vtanh.f32 %v3517_v29 }
 0x871   :  { %5168 = vtanh.f32 %v3502_v31  ;;  %v8201_v31 = vld [vmem:[#allocation56_spill] sm:$0xff] }
 0x872   :  { %5170 = vtanh.f32 %v3506_v38 }
 0x873   :  { %5172 = vtanh.f32 %v3526_v59 }
 0x874   :  { %5174 = vtanh.f32 %v3527_v40 }
 0x877   :  { %v5161_v14 = vpop.eup %5160 }
 0x878   :  { %v5163_v48 = vpop.eup %5162  ;;  %v3512_v2 = vadd.f32 1.0, %v5161_v14 }
 0x879   :  { %v5165_v63 = vpop.eup %5164  ;;  %v3513_v45 = vadd.f32 1.0, %v5163_v48 }
 0x87a   :  { %v5167_v62 = vpop.eup %5166  ;;  %v3514_v8 = vmul.f32 0.5, %v3512_v2  ;;  %v3520_v49 = vadd.f32 1.0, %v5165_v63 }
 0x87b   :  { %v5169_v21 = vpop.eup %5168  ;;  %v3515_v41 = vmul.f32 0.5, %v3513_v45  ;;  %v3521_v51 = vadd.f32 1.0, %v5167_v62 }
 0x87c   :  { %v5171_v60 = vpop.eup %5170  ;;  %v3522_v30 = vmul.f32 0.5, %v3520_v49  ;;  %v3542_v47 = vmul.f32 %v5169_v21, %v3514_v8 }
 0x87d   :  { %v3523_v13 = vmul.f32 0.5, %v3521_v51  ;;  %v3543_v35 = vmul.f32 %v5171_v60, %v3515_v41  ;;  %v5173_v46 = vpop.eup %5172 }
 0x87e   :  { %v3540_v4 = vmul.f32 %v3536_v58, %v3522_v30  ;;  %v5175_v53 = vpop.eup %5174  ;;  %v3530_v54 = vadd.f32 1.0, %v5173_v46 }
 0x87f   :  { %v3541_v43 = vmul.f32 %v3537_v15, %v3523_v13  ;;  %v3531_v56 = vadd.f32 1.0, %v5175_v53 }
 0x880   :  { %v3544_v5 = vadd.f32 %v3542_v47, %v3540_v4  ;;  %v3532_v7 = vmul.f32 0.5, %v3530_v54 }
 0x881   :  { %v3545_v20 = vadd.f32 %v3543_v35, %v3541_v43  ;;  %v3533_v22 = vmul.f32 0.5, %v3531_v56 }
 0x882   :  { %5176 = vtanh.f32 %v3544_v5 }
 0x883   :  { %5178 = vtanh.f32 %v3545_v20 }
 0x88c   :  { %v5177_v6 = vpop.eup %5176 }
 0x88d   :  { %v7566_v52 = vmul.f32 %v5177_v6, %v3532_v7  ;;  %v5179_v36 = vpop.eup %5178 }
 0x88e   :  { %v3594_v23 = vpop.f32.mrb[68].mxu0  ;;  %v3635_v61 = vpop.f32.mrb[68].mxu1  ;;  %v3549_v10 = vmul.f32 %v5179_v36, %v3533_v22 }
 0x88f   :  { %v3646_v33 = vrot.slane %v3594_v23, 1  ;;  %v3658_v50 = vadd.f32 %v3594_v23, %v6135_v27  ;;  %v3596_v25 = vpop.f32.mrb[69].mxu0  ;;  %v3637_v3 = vpop.f32.mrb[69].mxu1  ;;  %v3660_v1 = vadd.f32 %v3635_v61, %v6147_v32  ;;  %v3710_v19 = vrot.slane %v7566_v52, 7 }
 0x890   :  { %v3647_v44 = vrot.slane %v3596_v25, 1  ;;  %v3659_v55 = vadd.f32 %v3596_v25, %v6138_v28  ;;  %v3598_v16 = vpop.f32.mrb[70].mxu0  ;;  %v3639_v29 = vpop.f32.mrb[70].mxu1  ;;  %v3648_v0 = vrot.slane %v3635_v61, 1  ;;  %v3711_v59 = vrot.slane %v3549_v10, 7 }
 0x891   :  { %v3662_v12 = vadd.f32 %v3646_v33, %v8201_v31  ;;  %v3666_v38 = vmul.f32 0.5, %v3658_v50  ;;  %v3599_v42 = vpop.f32.mrb[71].mxu0  ;;  %v3640_v24 = vpop.f32.mrb[71].mxu1  ;;  %3714 = vst [vmem:[#allocation2 + $0x7] sm:$0x1] %v3710_v19  ;;  %v3649_v14 = vrot.slane %v3637_v3, 1 }
 0x892   :  { %v3663_v27 = vadd.f32 %v3647_v44, %v6144_v26  ;;  %v3674_v9 = vmul.f32 0.5, %v3659_v55  ;;  %v3664_v17 = vadd.f32 %v3648_v0, %v6156_v11  ;;  %3715 = vst [vmem:[#allocation2 + $0x17] sm:$0x1] %v3711_v59  ;;  %v3661_v26 = vadd.f32 %v3637_v3, %v6161_v37  ;;  %v8202_v24 = vld [vmem:[#allocation43_spill] sm:$0xff] }
 0x893   :  { %v3667_v32 = vmul.f32 0.5, %v3662_v12  ;;  %5180 = vtanh.f32 %v3666_v38  ;;  %v3665_v48 = vadd.f32 %v3649_v14, %v6164_v18  ;;  %v3694_v18 = vrot.slane %v7439_v34, 1  ;;  %v4626_v38 = vld [vmem:[%s7696_s8] ss:$0 sm:$0xff] }
 0x894   :  { %5182 = vtanh.f32 %v3660_v1  ;;  %v3675_v28 = vmul.f32 0.5, %v3663_v27  ;;  %v3684_v63 = vmul.f32 0.5, %v3661_v26  ;;  %v5339_v29 = vmov 1966171168  }
 0x895   :  { %5184 = vtanh.f32 %v3667_v32  ;;  %v3685_v62 = vmul.f32 0.5, %v3665_v48 }
 0x896   :  { %5186 = vtanh.f32 %v3674_v9 }
 0x897   :  { %5188 = vtanh.f32 %v3675_v28 }
 0x898   :  { %5190 = vtanh.f32 %v3664_v17  ;;  %v7583_v22 = vld [vmem:[#allocation2] sm:$0xff] }
 0x899   :  { %5192 = vtanh.f32 %v3684_v63  ;;  %v7585_v1 = vld [vmem:[#allocation2 + $0x10] sm:$0xff] }
 0x89a   :  { %5194 = vtanh.f32 %v3685_v62  ;;  %v3722_v52 = vpack.c.bf16 %v7585_v1, %v7583_v22 }
 0x89d   :  { %v5181_v2 = vpop.eup %5180 }
 0x89e   :  { %v5183_v45 = vpop.eup %5182  ;;  %v3670_v40 = vadd.f32 1.0, %v5181_v2 }
 0x89f   :  { %v5185_v8 = vpop.eup %5184 }
 0x8a0   :  { %v5187_v49 = vpop.eup %5186  ;;  %v3671_v21 = vadd.f32 1.0, %v5185_v8  ;;  %v3672_v41 = vmul.f32 0.5, %v3670_v40  ;;  %v8203_v8 = vld [vmem:[#allocation44_spill] sm:$0xff] }
 0x8a1   :  { %v5189_v11 = vpop.eup %5188  ;;  %v3678_v51 = vadd.f32 1.0, %v5187_v49 }
 0x8a2   :  { %v3673_v60 = vmul.f32 0.5, %v3671_v21  ;;  %v3679_v30 = vadd.f32 1.0, %v5189_v11  ;;  %v3700_v58 = vmul.f32 %v5183_v45, %v3672_v41  ;;  %v5191_v47 = vpop.eup %5190 }
 0x8a3   :  { %v3680_v37 = vmul.f32 0.5, %v3678_v51  ;;  %v5193_v20 = vpop.eup %5192 }
 0x8a4   :  { %v3681_v13 = vmul.f32 0.5, %v3679_v30  ;;  %v3701_v15 = vmul.f32 %v5191_v47, %v3673_v60  ;;  %v5195_v46 = vpop.eup %5194  ;;  %v3688_v53 = vadd.f32 1.0, %v5193_v20  ;;  %v4643_v30 = vld [vmem:[%s7698_s9] ss:$0 sm:$0xff] }
 0x8a5   :  { %v3698_v35 = vmul.f32 %v3694_v18, %v3680_v37  ;;  %v3689_v54 = vadd.f32 1.0, %v5195_v46 }
 0x8a6   :  { %v3699_v4 = vmul.f32 %v3695_v57, %v3681_v13  ;;  %v3690_v56 = vmul.f32 0.5, %v3688_v53  ;;  %v8204_v13 = vlaneseq }
 0x8a7   :  { %v3702_v43 = vadd.f32 %v3700_v58, %v3698_v35  ;;  %v3691_v6 = vmul.f32 0.5, %v3689_v54 }
 0x8a8   :  { %v3703_v5 = vadd.f32 %v3701_v15, %v3699_v4  ;;  %v4139_v57 = vand.u32 127, %v8204_v13 }
 0x8a9   :  { %5196 = vtanh.f32 %v3702_v43 }
 0x8aa   :  { %5198 = vtanh.f32 %v3703_v5  ;;  %v4142_v35 = vsub.s32 %v4139_v57, %v8202_v24 }
 0x8b3   :  { %v5197_v7 = vpop.eup %5196 }
 0x8b4   :  { %v5199_v23 = vpop.eup %5198  ;;  %v3706_v61 = vmul.f32 %v5197_v7, %v3690_v56  ;;  %v8205_v56 = vld [vmem:[#allocation45_spill] sm:$0xff] }
 0x8b5   :  { %v3707_v34 = vmul.f32 %v5199_v23, %v3691_v6 }
 0x8b6   :  { %3716 = vst [vmem:[#allocation2 + $0x8] sm:$0x1] %v3706_v61  ;;  %v3902_v39 = vrot.slane %v3706_v61, 7 }
 0x8b7   :  { %3717 = vst [vmem:[#allocation2 + $0x18] sm:$0x1] %v3707_v34  ;;  %v3903_v33 = vrot.slane %v3707_v34, 7 }
 0x8b8   :  { %v3907_v50 = vsel %vm3906_vm1, %v3710_v19, %v3902_v39  ;;  %v4088_v19 = vunpack.c.l.s4 %v5339_v29  ;;  %v4864_v29 = vld [vmem:[%s7699_s10 + $0x40] sm:$0xff]  }
 0x8b9   :  { %v3908_v25 = vsel %vm3906_vm1, %v3711_v59, %v3903_v33  ;;  %v3909_v36 = vpack.c.bf16 %v3907_v50, %v3907_v50  ;;  %v4609_v59 = vld [vmem:[%s7697_s6] ss:$0 sm:$0xff]  ;;  %4709 = vmatprep.subr.bf16.mxu0 %v4864_v29  ;;  %v21_v29 = vstv %s7700_s15 }
 0x8ba   :  { %v3910_v3 = vpack.c.bf16 %v3908_v25, %v3908_v25  ;;  %v4089_v31 = vunpack.c.0.s8 %v4088_v19  ;;  %v4865_v19 = vld [vmem:[%s7699_s10] sm:$0xff]   ;;  %22 = vst [vmem:[#allocation3] sm:$0x1] %v21_v29 }
 0x8bc   :  { %4078 = vmatprep.mubr.bf16.mxu1 %v3910_v3  ;;  %v4092_v27 = vsub.s32 %v4089_v31, %v8202_v24  ;;  %v4866_v31 = vld [vmem:[%s7699_s10 + $0x48] sm:$0xff]  }
 0x8bd   :  { %4079 = vmatmul.mubr.bf16.vlgmr.msra.gmra.mrb[72].mxu1 %v3909_v36  ;;  %v7587_v44 = vld [vmem:[#allocation2 + $0x8] sm:$0xff] }
 0x8be   :  { %v7589_v55 = vld [vmem:[#allocation2 + $0x18] sm:$0xff] }
 0x8bf   :  { %v3723_v16 = vpack.c.bf16 %v7589_v55, %v7587_v44 }
 0x8c1   :  { %3891 = vmatprep.mubr.bf16.mxu0 %v3723_v16 }
 0x8c2   :  { %3892 = vmatmul.mubr.bf16.vlgmr.msra.gmra.mrb[72].mxu0 %v3722_v52 }
 0x8c3   :  { %4710 = vmatpush3.bf16.msra.mxu0 %v4865_v19 }
 0x8c4   :  { %4711 = vmatprep.subr.bf16.mxu0 %v4866_v31  ;;  %v4644_v31 = vld [vmem:[%s7701_s11] ss:$0 sm:$0xff] }
 0x990   :  { %v4703_v12 = vpop.f32.mrb[72].mxu1 }
 0x991   :  { %v4704_v0 = vpop.f32.mrb[73].mxu1 }
 0x992   :  { %v4705_v42 = vadd.f32 %v4704_v0, %v4703_v12  ;;  %v4706_v9 = vpop.f32.mrb[74].mxu1  ;;  %v4867_v12 = vld [vmem:[%s7699_s10 + $0x8] sm:$0xff]  }
 0x993   :  { %v4707_v32 = vpop.f32.mrb[75].mxu1  ;;  %4712 = vmatpush3.bf16.msra.mxu0 %v4867_v12 }
 0x994   :  { %v4081_v10 = vadd.f32 %v4705_v42, %v4626_v38  ;;  %v4868_v32 = vld [vmem:[%s7699_s10 + $0x50] sm:$0xff]  }
 0x995   :  { %v4681_v28 = vpop.f32.mrb[72].mxu0  ;;  %4713 = vmatprep.subr.bf16.mxu0 %v4868_v32 }
 0x996   :  { %v4093_v17 = vrot.slane %v4081_v10, %v4092_v27  ;;  %v4682_v14 = vpop.f32.mrb[73].mxu0  ;;  %v4869_v10 = vld [vmem:[%s7699_s10 + $0x10] sm:$0xff]  }
 0x997   :  { %v4683_v26 = vadd.f32 %v4682_v14, %v4681_v28  ;;  %v4684_v48 = vpop.f32.mrb[74].mxu0  ;;  %4714 = vmatpush3.bf16.msra.mxu0 %v4869_v10  ;;  %v4870_v28 = vld [vmem:[%s7699_s10 + $0x58] sm:$0xff]   ;;  %v4873_v14 = vld [vmem:[%s7699_s10 + $0x20] sm:$0xff]  }
 0x998   :  { %v4094_v2 = vcombine.high %v4093_v17, %v4093_v17  ;;  %v4101_v63 = vrot.slane %v4093_v17, %v4092_v27  ;;  %v4685_v45 = vpop.f32.mrb[75].mxu0  ;;  %v4871_v17 = vld [vmem:[%s7699_s10 + $0x18] sm:$0xff]   ;;  %4715 = vmatprep.subr.bf16.mxu0 %v4870_v28  ;;  %v4663_v28 = vld [vmem:[%s7704_s14] ss:$0 sm:$0xff] }
 0x999   :  { %v3894_v40 = vadd.f32 %v4683_v26, %v4609_v59  ;;  %v4686_v62 = vadd.f32 %v4685_v45, %v4684_v48  ;;  %v4874_v26 = vld [vmem:[%s7699_s10 + $0x68] sm:$0xff]   ;;  %v4878_v45 = vld [vmem:[%s7699_s10 + $0x78] sm:$0xff]  }
 0x99a   :  { %v4112_v49 = vrot.slane %v4101_v63, %v8203_v8  ;;  %v4108_v21 = vrot.slane %v4094_v2, %v4092_v27  ;;  %v4875_v48 = vld [vmem:[%s7699_s10 + $0x28] sm:$0xff]   ;;  %v4876_v2 = vld [vmem:[%s7699_s10 + $0x70] sm:$0xff]  }
 0x99b   :  { %v3897_v41 = vadd.f32 %v4686_v62, %v4609_v59  ;;  %4716 = vmatpush3.bf16.msra.mxu0 %v4871_v17  ;;  %v4872_v59 = vld [vmem:[%s7699_s10 + $0x60] sm:$0xff]   ;;  %v4877_v63 = vld [vmem:[%s7699_s10 + $0x30] sm:$0xff]  }
 0x99c   :  { %v4119_v11 = vadd.f32 %v4112_v49, %v3894_v40  ;;  %v4116_v51 = vrot.slane %v4108_v21, %v8203_v8  ;;  %4717 = vmatprep.subr.bf16.mxu0 %v4872_v59  ;;  %v4879_v40 = vld [vmem:[%s7699_s10 + $0x38] sm:$0xff]  }
 0x99e   :  { %5200 = vtanh.f32 %v4119_v11  ;;  %v4120_v60 = vadd.f32 %v4116_v51, %v3897_v41 }
 0x99f   :  { %4718 = vmatpush3.bf16.msra.mxu0 %v4873_v14 }
 0x9a0   :  { %5202 = vtanh.f32 %v4120_v60  ;;  %4719 = vmatprep.subr.bf16.mxu0 %v4874_v26  ;;  %v4664_v26 = vld [vmem:[#allocation3] ss:$0 sm:$0xff] }
 0x9a3   :  { %4720 = vmatpush3.bf16.msra.mxu0 %v4875_v48 }
 0x9a4   :  { %4721 = vmatprep.subr.bf16.mxu0 %v4876_v2 }
 0x9a7   :  { %4722 = vmatpush3.bf16.msra.mxu0 %v4877_v63 }
 0x9a8   :  { %v5201_v58 = vpop.eup %5200  ;;  %4723 = vmatprep.subr.bf16.mxu0 %v4878_v45 }
 0x9a9   :  { %v4130_v47 = vmul.f32 %v5201_v58, %v4643_v30 }
 0x9aa   :  { %v5203_v37 = vpop.eup %5202 }
 0x9ab   :  { %4132 = vadd.xlane.f32.xlu0 %v4130_v47  ;;  %v4131_v18 = vmul.f32 %v5203_v37, %v4643_v30  ;;  %4724 = vmatpush3.bf16.msra.mxu0 %v4879_v40 }
 0x9af   :  { %4134 = vadd.xlane.f32.xlu0 %v4131_v18 }
 0xa38   :  { %v4133_v15 = vpop.xlane.xlu0 %4132 }
 0xa39   :  { %v4143_v43 = vrot.slane %v4133_v15, %v4142_v35 }
 0xa3c   :  { %v4135_v4 = vpop.xlane.xlu0 %4134 }
 0xa3d   :  { %v4147_v5 = vrot.slane %v4135_v4, %v4142_v35 }
 0xa3f   :  { %v4148_v20 = vsel %vm1351_vm0, %v4147_v5, %v4143_v43 }
 0xa40   :  { %v4151_v46 = vsel %vm4150_vm2, %v4148_v20, -inf }
 0xa41   :  { %4152 = vmax.xlane.f32.xlu1 %v4151_v46 }
 0xace   :  { %v4153_v53 = vpop.xlane.xlu1 %4152 }
 0xacf   :  { %v4158_v54 = vrot.slane %v4153_v53, %v8203_v8  ;;  %v4162_v7 = vrot.slane %v4153_v53, %v8205_v56 }
 0xad1   :  { %v4165_v6 = vsub.f32 %v4133_v15, %v4158_v54  ;;  %v4166_v23 = vsub.f32 %v4135_v4, %v4162_v7 }
 0xad3   :  { %v4167_v61 = vmul.f32 1.442695, %v4165_v6  ;;  %v4169_v34 = vmul.f32 1.442695, %v4166_v23 }
 0xad5   :  { %5204 = vpow2.f32 %v4167_v61 }
 0xad6   :  { %5206 = vpow2.f32 %v4169_v34 }
 0xadf   :  { %v5205_v39 = vpop.eup %5204 }
 0xae0   :  { %v5207_v33 = vpop.eup %5206  ;;  %4174 = vperm.xlu1 %4733, %v5205_v39  }
 0xae1   :  { %4177 = vperm.xlu0 %4734, %v5207_v33  }
 0xb5f   :  { %v4175_v50 = vpop.permute.xlu1 %4174 }
 0xb60   :  { %v4178_v25 = vpop.permute.xlu0 %4177  ;;  %v4182_v3 = vrot.slane %v4175_v50, %v4142_v35 }
 0xb61   :  { %v4186_v36 = vrot.slane %v4178_v25, %v4142_v35 }
 0xb63   :  { %v4187_v16 = vsel %vm1351_vm0, %v4186_v36, %v4182_v3 }
 0xb64   :  { %v4189_v52 = vsel %vm4150_vm2, %v4187_v16, 0.0 }
 0xb65   :  { %4190 = vadd.xlane.f32.xlu1 %v4189_v52 }
 0xbf2   :  { %v4191_v38 = vpop.xlane.xlu1 %4190 }
 0xbf3   :  { %5208 = vrcp.f32 %v4191_v38 }
 0xbfd   :  { %v5209_v0 = vpop.eup %5208 }
 0xbfe   :  { %v4197_v42 = vrot.slane %v5209_v0, %v8203_v8  ;;  %v4201_v27 = vrot.slane %v5209_v0, %v8205_v56 }
 0xc00   :  { %v4204_v24 = vmul.f32 %v5205_v39, %v4197_v42  ;;  %v4205_v9 = vmul.f32 %v5207_v33, %v4201_v27  ;;  %v4661_v42 = vld [vmem:[%s7702_s12] ss:$0 sm:$0xff] }
 0xc02   :  { %4208 = vperm.xlu0 %4734, %v4204_v24  }
 0xc06   :  { %4213 = vperm.xlu0 %4734, %v4205_v9   ;;  %v4662_v9 = vld [vmem:[%s7703_s13] ss:$0 sm:$0xff] }
 0xc81   :  { %v4209_v62 = vpop.permute.xlu0 %4208 }
 0xc82   :  { %v4216_v8 = vmul.f32 %v4209_v62, %v7583_v22  ;;  %v4217_v49 = vmul.f32 %v4209_v62, %v7587_v44 }
 0xc84   :  { %v4220_v21 = vrot.slane %v4216_v8, 4  ;;  %v4226_v41 = vrot.slane %v4217_v49, 4 }
 0xc85   :  { %v4214_v11 = vpop.permute.xlu0 %4213 }
 0xc86   :  { %v4221_v51 = vadd.f32 %v4220_v21, %v4216_v8  ;;  %v4227_v60 = vadd.f32 %v4226_v41, %v4217_v49  ;;  %v4218_v30 = vmul.f32 %v4214_v11, %v7585_v1  ;;  %v4219_v58 = vmul.f32 %v4214_v11, %v7589_v55 }
 0xc88   :  { %v4222_v47 = vrot.slane %v4221_v51, 2  ;;  %v4228_v37 = vrot.slane %v4227_v60, 2  ;;  %v4232_v18 = vrot.slane %v4218_v30, 4  ;;  %v4238_v13 = vrot.slane %v4219_v58, 4 }
 0xc8a   :  { %v4223_v57 = vadd.f32 %v4222_v47, %v4221_v51  ;;  %v4229_v15 = vadd.f32 %v4228_v37, %v4227_v60  ;;  %v4233_v35 = vadd.f32 %v4232_v18, %v4218_v30  ;;  %v4239_v4 = vadd.f32 %v4238_v13, %v4219_v58 }
 0xc8c   :  { %v4224_v22 = vrot.slane %v4223_v57, 1  ;;  %v4230_v43 = vrot.slane %v4229_v15, 1  ;;  %v4234_v44 = vrot.slane %v4233_v35, 2  ;;  %v4240_v5 = vrot.slane %v4239_v4, 2 }
 0xc8e   :  { %v4225_v20 = vadd.f32 %v4224_v22, %v4223_v57  ;;  %v4231_v46 = vadd.f32 %v4230_v43, %v4229_v15  ;;  %v4235_v53 = vadd.f32 %v4234_v44, %v4233_v35  ;;  %v4241_v54 = vadd.f32 %v4240_v5, %v4239_v4 }
 0xc90   :  { %v4236_v56 = vrot.slane %v4235_v53, 1  ;;  %v4242_v1 = vrot.slane %v4241_v54, 1  ;;  %v4244_v7 = vpack.c.bf16 %v4225_v20, %v4225_v20  ;;  %v4245_v55 = vpack.c.bf16 %v4231_v46, %v4231_v46 }
 0xc92   :  { %v4237_v6 = vadd.f32 %v4236_v56, %v4235_v53  ;;  %v4243_v23 = vadd.f32 %v4242_v1, %v4241_v54  ;;  %v4291_v39 = vunpack.c.l.b16 %v4244_v7  ;;  %v4292_v25 = vunpack.c.l.b16 %v4245_v55 }
 0xc94   :  { %v4246_v61 = vpack.c.bf16 %v4237_v6, %v4237_v6  ;;  %v4247_v34 = vpack.c.bf16 %v4243_v23, %v4243_v23 }
 0xc96   :  { %v4293_v33 = vunpack.c.l.b16 %v4246_v61  ;;  %v4294_v50 = vunpack.c.l.b16 %v4247_v34 }
 0xc98   :  { %v4296_v3 = vsel %vm1351_vm0, %v4294_v50, %v4292_v25  ;;  %v4295_v36 = vsel %vm1351_vm0, %v4293_v33, %v4291_v39 }
 0xc99   :  { %v4298_v16 = vpack.c.b16 %v4296_v3, %v4296_v3  ;;  %v4297_v52 = vpack.c.b16 %v4295_v36, %v4295_v36 }
 0xc9b   :  { %4429 = vmatprep.mubr.bf16.mxu0 %v4298_v16 }
 0xc9c   :  { %4430 = vmatmul.mubr.bf16.vlgmr.msra.gmra.mrb[76].mxu0 %v4297_v52 }
 0xd6f   :  { %v4725_v19 = vpop.f32.mrb[76].mxu0 }
 0xd70   :  { %v4726_v12 = vpop.f32.mrb[77].mxu0 }
 0xd71   :  { %v4727_v38 = vadd.f32 %v4726_v12, %v4725_v19  ;;  %v4728_v0 = vpop.f32.mrb[78].mxu0 }
 0xd72   :  { %v4729_v24 = vpop.f32.mrb[79].mxu0 }
 0xd73   :  { %v4432_v27 = vadd.f32 %v4727_v38, %v4644_v31 }
 0xd75   :  { %v4444_v32 = vmul.f32 %v4661_v42, %v4432_v27 }
 0xd77   :  { %v4452_v10 = vadd.f32 %v4662_v9, %v4444_v32 }
 0xd79   :  { %v4453_v17 = vmax.f32 %v4452_v10, 0.0 }
 0xd7b   :  { %v4461_v59 = vmul.f32 %v4663_v28, %v4453_v17 }
 0xd7d   :  { %v4463_v14 = vsel %vm4462_vm3, %v4461_v59, 0.0 }
 0xd7e   :  { %4464 = vadd.xlane.f32.xlu1 %v4463_v14 }
 0xe0b   :  { %v4465_v48 = vpop.xlane.xlu1 %4464 }
 0xe0c   :  { %v4473_v2 = vadd.f32 %v4664_v26, %v4465_v48 }
 0xe0e   :  { %4475 = vst.msk [vmem:[%s7705_s16] sm:$0x3] %vm4474_vm4, %v4473_v2 }

</bundles_post_ra>
